<compile_context>
chip_gen: v7x
topology: tpu7x:2x2x1
jax: 0.10.0
libtpu: 0.0.40
codegen_flags: <defaults>
</compile_context>

<pallas_src>
import functools

import jax
import jax.numpy as jnp
import numpy as np
from jax.experimental import pallas as pl
from jax.experimental.pallas import tpu as pltpu

_CONV_CHANNELS = [(1, 30), (30, 60), (60, 80), (80, 100), (100, 40)]
_BN_EPS = 1e-5
_CP = 128          # channel lanes for the GEMM layers (zero-padded to one vreg width)
_NUM_TAPS = 5      # conv kernel height


# ----------------------------- static geometry ------------------------------

def _layer_dims(W):
    """Per conv layer: (padded width == conv output width, pool stride, pooled width)."""
    dims = []
    win = W
    for i in range(len(_CONV_CHANNELS)):
        wp = win + 2                           # width pad 1 each side, kernel width 1
        stride = 2 if i < 4 else 1             # layer5: MaxPool((1,2), stride=(1,1))
        wo = wp // 2 if stride == 2 else wp - 1
        dims.append((wp, stride, wo))
        win = wo
    return dims


def _make_pool_selectors(H, dims):
    """One 0/1 matrix per layer folding (pool-row select + zero halo + scatter) into a GEMM.

    The MaxPool((1,2)) max itself is computed on the VPU as max(act[:-1], act[1:]);
    sel[l] (rows_dst, H*Wp-1) then picks pair-max row h*Wp + stride*j (exactly one 1.0
    per selected row).  All-zero rows of sel produce the next layer's conv zero halo,
    so the padded buffer is rebuilt exactly every sample.  Selected columns never hit
    the dropped last pair-max row, so the construction is exact.
    """
    sels = []
    n_layers = len(dims)
    for i, (wp, stride, wo) in enumerate(dims):
        cols = H * wp - 1
        last = i == n_layers - 1
        rows = H * wo if last else (H + 4) * dims[i + 1][0]
        s = np.zeros((rows, cols), np.float32)
        for h in range(H):
            for j in range(wo):
                r = h * wo + j if last else (h + 2) * dims[i + 1][0] + (j + 1)
                s[r, h * wp + stride * j] = 1.0
        sels.append(jnp.asarray(s, dtype=jnp.bfloat16))
    return tuple(sels)


# ----------------------------- Pallas kernels ------------------------------

def _make_conv_stack_kernel(H, dims):
    """Fused 5-layer conv/BN/ReLU/pool stack for one batch sample."""
    n_layers = len(dims)
    c_last = _CONV_CHANNELS[-1][1]

    def kernel(x_ref, w1_ref, w_ref, shift_ref, *rest):
        sel_refs = rest[:n_layers]
        o_ref = rest[n_layers]
        p_refs = rest[n_layers + 1:]          # VMEM scratch: padded inputs of layers 2..5

        # ---- layer 1 (cin == 1): 5 per-tap broadcast multiplies on the VPU ----
        wp0, _, _ = dims[0]
        hwp = H * wp0
        acc = x_ref[pl.ds(0, hwp), :] * w1_ref[0]                 # (hwp,1)*(1,128) f32
        for kh in range(1, _NUM_TAPS):
            acc = acc + x_ref[pl.ds(kh * wp0, hwp), :] * w1_ref[kh]
        act = jnp.maximum(acc + shift_ref[0], 0.0)                # BN/bias shift + ReLU
        pm = jnp.maximum(act[:-1, :], act[1:, :]).astype(jnp.bfloat16)   # MaxPool pair-max
        p_refs[0][...] = jnp.dot(sel_refs[0][...], pm,            # select + halo + scatter
                                 preferred_element_type=jnp.float32).astype(jnp.bfloat16)

        # ---- layers 2..5: one K=640 GEMM per layer (5 taps fused along K) ----
        for layer in range(1, n_layers):
            wp, _, _ = dims[layer]
            hwp = H * wp
            src = p_refs[layer - 1]
            cat = jnp.concatenate(
                [src[pl.ds(kh * wp, hwp), :] for kh in range(_NUM_TAPS)], axis=1)
            acc = jnp.dot(cat, w_ref[layer - 1],                  # bf16 GEMM, f32 accum
                          preferred_element_type=jnp.float32)
            act = jnp.maximum(acc + shift_ref[layer], 0.0)        # conv -> BN -> ReLU
            pm = jnp.maximum(act[:-1, :], act[1:, :]).astype(jnp.bfloat16)
            sel = jnp.dot(sel_refs[layer][...], pm,
                          preferred_element_type=jnp.float32)
            if layer == n_layers - 1:
                o_ref[...] = sel[:, :c_last].astype(o_ref.dtype)  # lane-compact feature
            else:
                p_refs[layer][...] = sel.astype(jnp.bfloat16)

    return kernel


def _make_fc_stack_kernel(num_classes):
    def kernel(x_ref, w1_ref, b1_ref, w2_ref, b2_ref, w3_ref, b3_ref, o_ref):
        h = jnp.dot(x_ref[...], w1_ref[...], preferred_element_type=jnp.float32)
        h = jnp.maximum(h + b1_ref[...], 0.0)
        # TODO(synk): F.dropout(p=0.3) after fc1/fc2 ReLU is an inference-mode identity.
        h = jnp.dot(h.astype(jnp.bfloat16), w2_ref[...], preferred_element_type=jnp.float32)
        h = jnp.maximum(h + b2_ref[...], 0.0)
        h = jnp.dot(h.astype(jnp.bfloat16), w3_ref[...], preferred_element_type=jnp.float32)
        h = jnp.maximum(h + b3_ref[...], 0.0)          # reference forward ReLUs fc3 too
        o_ref[...] = h[:, :num_classes].astype(o_ref.dtype)
    return kernel


# ------------------------------- wrappers ----------------------------------

def conv_stack(xpad, conv_params, H, dims):
    N, rows_in, _ = xpad.shape
    wf = dims[-1][2]
    c_last = _CONV_CHANNELS[-1][1]
    sels = conv_params["sel"]

    in_specs = [
        pl.BlockSpec((None, rows_in, 1), lambda n: (n, 0, 0)),
        pl.BlockSpec(conv_params["w1"].shape, lambda n: (0, 0, 0)),
        pl.BlockSpec(conv_params["w"].shape, lambda n: (0, 0, 0)),
        pl.BlockSpec(conv_params["shift"].shape, lambda n: (0, 0, 0)),
    ] + [pl.BlockSpec(s.shape, lambda n: (0, 0)) for s in sels]

    # VMEM-resident padded activation buffers for layers 2..5 (bf16).
    scratch = [pltpu.VMEM(((H + 4) * dims[i][0], _CP), jnp.bfloat16)
               for i in range(1, len(dims))]

    gemm_flops = sum(2 * (H * dims[i][0]) * (_NUM_TAPS * _CP) * _CP
                     for i in range(1, len(dims)))
    sel_flops = sum(2 * s.shape[0] * s.shape[1] * _CP for s in sels)
    l1_flops = 2 * _NUM_TAPS * (H * dims[0][0]) * _CP
    bytes_accessed = (conv_params["w"].size * 2 + conv_params["w1"].size * 4 +
                      conv_params["shift"].size * 4 + sum(s.size * 2 for s in sels) +
                      xpad.size * 4 + N * H * wf * c_last * 2)

    return pl.pallas_call(
        _make_conv_stack_kernel(H, dims),
        out_shape=jax.ShapeDtypeStruct((N, H * wf, c_last), jnp.bfloat16),
        grid_spec=pltpu.PrefetchScalarGridSpec(
            num_scalar_prefetch=0,
            grid=(N,),
            in_specs=in_specs,
            out_specs=pl.BlockSpec((None, H * wf, c_last), lambda n: (n, 0, 0)),
            scratch_shapes=scratch,
        ),
        compiler_params=pltpu.CompilerParams(dimension_semantics=("parallel",)),
        cost_estimate=pl.CostEstimate(
            flops=int(N * (gemm_flops + sel_flops + l1_flops)),
            transcendentals=0,
            bytes_accessed=int(bytes_accessed)),
    )(xpad, conv_params["w1"], conv_params["w"], conv_params["shift"], *sels)


def fc_stack(feat, fc_params, num_classes):
    N, K = feat.shape
    f1 = fc_params["w1"].shape[1]
    f2 = fc_params["w2"].shape[1]
    f3 = fc_params["w3"].shape[1]
    flops = 2 * N * (K * f1 + f1 * f2 + f2 * f3)
    bytes_accessed = (feat.size * 2 + fc_params["w1"].size * 2 +
                      fc_params["w2"].size * 2 + fc_params["w3"].size * 2 +
                      fc_params["b1"].size * 4 + fc_params["b2"].size * 4 +
                      fc_params["b3"].size * 4 + N * num_classes * 4)
    # Gridless call: whole (tiny) operands live in VMEM; single launch for all 3 FCs.
    return pl.pallas_call(
        _make_fc_stack_kernel(num_classes),
        out_shape=jax.ShapeDtypeStruct((N, num_classes), jnp.float32),
        cost_estimate=pl.CostEstimate(flops=int(flops), transcendentals=0,
                                      bytes_accessed=int(bytes_accessed)),
    )(feat, fc_params["w1"], fc_params["b1"], fc_params["w2"], fc_params["b2"],
      fc_params["w3"], fc_params["b3"])


# ------------------------- parameters & forward -----------------------------

def init_params(key, input_hw, num_classes=6, fc1_out=512, fc2_out=256):
    """Deterministic synthetic parameters, pre-padded / pre-folded for the kernels."""
    H, W = input_hw
    dims = _layer_dims(W)

    w1_l1 = None
    w_fused, shift_all = [], []
    for li, (cin, cout) in enumerate(_CONV_CHANNELS):
        key, kw, kb, kg, kbe, km, kv = jax.random.split(key, 7)
        w = jax.random.normal(kw, (_NUM_TAPS, cin, cout), jnp.float32) / jnp.sqrt(5.0 * cin)
        bias = jax.random.normal(kb, (cout,), jnp.float32) * 0.05
        gamma = jax.random.uniform(kg, (cout,), jnp.float32, 0.5, 1.5)
        beta = jax.random.normal(kbe, (cout,), jnp.float32) * 0.05
        mean = jax.random.normal(km, (cout,), jnp.float32) * 0.05
        var = jax.random.uniform(kv, (cout,), jnp.float32, 0.5, 1.5)
        scale = gamma / jnp.sqrt(var + _BN_EPS)               # BN running-stats fold
        shift = beta + scale * (bias - mean)                  # includes conv bias
        w = w * scale[None, None, :]                          # scale folded into weights
        shift_all.append(jnp.zeros((_CP,), jnp.float32).at[:cout].set(shift))
        if li == 0:
            # layer 1 (cin=1): kept f32 for the VPU broadcast path, no cin padding
            w1_l1 = jnp.zeros((_NUM_TAPS, 1, _CP), jnp.float32).at[:, :, :cout].set(w)
        else:
            # layers 2..5: pad (cin,cout) to 128 lanes and stack the 5 taps along K
            wpad = jnp.zeros((_NUM_TAPS, _CP, _CP), jnp.float32).at[:, :cin, :cout].set(w)
            w_fused.append(wpad.reshape(_NUM_TAPS * _CP, _CP))

    conv = {
        "w1": w1_l1,                                          # (5, 1, 128) f32
        "w": jnp.stack(w_fused).astype(jnp.bfloat16),         # (4, 640, 128) bf16
        "shift": jnp.stack(shift_all)[:, None, :],            # (5, 1, 128) f32
        "sel": _make_pool_selectors(H, dims),                 # single selection GEMMs
    }

    # FC stack — fc1 stored COMPACT: rows in (h, w, c) order over the 40 real channels
    # of layer 5 (a row permutation of a PyTorch (c,h,w)-flattened weight), so the
    # lane-compact kernel-A output feeds it with a free reshape and no zero rows.
    wf = dims[-1][2]
    c_last = _CONV_CHANNELS[-1][1]
    flat = H * wf * c_last

    key, kw, kb = jax.random.split(key, 3)
    bound = 1.0 / jnp.sqrt(float(flat))
    w1 = jax.random.uniform(kw, (H, wf, c_last, fc1_out), jnp.float32, -bound, bound)
    w1 = w1.reshape(flat, fc1_out)
    b1 = jax.random.uniform(kb, (1, fc1_out), jnp.float32, -bound, bound)

    key, kw, kb = jax.random.split(key, 3)
    bound = 1.0 / jnp.sqrt(float(fc1_out))
    w2 = jax.random.uniform(kw, (fc1_out, fc2_out), jnp.float32, -bound, bound)
    b2 = jax.random.uniform(kb, (1, fc2_out), jnp.float32, -bound, bound)

    key, kw, kb = jax.random.split(key, 3)
    bound = 1.0 / jnp.sqrt(float(fc2_out))
    w3 = jax.random.uniform(kw, (fc2_out, num_classes), jnp.float32, -bound, bound)
    b3 = jax.random.uniform(kb, (1, num_classes), jnp.float32, -bound, bound)
    w3 = jnp.zeros((fc2_out, _CP), jnp.float32).at[:, :num_classes].set(w3)
    b3 = jnp.zeros((1, _CP), jnp.float32).at[:, :num_classes].set(b3)

    fc = {
        "w1": w1.astype(jnp.bfloat16), "b1": b1,              # (1280, 512) bf16 compact
        "w2": w2.astype(jnp.bfloat16), "b2": b2,
        "w3": w3.astype(jnp.bfloat16), "b3": b3,
    }
    return {"conv": conv, "fc": fc}


@functools.partial(jax.jit, static_argnames="num_classes")
def convnet_forward(x_nchw, params, *, num_classes=6):
    N, C, H, W = x_nchw.shape
    assert C == 1, "ConvNet takes single-channel input"
    dims = _layer_dims(W)
    # Single-channel input: reshape (free) + zero-pad (H by 2, W by 1) + flatten the
    # padded (H+4, W+2) grid into one row axis -> one tiny XLA pad fusion; the
    # per-sample DMA into kernel A is just (H+4)*(W+2) f32 scalars (no lane padding).
    x = x_nchw.reshape(N, H, W)
    x = jnp.pad(x, ((0, 0), (2, 2), (1, 1)))
    x = x.reshape(N, (H + 4) * (W + 2), 1)

    feat = conv_stack(x, params["conv"], H, dims)             # (N, H*Wf, 40) bf16
    feat = feat.reshape(N, -1)                                # free bitcast -> (N, 1280)
    return fc_stack(feat, params["fc"], num_classes)          # (N, num_classes) f32


# ---------------------------------- main ------------------------------------

if __name__ == "__main__":
    N, C, H, W = 2, 1, 8, 18                                  # small synthetic shapes
    num_classes = 6

    key = jax.random.PRNGKey(0)
    key, kx, kp = jax.random.split(key, 3)
    x = jax.random.normal(kx, (N, C, H, W), dtype=jnp.float32)    # NCHW like PyTorch
    params = init_params(kp, (H, W), num_classes=num_classes)

    out = convnet_forward(x, params, num_classes=num_classes)
    out = jax.block_until_ready(out)
    assert out.shape == (N, num_classes)
    assert bool(jnp.all(jnp.isfinite(out))) and bool(jnp.all(out >= 0.0))
    print("KERNEL_OK")
</pallas_src>

<mosaic_0001>
module attributes {stable_mosaic.version = 11 : i64} {
  func.func @kernel(%arg0: i32, %arg1: memref<1x240x1xf32, #tpu.memory_space<vmem>>, %arg2: memref<5x1x128xf32, #tpu.memory_space<vmem>>, %arg3: memref<4x640x128xbf16, #tpu.memory_space<vmem>>, %arg4: memref<5x1x128xf32, #tpu.memory_space<vmem>>, %arg5: memref<144x159xbf16, #tpu.memory_space<vmem>>, %arg6: memref<96x95xbf16, #tpu.memory_space<vmem>>, %arg7: memref<72x63xbf16, #tpu.memory_space<vmem>>, %arg8: memref<60x47xbf16, #tpu.memory_space<vmem>>, %arg9: memref<32x39xbf16, #tpu.memory_space<vmem>>, %arg10: memref<1x32x40xbf16, #tpu.memory_space<vmem>>, %arg11: memref<144x128xbf16, #tpu.memory_space<vmem>>, %arg12: memref<96x128xbf16, #tpu.memory_space<vmem>>, %arg13: memref<72x128xbf16, #tpu.memory_space<vmem>>, %arg14: memref<60x128xbf16, #tpu.memory_space<vmem>>) attributes {dimension_semantics = [#tpu.dimension_semantics<parallel>], iteration_bounds = array<i64: 2>, scalar_prefetch = 0 : i64, scratch_operands = 4 : i64, tpu.core_type = #tpu.core_type<tc>, window_params = [{transform_indices = @transform_0, window_bounds = array<i64: 1, 240, 1>}, {pipeline_mode = #tpu.pipeline_mode<synchronous>, transform_indices = @transform_1, window_bounds = array<i64: 5, 1, 128>}, {pipeline_mode = #tpu.pipeline_mode<synchronous>, transform_indices = @transform_2, window_bounds = array<i64: 4, 640, 128>}, {pipeline_mode = #tpu.pipeline_mode<synchronous>, transform_indices = @transform_3, window_bounds = array<i64: 5, 1, 128>}, {pipeline_mode = #tpu.pipeline_mode<synchronous>, transform_indices = @transform_4, window_bounds = array<i64: 144, 159>}, {pipeline_mode = #tpu.pipeline_mode<synchronous>, transform_indices = @transform_5, window_bounds = array<i64: 96, 95>}, {pipeline_mode = #tpu.pipeline_mode<synchronous>, transform_indices = @transform_6, window_bounds = array<i64: 72, 63>}, {pipeline_mode = #tpu.pipeline_mode<synchronous>, transform_indices = @transform_7, window_bounds = array<i64: 60, 47>}, {pipeline_mode = #tpu.pipeline_mode<synchronous>, transform_indices = @transform_8, window_bounds = array<i64: 32, 39>}, {transform_indices = @transform_9, window_bounds = array<i64: 1, 32, 40>}]} {
    %c0 = arith.constant 0 : index
    %c0_0 = arith.constant 0 : index
    %c0_1 = arith.constant 0 : index
    %0 = vector.load %arg1[%c0, %c0_0, %c0_1] : memref<1x240x1xf32, #tpu.memory_space<vmem>>, vector<1x160x1xf32>
    %1 = vector.shape_cast %0 : vector<1x160x1xf32> to vector<160x1xf32>
    %c0_2 = arith.constant 0 : index
    %c0_3 = arith.constant 0 : index
    %c0_4 = arith.constant 0 : index
    %2 = vector.load %arg2[%c0_2, %c0_3, %c0_4] : memref<5x1x128xf32, #tpu.memory_space<vmem>>, vector<1x1x128xf32>
    %3 = vector.shape_cast %2 : vector<1x1x128xf32> to vector<1x128xf32>
    %4 = vector.broadcast %1 : vector<160x1xf32> to vector<160x128xf32>
    %5 = vector.broadcast %3 : vector<1x128xf32> to vector<160x128xf32>
    %6 = arith.mulf %4, %5 : vector<160x128xf32>
    %c0_5 = arith.constant 0 : index
    %c20 = arith.constant 20 : index
    %c0_6 = arith.constant 0 : index
    %7 = vector.load %arg1[%c0_5, %c20, %c0_6] : memref<1x240x1xf32, #tpu.memory_space<vmem>>, vector<1x160x1xf32>
    %8 = vector.shape_cast %7 : vector<1x160x1xf32> to vector<160x1xf32>
    %c1 = arith.constant 1 : index
    %c0_7 = arith.constant 0 : index
    %c0_8 = arith.constant 0 : index
    %9 = vector.load %arg2[%c1, %c0_7, %c0_8] : memref<5x1x128xf32, #tpu.memory_space<vmem>>, vector<1x1x128xf32>
    %10 = vector.shape_cast %9 : vector<1x1x128xf32> to vector<1x128xf32>
    %11 = vector.broadcast %8 : vector<160x1xf32> to vector<160x128xf32>
    %12 = vector.broadcast %10 : vector<1x128xf32> to vector<160x128xf32>
    %13 = arith.mulf %11, %12 : vector<160x128xf32>
    %14 = arith.addf %6, %13 : vector<160x128xf32>
    %c0_9 = arith.constant 0 : index
    %c40 = arith.constant 40 : index
    %c0_10 = arith.constant 0 : index
    %15 = vector.load %arg1[%c0_9, %c40, %c0_10] : memref<1x240x1xf32, #tpu.memory_space<vmem>>, vector<1x160x1xf32>
    %16 = vector.shape_cast %15 : vector<1x160x1xf32> to vector<160x1xf32>
    %c2 = arith.constant 2 : index
    %c0_11 = arith.constant 0 : index
    %c0_12 = arith.constant 0 : index
    %17 = vector.load %arg2[%c2, %c0_11, %c0_12] : memref<5x1x128xf32, #tpu.memory_space<vmem>>, vector<1x1x128xf32>
    %18 = vector.shape_cast %17 : vector<1x1x128xf32> to vector<1x128xf32>
    %19 = vector.broadcast %16 : vector<160x1xf32> to vector<160x128xf32>
    %20 = vector.broadcast %18 : vector<1x128xf32> to vector<160x128xf32>
    %21 = arith.mulf %19, %20 : vector<160x128xf32>
    %22 = arith.addf %14, %21 : vector<160x128xf32>
    %c0_13 = arith.constant 0 : index
    %c60 = arith.constant 60 : index
    %c0_14 = arith.constant 0 : index
    %23 = vector.load %arg1[%c0_13, %c60, %c0_14] : memref<1x240x1xf32, #tpu.memory_space<vmem>>, vector<1x160x1xf32>
    %24 = vector.shape_cast %23 : vector<1x160x1xf32> to vector<160x1xf32>
    %c3 = arith.constant 3 : index
    %c0_15 = arith.constant 0 : index
    %c0_16 = arith.constant 0 : index
    %25 = vector.load %arg2[%c3, %c0_15, %c0_16] : memref<5x1x128xf32, #tpu.memory_space<vmem>>, vector<1x1x128xf32>
    %26 = vector.shape_cast %25 : vector<1x1x128xf32> to vector<1x128xf32>
    %27 = vector.broadcast %24 : vector<160x1xf32> to vector<160x128xf32>
    %28 = vector.broadcast %26 : vector<1x128xf32> to vector<160x128xf32>
    %29 = arith.mulf %27, %28 : vector<160x128xf32>
    %30 = arith.addf %22, %29 : vector<160x128xf32>
    %c0_17 = arith.constant 0 : index
    %c80 = arith.constant 80 : index
    %c0_18 = arith.constant 0 : index
    %31 = vector.load %arg1[%c0_17, %c80, %c0_18] : memref<1x240x1xf32, #tpu.memory_space<vmem>>, vector<1x160x1xf32>
    %32 = vector.shape_cast %31 : vector<1x160x1xf32> to vector<160x1xf32>
    %c4 = arith.constant 4 : index
    %c0_19 = arith.constant 0 : index
    %c0_20 = arith.constant 0 : index
    %33 = vector.load %arg2[%c4, %c0_19, %c0_20] : memref<5x1x128xf32, #tpu.memory_space<vmem>>, vector<1x1x128xf32>
    %34 = vector.shape_cast %33 : vector<1x1x128xf32> to vector<1x128xf32>
    %35 = vector.broadcast %32 : vector<160x1xf32> to vector<160x128xf32>
    %36 = vector.broadcast %34 : vector<1x128xf32> to vector<160x128xf32>
    %37 = arith.mulf %35, %36 : vector<160x128xf32>
    %38 = arith.addf %30, %37 : vector<160x128xf32>
    %c0_21 = arith.constant 0 : index
    %c0_22 = arith.constant 0 : index
    %c0_23 = arith.constant 0 : index
    %39 = vector.load %arg4[%c0_21, %c0_22, %c0_23] : memref<5x1x128xf32, #tpu.memory_space<vmem>>, vector<1x1x128xf32>
    %40 = vector.shape_cast %39 : vector<1x1x128xf32> to vector<1x128xf32>
    %41 = vector.broadcast %40 : vector<1x128xf32> to vector<160x128xf32>
    %42 = arith.addf %38, %41 : vector<160x128xf32>
    %cst = arith.constant 0.000000e+00 : f32
    %43 = vector.broadcast %cst : f32 to vector<160x128xf32>
    %44 = arith.maximumf %42, %43 : vector<160x128xf32>
    %45 = vector.extract_strided_slice %44 {offsets = [0, 0], sizes = [159, 128], strides = [1, 1]} : vector<160x128xf32> to vector<159x128xf32>
    %46 = vector.extract_strided_slice %44 {offsets = [1, 0], sizes = [159, 128], strides = [1, 1]} : vector<160x128xf32> to vector<159x128xf32>
    %47 = arith.maximumf %45, %46 : vector<159x128xf32>
    %48 = arith.truncf %47 : vector<159x128xf32> to vector<159x128xbf16>
    %c0_24 = arith.constant 0 : index
    %c0_25 = arith.constant 0 : index
    %49 = vector.load %arg5[%c0_24, %c0_25] : memref<144x159xbf16, #tpu.memory_space<vmem>>, vector<144x159xbf16>
    %cst_26 = arith.constant dense<0.000000e+00> : vector<144x128xf32>
    %50 = tpu.matmul %49, %48, %cst_26 {dimension_numbers = #tpu.dot_dimension_numbers<[1], [0], [0], [1], [0, 0, 1, 1], [], []>} : vector<144x159xbf16>, vector<159x128xbf16>, vector<144x128xf32> -> vector<144x128xf32>
    %51 = arith.truncf %50 : vector<144x128xf32> to vector<144x128xbf16>
    %c0_27 = arith.constant 0 : index
    %c0_28 = arith.constant 0 : index
    %52 = vector.load %arg11[%c0_27, %c0_28] : memref<144x128xbf16, #tpu.memory_space<vmem>>, vector<144x128xbf16>
    tpu.vector_store %arg11[%c0_27, %c0_28], %51 {strides = array<i32>} : memref<144x128xbf16, #tpu.memory_space<vmem>>, vector<144x128xbf16>,
    %c0_29 = arith.constant 0 : index
    %c0_30 = arith.constant 0 : index
    %53 = vector.load %arg11[%c0_29, %c0_30] : memref<144x128xbf16, #tpu.memory_space<vmem>>, vector<96x128xbf16>
    %c12 = arith.constant 12 : index
    %c0_31 = arith.constant 0 : index
    %54 = vector.load %arg11[%c12, %c0_31] : memref<144x128xbf16, #tpu.memory_space<vmem>>, vector<96x128xbf16>
    %c24 = arith.constant 24 : index
    %c0_32 = arith.constant 0 : index
    %55 = vector.load %arg11[%c24, %c0_32] : memref<144x128xbf16, #tpu.memory_space<vmem>>, vector<96x128xbf16>
    %c36 = arith.constant 36 : index
    %c0_33 = arith.constant 0 : index
    %56 = vector.load %arg11[%c36, %c0_33] : memref<144x128xbf16, #tpu.memory_space<vmem>>, vector<96x128xbf16>
    %c48 = arith.constant 48 : index
    %c0_34 = arith.constant 0 : index
    %57 = vector.load %arg11[%c48, %c0_34] : memref<144x128xbf16, #tpu.memory_space<vmem>>, vector<96x128xbf16>
    %58 = tpu.concatenate %53, %54, %55, %56, %57 in 1 : vector<96x128xbf16>, vector<96x128xbf16>, vector<96x128xbf16>, vector<96x128xbf16>, vector<96x128xbf16> -> vector<96x640xbf16>
    %c0_35 = arith.constant 0 : index
    %c0_36 = arith.constant 0 : index
    %c0_37 = arith.constant 0 : index
    %59 = vector.load %arg3[%c0_35, %c0_36, %c0_37] : memref<4x640x128xbf16, #tpu.memory_space<vmem>>, vector<1x640x128xbf16>
    %60 = vector.shape_cast %59 : vector<1x640x128xbf16> to vector<640x128xbf16>
    %cst_38 = arith.constant dense<0.000000e+00> : vector<96x128xf32>
    %61 = tpu.matmul %58, %60, %cst_38 {dimension_numbers = #tpu.dot_dimension_numbers<[1], [0], [0], [1], [0, 0, 1, 1], [], []>} : vector<96x640xbf16>, vector<640x128xbf16>, vector<96x128xf32> -> vector<96x128xf32>
    %c1_39 = arith.constant 1 : index
    %c0_40 = arith.constant 0 : index
    %c0_41 = arith.constant 0 : index
    %62 = vector.load %arg4[%c1_39, %c0_40, %c0_41] : memref<5x1x128xf32, #tpu.memory_space<vmem>>, vector<1x1x128xf32>
    %63 = vector.shape_cast %62 : vector<1x1x128xf32> to vector<1x128xf32>
    %64 = vector.broadcast %63 : vector<1x128xf32> to vector<96x128xf32>
    %65 = arith.addf %61, %64 : vector<96x128xf32>
    %cst_42 = arith.constant 0.000000e+00 : f32
    %66 = vector.broadcast %cst_42 : f32 to vector<96x128xf32>
    %67 = arith.maximumf %65, %66 : vector<96x128xf32>
    %68 = vector.extract_strided_slice %67 {offsets = [0, 0], sizes = [95, 128], strides = [1, 1]} : vector<96x128xf32> to vector<95x128xf32>
    %69 = vector.extract_strided_slice %67 {offsets = [1, 0], sizes = [95, 128], strides = [1, 1]} : vector<96x128xf32> to vector<95x128xf32>
    %70 = arith.maximumf %68, %69 : vector<95x128xf32>
    %71 = arith.truncf %70 : vector<95x128xf32> to vector<95x128xbf16>
    %c0_43 = arith.constant 0 : index
    %c0_44 = arith.constant 0 : index
    %72 = vector.load %arg6[%c0_43, %c0_44] : memref<96x95xbf16, #tpu.memory_space<vmem>>, vector<96x95xbf16>
    %cst_45 = arith.constant dense<0.000000e+00> : vector<96x128xf32>
    %73 = tpu.matmul %72, %71, %cst_45 {dimension_numbers = #tpu.dot_dimension_numbers<[1], [0], [0], [1], [0, 0, 1, 1], [], []>} : vector<96x95xbf16>, vector<95x128xbf16>, vector<96x128xf32> -> vector<96x128xf32>
    %74 = arith.truncf %73 : vector<96x128xf32> to vector<96x128xbf16>
    %c0_46 = arith.constant 0 : index
    %c0_47 = arith.constant 0 : index
    %75 = vector.load %arg12[%c0_46, %c0_47] : memref<96x128xbf16, #tpu.memory_space<vmem>>, vector<96x128xbf16>
    tpu.vector_store %arg12[%c0_46, %c0_47], %74 {strides = array<i32>} : memref<96x128xbf16, #tpu.memory_space<vmem>>, vector<96x128xbf16>,
    %c0_48 = arith.constant 0 : index
    %c0_49 = arith.constant 0 : index
    %76 = vector.load %arg12[%c0_48, %c0_49] : memref<96x128xbf16, #tpu.memory_space<vmem>>, vector<64x128xbf16>
    %c8 = arith.constant 8 : index
    %c0_50 = arith.constant 0 : index
    %77 = vector.load %arg12[%c8, %c0_50] : memref<96x128xbf16, #tpu.memory_space<vmem>>, vector<64x128xbf16>
    %c16 = arith.constant 16 : index
    %c0_51 = arith.constant 0 : index
    %78 = vector.load %arg12[%c16, %c0_51] : memref<96x128xbf16, #tpu.memory_space<vmem>>, vector<64x128xbf16>
    %c24_52 = arith.constant 24 : index
    %c0_53 = arith.constant 0 : index
    %79 = vector.load %arg12[%c24_52, %c0_53] : memref<96x128xbf16, #tpu.memory_space<vmem>>, vector<64x128xbf16>
    %c32 = arith.constant 32 : index
    %c0_54 = arith.constant 0 : index
    %80 = vector.load %arg12[%c32, %c0_54] : memref<96x128xbf16, #tpu.memory_space<vmem>>, vector<64x128xbf16>
    %81 = tpu.concatenate %76, %77, %78, %79, %80 in 1 : vector<64x128xbf16>, vector<64x128xbf16>, vector<64x128xbf16>, vector<64x128xbf16>, vector<64x128xbf16> -> vector<64x640xbf16>
    %c1_55 = arith.constant 1 : index
    %c0_56 = arith.constant 0 : index
    %c0_57 = arith.constant 0 : index
    %82 = vector.load %arg3[%c1_55, %c0_56, %c0_57] : memref<4x640x128xbf16, #tpu.memory_space<vmem>>, vector<1x640x128xbf16>
    %83 = vector.shape_cast %82 : vector<1x640x128xbf16> to vector<640x128xbf16>
    %cst_58 = arith.constant dense<0.000000e+00> : vector<64x128xf32>
    %84 = tpu.matmul %81, %83, %cst_58 {dimension_numbers = #tpu.dot_dimension_numbers<[1], [0], [0], [1], [0, 0, 1, 1], [], []>} : vector<64x640xbf16>, vector<640x128xbf16>, vector<64x128xf32> -> vector<64x128xf32>
    %c2_59 = arith.constant 2 : index
    %c0_60 = arith.constant 0 : index
    %c0_61 = arith.constant 0 : index
    %85 = vector.load %arg4[%c2_59, %c0_60, %c0_61] : memref<5x1x128xf32, #tpu.memory_space<vmem>>, vector<1x1x128xf32>
    %86 = vector.shape_cast %85 : vector<1x1x128xf32> to vector<1x128xf32>
    %87 = vector.broadcast %86 : vector<1x128xf32> to vector<64x128xf32>
    %88 = arith.addf %84, %87 : vector<64x128xf32>
    %cst_62 = arith.constant 0.000000e+00 : f32
    %89 = vector.broadcast %cst_62 : f32 to vector<64x128xf32>
    %90 = arith.maximumf %88, %89 : vector<64x128xf32>
    %91 = vector.extract_strided_slice %90 {offsets = [0, 0], sizes = [63, 128], strides = [1, 1]} : vector<64x128xf32> to vector<63x128xf32>
    %92 = vector.extract_strided_slice %90 {offsets = [1, 0], sizes = [63, 128], strides = [1, 1]} : vector<64x128xf32> to vector<63x128xf32>
    %93 = arith.maximumf %91, %92 : vector<63x128xf32>
    %94 = arith.truncf %93 : vector<63x128xf32> to vector<63x128xbf16>
    %c0_63 = arith.constant 0 : index
    %c0_64 = arith.constant 0 : index
    %95 = vector.load %arg7[%c0_63, %c0_64] : memref<72x63xbf16, #tpu.memory_space<vmem>>, vector<72x63xbf16>
    %cst_65 = arith.constant dense<0.000000e+00> : vector<72x128xf32>
    %96 = tpu.matmul %95, %94, %cst_65 {dimension_numbers = #tpu.dot_dimension_numbers<[1], [0], [0], [1], [0, 0, 1, 1], [], []>} : vector<72x63xbf16>, vector<63x128xbf16>, vector<72x128xf32> -> vector<72x128xf32>
    %97 = arith.truncf %96 : vector<72x128xf32> to vector<72x128xbf16>
    %c0_66 = arith.constant 0 : index
    %c0_67 = arith.constant 0 : index
    %98 = vector.load %arg13[%c0_66, %c0_67] : memref<72x128xbf16, #tpu.memory_space<vmem>>, vector<72x128xbf16>
    tpu.vector_store %arg13[%c0_66, %c0_67], %97 {strides = array<i32>} : memref<72x128xbf16, #tpu.memory_space<vmem>>, vector<72x128xbf16>,
    %c0_68 = arith.constant 0 : index
    %c0_69 = arith.constant 0 : index
    %99 = vector.load %arg13[%c0_68, %c0_69] : memref<72x128xbf16, #tpu.memory_space<vmem>>, vector<48x128xbf16>
    %c6 = arith.constant 6 : index
    %c0_70 = arith.constant 0 : index
    %100 = vector.load %arg13[%c6, %c0_70] : memref<72x128xbf16, #tpu.memory_space<vmem>>, vector<48x128xbf16>
    %c12_71 = arith.constant 12 : index
    %c0_72 = arith.constant 0 : index
    %101 = vector.load %arg13[%c12_71, %c0_72] : memref<72x128xbf16, #tpu.memory_space<vmem>>, vector<48x128xbf16>
    %c18 = arith.constant 18 : index
    %c0_73 = arith.constant 0 : index
    %102 = vector.load %arg13[%c18, %c0_73] : memref<72x128xbf16, #tpu.memory_space<vmem>>, vector<48x128xbf16>
    %c24_74 = arith.constant 24 : index
    %c0_75 = arith.constant 0 : index
    %103 = vector.load %arg13[%c24_74, %c0_75] : memref<72x128xbf16, #tpu.memory_space<vmem>>, vector<48x128xbf16>
    %104 = tpu.concatenate %99, %100, %101, %102, %103 in 1 : vector<48x128xbf16>, vector<48x128xbf16>, vector<48x128xbf16>, vector<48x128xbf16>, vector<48x128xbf16> -> vector<48x640xbf16>
    %c2_76 = arith.constant 2 : index
    %c0_77 = arith.constant 0 : index
    %c0_78 = arith.constant 0 : index
    %105 = vector.load %arg3[%c2_76, %c0_77, %c0_78] : memref<4x640x128xbf16, #tpu.memory_space<vmem>>, vector<1x640x128xbf16>
    %106 = vector.shape_cast %105 : vector<1x640x128xbf16> to vector<640x128xbf16>
    %cst_79 = arith.constant dense<0.000000e+00> : vector<48x128xf32>
    %107 = tpu.matmul %104, %106, %cst_79 {dimension_numbers = #tpu.dot_dimension_numbers<[1], [0], [0], [1], [0, 0, 1, 1], [], []>} : vector<48x640xbf16>, vector<640x128xbf16>, vector<48x128xf32> -> vector<48x128xf32>
    %c3_80 = arith.constant 3 : index
    %c0_81 = arith.constant 0 : index
    %c0_82 = arith.constant 0 : index
    %108 = vector.load %arg4[%c3_80, %c0_81, %c0_82] : memref<5x1x128xf32, #tpu.memory_space<vmem>>, vector<1x1x128xf32>
    %109 = vector.shape_cast %108 : vector<1x1x128xf32> to vector<1x128xf32>
    %110 = vector.broadcast %109 : vector<1x128xf32> to vector<48x128xf32>
    %111 = arith.addf %107, %110 : vector<48x128xf32>
    %cst_83 = arith.constant 0.000000e+00 : f32
    %112 = vector.broadcast %cst_83 : f32 to vector<48x128xf32>
    %113 = arith.maximumf %111, %112 : vector<48x128xf32>
    %114 = vector.extract_strided_slice %113 {offsets = [0, 0], sizes = [47, 128], strides = [1, 1]} : vector<48x128xf32> to vector<47x128xf32>
    %115 = vector.extract_strided_slice %113 {offsets = [1, 0], sizes = [47, 128], strides = [1, 1]} : vector<48x128xf32> to vector<47x128xf32>
    %116 = arith.maximumf %114, %115 : vector<47x128xf32>
    %117 = arith.truncf %116 : vector<47x128xf32> to vector<47x128xbf16>
    %c0_84 = arith.constant 0 : index
    %c0_85 = arith.constant 0 : index
    %118 = vector.load %arg8[%c0_84, %c0_85] : memref<60x47xbf16, #tpu.memory_space<vmem>>, vector<60x47xbf16>
    %cst_86 = arith.constant dense<0.000000e+00> : vector<60x128xf32>
    %119 = tpu.matmul %118, %117, %cst_86 {dimension_numbers = #tpu.dot_dimension_numbers<[1], [0], [0], [1], [0, 0, 1, 1], [], []>} : vector<60x47xbf16>, vector<47x128xbf16>, vector<60x128xf32> -> vector<60x128xf32>
    %120 = arith.truncf %119 : vector<60x128xf32> to vector<60x128xbf16>
    %c0_87 = arith.constant 0 : index
    %c0_88 = arith.constant 0 : index
    %121 = vector.load %arg14[%c0_87, %c0_88] : memref<60x128xbf16, #tpu.memory_space<vmem>>, vector<60x128xbf16>
    tpu.vector_store %arg14[%c0_87, %c0_88], %120 {strides = array<i32>} : memref<60x128xbf16, #tpu.memory_space<vmem>>, vector<60x128xbf16>,
    %c0_89 = arith.constant 0 : index
    %c0_90 = arith.constant 0 : index
    %122 = vector.load %arg14[%c0_89, %c0_90] : memref<60x128xbf16, #tpu.memory_space<vmem>>, vector<40x128xbf16>
    %c5 = arith.constant 5 : index
    %c0_91 = arith.constant 0 : index
    %123 = vector.load %arg14[%c5, %c0_91] : memref<60x128xbf16, #tpu.memory_space<vmem>>, vector<40x128xbf16>
    %c10 = arith.constant 10 : index
    %c0_92 = arith.constant 0 : index
    %124 = vector.load %arg14[%c10, %c0_92] : memref<60x128xbf16, #tpu.memory_space<vmem>>, vector<40x128xbf16>
    %c15 = arith.constant 15 : index
    %c0_93 = arith.constant 0 : index
    %125 = vector.load %arg14[%c15, %c0_93] : memref<60x128xbf16, #tpu.memory_space<vmem>>, vector<40x128xbf16>
    %c20_94 = arith.constant 20 : index
    %c0_95 = arith.constant 0 : index
    %126 = vector.load %arg14[%c20_94, %c0_95] : memref<60x128xbf16, #tpu.memory_space<vmem>>, vector<40x128xbf16>
    %127 = tpu.concatenate %122, %123, %124, %125, %126 in 1 : vector<40x128xbf16>, vector<40x128xbf16>, vector<40x128xbf16>, vector<40x128xbf16>, vector<40x128xbf16> -> vector<40x640xbf16>
    %c3_96 = arith.constant 3 : index
    %c0_97 = arith.constant 0 : index
    %c0_98 = arith.constant 0 : index
    %128 = vector.load %arg3[%c3_96, %c0_97, %c0_98] : memref<4x640x128xbf16, #tpu.memory_space<vmem>>, vector<1x640x128xbf16>
    %129 = vector.shape_cast %128 : vector<1x640x128xbf16> to vector<640x128xbf16>
    %cst_99 = arith.constant dense<0.000000e+00> : vector<40x128xf32>
    %130 = tpu.matmul %127, %129, %cst_99 {dimension_numbers = #tpu.dot_dimension_numbers<[1], [0], [0], [1], [0, 0, 1, 1], [], []>} : vector<40x640xbf16>, vector<640x128xbf16>, vector<40x128xf32> -> vector<40x128xf32>
    %c4_100 = arith.constant 4 : index
    %c0_101 = arith.constant 0 : index
    %c0_102 = arith.constant 0 : index
    %131 = vector.load %arg4[%c4_100, %c0_101, %c0_102] : memref<5x1x128xf32, #tpu.memory_space<vmem>>, vector<1x1x128xf32>
    %132 = vector.shape_cast %131 : vector<1x1x128xf32> to vector<1x128xf32>
    %133 = vector.broadcast %132 : vector<1x128xf32> to vector<40x128xf32>
    %134 = arith.addf %130, %133 : vector<40x128xf32>
    %cst_103 = arith.constant 0.000000e+00 : f32
    %135 = vector.broadcast %cst_103 : f32 to vector<40x128xf32>
    %136 = arith.maximumf %134, %135 : vector<40x128xf32>
    %137 = vector.extract_strided_slice %136 {offsets = [0, 0], sizes = [39, 128], strides = [1, 1]} : vector<40x128xf32> to vector<39x128xf32>
    %138 = vector.extract_strided_slice %136 {offsets = [1, 0], sizes = [39, 128], strides = [1, 1]} : vector<40x128xf32> to vector<39x128xf32>
    %139 = arith.maximumf %137, %138 : vector<39x128xf32>
    %140 = arith.truncf %139 : vector<39x128xf32> to vector<39x128xbf16>
    %c0_104 = arith.constant 0 : index
    %c0_105 = arith.constant 0 : index
    %141 = vector.load %arg9[%c0_104, %c0_105] : memref<32x39xbf16, #tpu.memory_space<vmem>>, vector<32x39xbf16>
    %cst_106 = arith.constant dense<0.000000e+00> : vector<32x128xf32>
    %142 = tpu.matmul %141, %140, %cst_106 {dimension_numbers = #tpu.dot_dimension_numbers<[1], [0], [0], [1], [0, 0, 1, 1], [], []>} : vector<32x39xbf16>, vector<39x128xbf16>, vector<32x128xf32> -> vector<32x128xf32>
    %143 = vector.extract_strided_slice %142 {offsets = [0, 0], sizes = [32, 40], strides = [1, 1]} : vector<32x128xf32> to vector<32x40xf32>
    %144 = arith.truncf %143 : vector<32x40xf32> to vector<32x40xbf16>
    %c0_107 = arith.constant 0 : index
    %c0_108 = arith.constant 0 : index
    %c0_109 = arith.constant 0 : index
    %145 = vector.load %arg10[%c0_107, %c0_108, %c0_109] : memref<1x32x40xbf16, #tpu.memory_space<vmem>>, vector<1x32x40xbf16>
    %146 = vector.shape_cast %145 : vector<1x32x40xbf16> to vector<32x40xbf16>
    %147 = vector.shape_cast %144 : vector<32x40xbf16> to vector<1x32x40xbf16>
    tpu.vector_store %arg10[%c0_107, %c0_108, %c0_109], %147 {strides = array<i32>} : memref<1x32x40xbf16, #tpu.memory_space<vmem>>, vector<1x32x40xbf16>,
    return
  }
  func.func @transform_0(%arg0: i32) -> (i32, i32, i32) {
    %c0_i32 = arith.constant 0 : i32
    %c0_i32_0 = arith.constant 0 : i32
    %c0_i32_1 = arith.constant 0 : i32
    return %arg0, %c0_i32, %c0_i32_0 : i32, i32, i32
  }
  func.func @transform_1(%arg0: i32) -> (i32, i32, i32) {
    %c0_i32 = arith.constant 0 : i32
    %c0_i32_0 = arith.constant 0 : i32
    %c0_i32_1 = arith.constant 0 : i32
    %c0_i32_2 = arith.constant 0 : i32
    return %c0_i32, %c0_i32_0, %c0_i32_1 : i32, i32, i32
  }
  func.func @transform_2(%arg0: i32) -> (i32, i32, i32) {
    %c0_i32 = arith.constant 0 : i32
    %c0_i32_0 = arith.constant 0 : i32
    %c0_i32_1 = arith.constant 0 : i32
    %c0_i32_2 = arith.constant 0 : i32
    return %c0_i32, %c0_i32_0, %c0_i32_1 : i32, i32, i32
  }
  func.func @transform_3(%arg0: i32) -> (i32, i32, i32) {
    %c0_i32 = arith.constant 0 : i32
    %c0_i32_0 = arith.constant 0 : i32
    %c0_i32_1 = arith.constant 0 : i32
    %c0_i32_2 = arith.constant 0 : i32
    return %c0_i32, %c0_i32_0, %c0_i32_1 : i32, i32, i32
  }
  func.func @transform_4(%arg0: i32) -> (i32, i32) {
    %c0_i32 = arith.constant 0 : i32
    %c0_i32_0 = arith.constant 0 : i32
    %c0_i32_1 = arith.constant 0 : i32
    return %c0_i32, %c0_i32_0 : i32, i32
  }
  func.func @transform_5(%arg0: i32) -> (i32, i32) {
    %c0_i32 = arith.constant 0 : i32
    %c0_i32_0 = arith.constant 0 : i32
    %c0_i32_1 = arith.constant 0 : i32
    return %c0_i32, %c0_i32_0 : i32, i32
  }
  func.func @transform_6(%arg0: i32) -> (i32, i32) {
    %c0_i32 = arith.constant 0 : i32
    %c0_i32_0 = arith.constant 0 : i32
    %c0_i32_1 = arith.constant 0 : i32
    return %c0_i32, %c0_i32_0 : i32, i32
  }
  func.func @transform_7(%arg0: i32) -> (i32, i32) {
    %c0_i32 = arith.constant 0 : i32
    %c0_i32_0 = arith.constant 0 : i32
    %c0_i32_1 = arith.constant 0 : i32
    return %c0_i32, %c0_i32_0 : i32, i32
  }
  func.func @transform_8(%arg0: i32) -> (i32, i32) {
    %c0_i32 = arith.constant 0 : i32
    %c0_i32_0 = arith.constant 0 : i32
    %c0_i32_1 = arith.constant 0 : i32
    return %c0_i32, %c0_i32_0 : i32, i32
  }
  func.func @transform_9(%arg0: i32) -> (i32, i32, i32) {
    %c0_i32 = arith.constant 0 : i32
    %c0_i32_0 = arith.constant 0 : i32
    %c0_i32_1 = arith.constant 0 : i32
    return %arg0, %c0_i32, %c0_i32_0 : i32, i32, i32
  }
}

module attributes {stable_mosaic.version = 11 : i64} {
  func.func @kernel(%arg0: memref<2x1280xbf16, #tpu.memory_space<vmem>>, %arg1: memref<1280x512xbf16, #tpu.memory_space<vmem>>, %arg2: memref<1x512xf32, #tpu.memory_space<vmem>>, %arg3: memref<512x256xbf16, #tpu.memory_space<vmem>>, %arg4: memref<1x256xf32, #tpu.memory_space<vmem>>, %arg5: memref<256x128xbf16, #tpu.memory_space<vmem>>, %arg6: memref<1x128xf32, #tpu.memory_space<vmem>>, %arg7: memref<2x6xf32, #tpu.memory_space<vmem>>) attributes {dimension_semantics = [], scalar_prefetch = 0 : i64, scratch_operands = 0 : i64, tpu.core_type = #tpu.core_type<tc>} {
    %c0 = arith.constant 0 : index
    %c0_0 = arith.constant 0 : index
    %0 = vector.load %arg0[%c0, %c0_0] : memref<2x1280xbf16, #tpu.memory_space<vmem>>, vector<2x1280xbf16>
    %c0_1 = arith.constant 0 : index
    %c0_2 = arith.constant 0 : index
    %1 = vector.load %arg1[%c0_1, %c0_2] : memref<1280x512xbf16, #tpu.memory_space<vmem>>, vector<1280x512xbf16>
    %cst = arith.constant dense<0.000000e+00> : vector<2x512xf32>
    %2 = tpu.matmul %0, %1, %cst {dimension_numbers = #tpu.dot_dimension_numbers<[1], [0], [0], [1], [0, 0, 1, 1], [], []>} : vector<2x1280xbf16>, vector<1280x512xbf16>, vector<2x512xf32> -> vector<2x512xf32>
    %c0_3 = arith.constant 0 : index
    %c0_4 = arith.constant 0 : index
    %3 = vector.load %arg2[%c0_3, %c0_4] : memref<1x512xf32, #tpu.memory_space<vmem>>, vector<1x512xf32>
    %4 = vector.broadcast %3 : vector<1x512xf32> to vector<2x512xf32>
    %5 = arith.addf %2, %4 : vector<2x512xf32>
    %cst_5 = arith.constant 0.000000e+00 : f32
    %6 = vector.broadcast %cst_5 : f32 to vector<2x512xf32>
    %7 = arith.maximumf %5, %6 : vector<2x512xf32>
    %8 = arith.truncf %7 : vector<2x512xf32> to vector<2x512xbf16>
    %c0_6 = arith.constant 0 : index
    %c0_7 = arith.constant 0 : index
    %9 = vector.load %arg3[%c0_6, %c0_7] : memref<512x256xbf16, #tpu.memory_space<vmem>>, vector<512x256xbf16>
    %cst_8 = arith.constant dense<0.000000e+00> : vector<2x256xf32>
    %10 = tpu.matmul %8, %9, %cst_8 {dimension_numbers = #tpu.dot_dimension_numbers<[1], [0], [0], [1], [0, 0, 1, 1], [], []>} : vector<2x512xbf16>, vector<512x256xbf16>, vector<2x256xf32> -> vector<2x256xf32>
    %c0_9 = arith.constant 0 : index
    %c0_10 = arith.constant 0 : index
    %11 = vector.load %arg4[%c0_9, %c0_10] : memref<1x256xf32, #tpu.memory_space<vmem>>, vector<1x256xf32>
    %12 = vector.broadcast %11 : vector<1x256xf32> to vector<2x256xf32>
    %13 = arith.addf %10, %12 : vector<2x256xf32>
    %cst_11 = arith.constant 0.000000e+00 : f32
    %14 = vector.broadcast %cst_11 : f32 to vector<2x256xf32>
    %15 = arith.maximumf %13, %14 : vector<2x256xf32>
    %16 = arith.truncf %15 : vector<2x256xf32> to vector<2x256xbf16>
    %c0_12 = arith.constant 0 : index
    %c0_13 = arith.constant 0 : index
    %17 = vector.load %arg5[%c0_12, %c0_13] : memref<256x128xbf16, #tpu.memory_space<vmem>>, vector<256x128xbf16>
    %cst_14 = arith.constant dense<0.000000e+00> : vector<2x128xf32>
    %18 = tpu.matmul %16, %17, %cst_14 {dimension_numbers = #tpu.dot_dimension_numbers<[1], [0], [0], [1], [0, 0, 1, 1], [], []>} : vector<2x256xbf16>, vector<256x128xbf16>, vector<2x128xf32> -> vector<2x128xf32>
    %c0_15 = arith.constant 0 : index
    %c0_16 = arith.constant 0 : index
    %19 = vector.load %arg6[%c0_15, %c0_16] : memref<1x128xf32, #tpu.memory_space<vmem>>, vector<1x128xf32>
    %20 = vector.broadcast %19 : vector<1x128xf32> to vector<2x128xf32>
    %21 = arith.addf %18, %20 : vector<2x128xf32>
    %cst_17 = arith.constant 0.000000e+00 : f32
    %22 = vector.broadcast %cst_17 : f32 to vector<2x128xf32>
    %23 = arith.maximumf %21, %22 : vector<2x128xf32>
    %24 = vector.extract_strided_slice %23 {offsets = [0, 0], sizes = [2, 6], strides = [1, 1]} : vector<2x128xf32> to vector<2x6xf32>
    %c0_18 = arith.constant 0 : index
    %c0_19 = arith.constant 0 : index
    %25 = vector.load %arg7[%c0_18, %c0_19] : memref<2x6xf32, #tpu.memory_space<vmem>>, vector<2x6xf32>
    tpu.vector_store %arg7[%c0_18, %c0_19], %24 {strides = array<i32>} : memref<2x6xf32, #tpu.memory_space<vmem>>, vector<2x6xf32>,
    return
  }
}

</mosaic_0001>

<bundles_post_ra>
// kernel: convnet_forward.3
= control target key start
LH: loop header
LB: loop body
LE: loop exit
PB: predicated region body
PF: predicated region fallthrough
CT: control target
= control target key end

     0   :  { %12 = vsyncpa [#allocation3], 0  ;;  %s5453_s0 = inlined_call_operand.vmem [shape: bf16[2,1280], index: 0, kind: input, shape index: {}]   ;;  %s5454_s1 = inlined_call_operand.vmem [shape: bf16[1280,512], index: 1, kind: input, shape index: {}]   ;;  %s5455_s2 = inlined_call_operand.vmem [shape: f32[1,512], index: 2, kind: input, shape index: {}]   ;;  %s5456_s3 = inlined_call_operand.hbm [shape: bf16[512,256], index: 3, kind: input, shape index: {}]   ;;  %s5457_s4 = inlined_call_operand.vmem [shape: f32[1,256], index: 4, kind: input, shape index: {}]   ;;  %s5458_s5 = inlined_call_operand.vmem [shape: bf16[256,128], index: 5, kind: input, shape index: {}]   ;;  %s5459_s6 = inlined_call_operand.vmem [shape: f32[1,128], index: 6, kind: input, shape index: {}]   ;;  %s5460_s7 = inlined_call_operand.hbm [shape: f32[2,6], index: 7, kind: output, shape index: {}]  }
   0x1   :  { %13 = vsyncpa [#allocation4], 0  ;;  %s4272_s24 = smov [#allocation2]   ;;  %s4224_s28 = scalar_lea.hbm %s5456_s3, 8192 }
   0x2   :  { %s25_s25 = sshll.u32 %s4272_s24, 4  ;;  %p4225_p0 = scmp.ne.s32.totalorder %s5456_s3, %s4224_s28  ;;  %s26_s25 = int_to_ptr.vmem [resolvable:$true] %s25_s25 }
   0x3   :  { %p4228_p1 = scmp.lt.u32.totalorder %s4224_s28, %s5456_s3 }
   0x5   :  { %p4230_p2 = pnand %p4228_p1, %p4225_p0 }
   0x7   :  { %4233 = shalt.err (!%p4230_p2)
}
   0x8   :  { %s4234_s10 = scalar_lea.vmem %s26_s25, 8192  ;;  %p4239_p4 = scmp.lt.s32.totalorder %s26_s25, %s26_s25 }
   0x9   :  { %p4235_p3 = scmp.ne.s32.totalorder %s26_s25, %s4234_s10  ;;  %p4240_p5 = scmp.lt.s32.totalorder %s4234_s10, %s4234_s10 }
   0xb   :  { %p4241_p6 = por %p4240_p5, %p4239_p4 }
   0xd   :  { %p4242_p7 = pnand %p4241_p6, %p4235_p3 }
   0xf   :  { %4245 = shalt.err (!%p4242_p7)
}
  0x10   :  { %s4273_s11 = smov 128   ;;  %s4274_s12 = smov 8  }
  0x11   :  { %31 = dma.hbm_to_vmem [thread:$0]  %s5456_s3, 8192, %s26_s25, [#allocation3], %s4273_s11, %s4273_s11, %s4274_s12  }
  0x12   :  { %4268 = dma.done.wait [#allocation3], 8192  }
  0x13   :  { %4269 = vsyncadd [#allocation3], 4294959104  ;;  %v3631_v0 = vld [vmem:[%s5454_s1 + $0x4] ss:$16 sps:$4 sm:$0xff]   ;;  %v3635_v2 = vld [vmem:[%s5454_s1] ss:$16 sps:$4 sm:$0xff]   ;;  %v366_v36 = vlaneseq }
  0x14   :  { %v3633_v1 = vld [vmem:[%s5454_s1 + $0x204] ss:$16 sps:$4 sm:$0xff]   ;;  %2069 = vmatprep.subr.bf16.mxu1 %v3631_v0  ;;  %v3636_v3 = vld [vmem:[%s5454_s1 + $0x200] ss:$16 sps:$4 sm:$0xff]   ;;  %v4275_v37 = vmov 1966171168  }
  0x15   :  { %2110 = vmatprep.subr.bf16.mxu0 %v3633_v1  ;;  %v3637_v4 = vld [vmem:[%s5454_s1 + $0x24] ss:$16 sps:$4 sm:$0xff]   ;;  %2070 = vmatpush1.bf16.msra.mxu1 %v3635_v2  ;;  %v3641_v6 = vld [vmem:[%s5454_s1 + $0x20] ss:$16 sps:$4 sm:$0xff]   ;;  %v390_v38 = vunpack.c.l.s4 %v4275_v37  ;;  %v4446_v42 = vshrl.u32 %v366_v36, 7  ;;  %s4276_s30 = smov [#allocation5]  }
  0x16   :  { %2111 = vmatpush1.bf16.msra.mxu0 %v3636_v3  ;;  %v3639_v5 = vld [vmem:[%s5454_s1 + $0x224] ss:$16 sps:$4 sm:$0xff]   ;;  %2071 = vmatprep.subr.bf16.mxu1 %v3637_v4  ;;  %v3642_v7 = vld [vmem:[%s5454_s1 + $0x220] ss:$16 sps:$4 sm:$0xff]   ;;  %v3754_v36 = vld [vmem:[%s5454_s1 + $0x88] ss:$16 sps:$4 sm:$0xff]  }
  0x17   :  { %2112 = vmatprep.subr.bf16.mxu0 %v3639_v5  ;;  %v3643_v8 = vld [vmem:[%s5454_s1 + $0x44] ss:$16 sps:$4 sm:$0xff]   ;;  %v3647_v10 = vld [vmem:[%s5454_s1 + $0x40] ss:$16 sps:$4 sm:$0xff]   ;;  %v391_v43 = vunpack.c.0.s8 %v390_v38  ;;  %v3762_v38 = vld [vmem:[%s5454_s1 + $0xac] ss:$16 sps:$4 sm:$0xff]  }
  0x18   :  { %v3645_v9 = vld [vmem:[%s5454_s1 + $0x244] ss:$16 sps:$4 sm:$0xff]   ;;  %v3648_v11 = vld [vmem:[%s5454_s1 + $0x240] ss:$16 sps:$4 sm:$0xff]   ;;  %s3153_s8 = sshll.u32 %s4276_s30, 4  ;;  %vm3145_vm0 = vcmask 41984   ;;  %s3154_s8 = int_to_ptr.vmem [resolvable:$true] %s3153_s8 }
  0x19   :  { %2072 = vmatpush1.bf16.msra.mxu1 %v3641_v6  ;;  %v3649_v12 = vld [vmem:[%s5454_s1 + $0x64] ss:$16 sps:$4 sm:$0xff]   ;;  %v3653_v14 = vld [vmem:[%s5454_s1 + $0x60] ss:$16 sps:$4 sm:$0xff]   ;;  %v4464_v49 = vsub.s32 %v391_v43, %v4446_v42  ;;  %v3768_v43 = vld [vmem:[%s5454_s1 + $0xcc] ss:$16 sps:$4 sm:$0xff]   ;;  %p4251_p9 = scmp.lt.s32.totalorder %s3154_s8, %s3154_s8 }
  0x1a   :  { %2113 = vmatpush1.bf16.msra.mxu0 %v3642_v7  ;;  %2073 = vmatprep.subr.bf16.mxu1 %v3643_v8  ;;  %v3651_v13 = vld [vmem:[%s5454_s1 + $0x264] ss:$16 sps:$4 sm:$0xff]   ;;  %v3654_v15 = vld [vmem:[%s5454_s1 + $0x260] ss:$16 sps:$4 sm:$0xff]   ;;  %s4246_s9 = scalar_lea.vmem %s3154_s8, 32 }
  0x1b   :  { %2114 = vmatprep.subr.bf16.mxu0 %v3645_v9  ;;  %v3655_v16 = vld [vmem:[%s5454_s1 + $0x84] ss:$16 sps:$4 sm:$0xff]   ;;  %v3659_v18 = vld [vmem:[%s5454_s1 + $0x80] ss:$16 sps:$4 sm:$0xff]   ;;  %p4247_p8 = scmp.ne.s32.totalorder %s3154_s8, %s4246_s9  ;;  %p4252_p10 = scmp.lt.s32.totalorder %s4246_s9, %s4246_s9 }
  0x1c   :  { %v3657_v17 = vld [vmem:[%s5454_s1 + $0x284] ss:$16 sps:$4 sm:$0xff]   ;;  %v3660_v19 = vld [vmem:[%s5454_s1 + $0x280] ss:$16 sps:$4 sm:$0xff]  }
  0x1d   :  { %2074 = vmatpush1.bf16.msra.mxu1 %v3647_v10  ;;  %v3661_v20 = vld [vmem:[%s5454_s1 + $0xa4] ss:$16 sps:$4 sm:$0xff]   ;;  %v3665_v22 = vld [vmem:[%s5454_s1 + $0xa0] ss:$16 sps:$4 sm:$0xff]   ;;  %p4253_p11 = por %p4252_p10, %p4251_p9 }
  0x1e   :  { %2115 = vmatpush1.bf16.msra.mxu0 %v3648_v11  ;;  %2075 = vmatprep.subr.bf16.mxu1 %v3649_v12  ;;  %v3663_v21 = vld [vmem:[%s5454_s1 + $0x2a4] ss:$16 sps:$4 sm:$0xff]   ;;  %v3666_v23 = vld [vmem:[%s5454_s1 + $0x2a0] ss:$16 sps:$4 sm:$0xff]  }
  0x1f   :  { %2116 = vmatprep.subr.bf16.mxu0 %v3651_v13  ;;  %v3667_v24 = vld [vmem:[%s5454_s1 + $0xc4] ss:$16 sps:$4 sm:$0xff]   ;;  %v3671_v26 = vld [vmem:[%s5454_s1 + $0xc0] ss:$16 sps:$4 sm:$0xff]   ;;  %p4254_p12 = pnand %p4253_p11, %p4247_p8 }
  0x20   :  { %v3669_v25 = vld [vmem:[%s5454_s1 + $0x2c4] ss:$16 sps:$4 sm:$0xff]   ;;  %v3672_v27 = vld [vmem:[%s5454_s1 + $0x2c0] ss:$16 sps:$4 sm:$0xff]  }
  0x21   :  { %2076 = vmatpush1.bf16.msra.mxu1 %v3653_v14  ;;  %v3673_v28 = vld [vmem:[%s5454_s1 + $0xe4] ss:$16 sps:$4 sm:$0xff]   ;;  %v3677_v30 = vld [vmem:[%s5454_s1 + $0xe0] ss:$16 sps:$4 sm:$0xff]  }
  0x22   :  { %2117 = vmatpush1.bf16.msra.mxu0 %v3654_v15  ;;  %2077 = vmatprep.subr.bf16.mxu1 %v3655_v16  ;;  %v3675_v29 = vld [vmem:[%s5454_s1 + $0x2e4] ss:$16 sps:$4 sm:$0xff]   ;;  %v3678_v31 = vld [vmem:[%s5454_s1 + $0x2e0] ss:$16 sps:$4 sm:$0xff]   ;;  %v3732_v15 = vld [vmem:[%s5454_s1 + $0xc] ss:$16 sps:$4 sm:$0xff]  }
  0x23   :  { %2118 = vmatprep.subr.bf16.mxu0 %v3657_v17  ;;  %v3679_v32 = vld [vmem:[%s5454_s1 + $0x104] ss:$16 sps:$4 sm:$0xff]   ;;  %v3683_v34 = vld [vmem:[%s5454_s1 + $0x100] ss:$16 sps:$4 sm:$0xff]  }
  0x24   :  { %v3681_v33 = vld [vmem:[%s5454_s1 + $0x304] ss:$16 sps:$4 sm:$0xff]   ;;  %v3684_v35 = vld [vmem:[%s5454_s1 + $0x300] ss:$16 sps:$4 sm:$0xff]  }
  0x25   :  { %2078 = vmatpush1.bf16.msra.mxu1 %v3659_v18  ;;  %v3685_v39 = vld [vmem:[%s5454_s1 + $0x124] ss:$16 sps:$4 sm:$0xff]   ;;  %v3689_v41 = vld [vmem:[%s5454_s1 + $0x120] ss:$16 sps:$4 sm:$0xff]  }
  0x26   :  { %2119 = vmatpush1.bf16.msra.mxu0 %v3660_v19  ;;  %2079 = vmatprep.subr.bf16.mxu1 %v3661_v20  ;;  %v3687_v40 = vld [vmem:[%s5454_s1 + $0x324] ss:$16 sps:$4 sm:$0xff]   ;;  %v3690_v44 = vld [vmem:[%s5454_s1 + $0x320] ss:$16 sps:$4 sm:$0xff]   ;;  %v3730_v19 = vld [vmem:[%s5454_s1 + $0x8] ss:$16 sps:$4 sm:$0xff]  }
  0x27   :  { %2120 = vmatprep.subr.bf16.mxu0 %v3663_v21  ;;  %v3691_v45 = vld [vmem:[%s5454_s1 + $0x144] ss:$16 sps:$4 sm:$0xff]   ;;  %v3695_v47 = vld [vmem:[%s5454_s1 + $0x140] ss:$16 sps:$4 sm:$0xff]   ;;  %v3738_v21 = vld [vmem:[%s5454_s1 + $0x2c] ss:$16 sps:$4 sm:$0xff]  }
  0x28   :  { %v3693_v46 = vld [vmem:[%s5454_s1 + $0x344] ss:$16 sps:$4 sm:$0xff]   ;;  %v3696_v48 = vld [vmem:[%s5454_s1 + $0x340] ss:$16 sps:$4 sm:$0xff]  }
  0x29   :  { %2080 = vmatpush1.bf16.msra.mxu1 %v3665_v22  ;;  %v3697_v50 = vld [vmem:[%s5454_s1 + $0x164] ss:$16 sps:$4 sm:$0xff]   ;;  %v3701_v53 = vld [vmem:[%s5454_s1 + $0x160] ss:$16 sps:$4 sm:$0xff]  }
  0x2a   :  { %2121 = vmatpush1.bf16.msra.mxu0 %v3666_v23  ;;  %2081 = vmatprep.subr.bf16.mxu1 %v3667_v24  ;;  %v3699_v51 = vld [vmem:[%s5454_s1 + $0x364] ss:$16 sps:$4 sm:$0xff]   ;;  %v3702_v55 = vld [vmem:[%s5454_s1 + $0x360] ss:$16 sps:$4 sm:$0xff]   ;;  %v3736_v24 = vld [vmem:[%s5454_s1 + $0x28] ss:$16 sps:$4 sm:$0xff]  }
  0x2b   :  { %2122 = vmatprep.subr.bf16.mxu0 %v3669_v25  ;;  %v42_v52 = vld [vmem:[%s5453_s0] sm:$0xff] }
  0x2c   :  { %v395_v54 = vrot.slane %v42_v52, %v4464_v49  ;;  %v3703_v56 = vld [vmem:[%s5454_s1 + $0x184] ss:$16 sps:$4 sm:$0xff]   ;;  %v3707_v59 = vld [vmem:[%s5454_s1 + $0x180] ss:$16 sps:$4 sm:$0xff]   ;;  %v388_v5 = vcombine.high %v42_v52, %v42_v52  ;;  %v3780_v52 = vld [vmem:[%s5454_s1 + $0x10c] ss:$16 sps:$4 sm:$0xff]  }
  0x2d   :  { %2082 = vmatpush1.bf16.msra.mxu1 %v3671_v26  ;;  %v3705_v57 = vld [vmem:[%s5454_s1 + $0x384] ss:$16 sps:$4 sm:$0xff]   ;;  %v3708_v61 = vld [vmem:[%s5454_s1 + $0x380] ss:$16 sps:$4 sm:$0xff]   ;;  %v3744_v26 = vld [vmem:[%s5454_s1 + $0x4c] ss:$16 sps:$4 sm:$0xff]  }
  0x2e   :  { %2123 = vmatpush1.bf16.msra.mxu0 %v3672_v27  ;;  %2083 = vmatprep.subr.bf16.mxu1 %v3673_v28  ;;  %v403_v58 = vcombine.high %v395_v54, %v395_v54  ;;  %v3709_v62 = vld [vmem:[%s5454_s1 + $0x1a4] ss:$16 sps:$4 sm:$0xff]   ;;  %v3713_v1 = vld [vmem:[%s5454_s1 + $0x1a0] ss:$16 sps:$4 sm:$0xff]   ;;  %v4529_v10 = vrot.slane %v388_v5, %v4464_v49  ;;  %v4535_v12 = vrot.slane %v395_v54, %v4464_v49  ;;  %v3742_v28 = vld [vmem:[%s5454_s1 + $0x48] ss:$16 sps:$4 sm:$0xff]  }
  0x2f   :  { %2124 = vmatprep.subr.bf16.mxu0 %v3675_v29  ;;  %v3711_v63 = vld [vmem:[%s5454_s1 + $0x3a4] ss:$16 sps:$4 sm:$0xff]   ;;  %v3714_v2 = vld [vmem:[%s5454_s1 + $0x3a0] ss:$16 sps:$4 sm:$0xff]   ;;  %v3778_v54 = vld [vmem:[%s5454_s1 + $0x108] ss:$16 sps:$4 sm:$0xff]  }
  0x30   :  { %v425_v60 = vrot.slane %v403_v58, %v4464_v49  ;;  %v3715_v3 = vld [vmem:[%s5454_s1 + $0x1c4] ss:$16 sps:$4 sm:$0xff]   ;;  %v3719_v6 = vld [vmem:[%s5454_s1 + $0x1c0] ss:$16 sps:$4 sm:$0xff]   ;;  %v404_v16 = vcombine.high %v4529_v10, %v4529_v10  ;;  %v4553_v18 = vcombine.high %v4535_v12, %v4535_v12  ;;  %v3784_v58 = vld [vmem:[%s5454_s1 + $0x128] ss:$16 sps:$4 sm:$0xff]  }
  0x31   :  { %2084 = vmatpush1.bf16.msra.mxu1 %v3677_v30  ;;  %v3717_v4 = vld [vmem:[%s5454_s1 + $0x3c4] ss:$16 sps:$4 sm:$0xff]   ;;  %v3720_v7 = vld [vmem:[%s5454_s1 + $0x3c0] ss:$16 sps:$4 sm:$0xff]   ;;  %v3750_v30 = vld [vmem:[%s5454_s1 + $0x6c] ss:$16 sps:$4 sm:$0xff]  }
  0x32   :  { %2125 = vmatpush1.bf16.msra.mxu0 %v3678_v31  ;;  %2085 = vmatprep.subr.bf16.mxu1 %v3679_v32  ;;  %v4501_v0 = vcombine.high %v425_v60, %v425_v60  ;;  %v3721_v8 = vld [vmem:[%s5454_s1 + $0x1e4] ss:$16 sps:$4 sm:$0xff]   ;;  %v3725_v11 = vld [vmem:[%s5454_s1 + $0x1e0] ss:$16 sps:$4 sm:$0xff]   ;;  %v4565_v22 = vrot.slane %v404_v16, %v4464_v49  ;;  %v3748_v32 = vld [vmem:[%s5454_s1 + $0x68] ss:$16 sps:$4 sm:$0xff]  }
  0x33   :  { %2126 = vmatprep.subr.bf16.mxu0 %v3681_v33  ;;  %2101 = vmatprep.mubr.bf16.mxu1 %v425_v60  ;;  %v3723_v9 = vld [vmem:[%s5454_s1 + $0x3e4] ss:$16 sps:$4 sm:$0xff]   ;;  %v3726_v13 = vld [vmem:[%s5454_s1 + $0x3e0] ss:$16 sps:$4 sm:$0xff]   ;;  %v3804_v5 = vld [vmem:[%s5454_s1 + $0x18c] ss:$16 sps:$4 sm:$0xff]  }
  0x34   :  { %2142 = vmatprep.mubr.bf16.mxu0 %v4501_v0  ;;  %v3729_v14 = vld [vmem:[%s5454_s1 + $0x404] ss:$16 sps:$4 sm:$0xff]   ;;  %v3727_v17 = vld [vmem:[%s5454_s1 + $0x400] ss:$16 sps:$4 sm:$0xff]  }
  0x35   :  { %2086 = vmatpush1.bf16.msra.mxu1 %v3683_v34  ;;  %v3735_v20 = vld [vmem:[%s5454_s1 + $0x424] ss:$16 sps:$4 sm:$0xff]   ;;  %v3733_v23 = vld [vmem:[%s5454_s1 + $0x420] ss:$16 sps:$4 sm:$0xff]   ;;  %v3756_v34 = vld [vmem:[%s5454_s1 + $0x8c] ss:$16 sps:$4 sm:$0xff]  }
  0x36   :  { %2127 = vmatpush1.bf16.msra.mxu0 %v3684_v35  ;;  %2087 = vmatprep.subr.bf16.mxu1 %v3685_v39  ;;  %v3741_v25 = vld [vmem:[%s5454_s1 + $0x444] ss:$16 sps:$4 sm:$0xff]   ;;  %v3739_v27 = vld [vmem:[%s5454_s1 + $0x440] ss:$16 sps:$4 sm:$0xff]  }
  0x37   :  { %2128 = vmatprep.subr.bf16.mxu0 %v3687_v40  ;;  %v3747_v29 = vld [vmem:[%s5454_s1 + $0x464] ss:$16 sps:$4 sm:$0xff]   ;;  %v3745_v31 = vld [vmem:[%s5454_s1 + $0x460] ss:$16 sps:$4 sm:$0xff]   ;;  %v3760_v40 = vld [vmem:[%s5454_s1 + $0xa8] ss:$16 sps:$4 sm:$0xff]  }
  0x38   :  { %v3753_v33 = vld [vmem:[%s5454_s1 + $0x484] ss:$16 sps:$4 sm:$0xff]   ;;  %v3751_v35 = vld [vmem:[%s5454_s1 + $0x480] ss:$16 sps:$4 sm:$0xff]  }
  0x39   :  { %2088 = vmatpush1.bf16.msra.mxu1 %v3689_v41  ;;  %v3759_v37 = vld [vmem:[%s5454_s1 + $0x4a4] ss:$16 sps:$4 sm:$0xff]   ;;  %v3757_v39 = vld [vmem:[%s5454_s1 + $0x4a0] ss:$16 sps:$4 sm:$0xff]  }
  0x3a   :  { %2129 = vmatpush1.bf16.msra.mxu0 %v3690_v44  ;;  %2089 = vmatprep.subr.bf16.mxu1 %v3691_v45  ;;  %v3765_v41 = vld [vmem:[%s5454_s1 + $0x4c4] ss:$16 sps:$4 sm:$0xff]   ;;  %v3763_v44 = vld [vmem:[%s5454_s1 + $0x4c0] ss:$16 sps:$4 sm:$0xff]   ;;  %v3766_v45 = vld [vmem:[%s5454_s1 + $0xc8] ss:$16 sps:$4 sm:$0xff]  }
  0x3b   :  { %2130 = vmatprep.subr.bf16.mxu0 %v3693_v46  ;;  %v3771_v46 = vld [vmem:[%s5454_s1 + $0x4e4] ss:$16 sps:$4 sm:$0xff]   ;;  %v3811_v16 = vld [vmem:[%s5454_s1 + $0x5c0] ss:$16 sps:$4 sm:$0xff]  }
  0x3d   :  { %2090 = vmatpush1.bf16.msra.mxu1 %v3695_v47  ;;  %v3774_v47 = vld [vmem:[%s5454_s1 + $0xec] ss:$16 sps:$4 sm:$0xff]  }
  0x3e   :  { %2131 = vmatpush1.bf16.msra.mxu0 %v3696_v48  ;;  %2091 = vmatprep.subr.bf16.mxu1 %v3697_v50  ;;  %v3769_v48 = vld [vmem:[%s5454_s1 + $0x4e0] ss:$16 sps:$4 sm:$0xff]   ;;  %v3772_v50 = vld [vmem:[%s5454_s1 + $0xe8] ss:$16 sps:$4 sm:$0xff]  }
  0x3f   :  { %2132 = vmatprep.subr.bf16.mxu0 %v3699_v51  ;;  %v3777_v51 = vld [vmem:[%s5454_s1 + $0x504] ss:$16 sps:$4 sm:$0xff]  }
  0x41   :  { %2092 = vmatpush1.bf16.msra.mxu1 %v3701_v53  ;;  %v3775_v53 = vld [vmem:[%s5454_s1 + $0x500] ss:$16 sps:$4 sm:$0xff]  }
  0x42   :  { %2133 = vmatpush1.bf16.msra.mxu0 %v3702_v55  ;;  %2093 = vmatprep.subr.bf16.mxu1 %v3703_v56  ;;  %v3783_v55 = vld [vmem:[%s5454_s1 + $0x524] ss:$16 sps:$4 sm:$0xff]   ;;  %v3786_v56 = vld [vmem:[%s5454_s1 + $0x12c] ss:$16 sps:$4 sm:$0xff]  }
  0x43   :  { %2134 = vmatprep.subr.bf16.mxu0 %v3705_v57  ;;  %v3781_v57 = vld [vmem:[%s5454_s1 + $0x520] ss:$16 sps:$4 sm:$0xff]  }
  0x45   :  { %2094 = vmatpush1.bf16.msra.mxu1 %v3707_v59  ;;  %v3789_v59 = vld [vmem:[%s5454_s1 + $0x544] ss:$16 sps:$4 sm:$0xff]  }
  0x46   :  { %2135 = vmatpush1.bf16.msra.mxu0 %v3708_v61  ;;  %2095 = vmatprep.subr.bf16.mxu1 %v3709_v62  ;;  %v3787_v61 = vld [vmem:[%s5454_s1 + $0x540] ss:$16 sps:$4 sm:$0xff]   ;;  %v3790_v62 = vld [vmem:[%s5454_s1 + $0x148] ss:$16 sps:$4 sm:$0xff]  }
  0x47   :  { %2136 = vmatprep.subr.bf16.mxu0 %v3711_v63  ;;  %v3795_v63 = vld [vmem:[%s5454_s1 + $0x564] ss:$16 sps:$4 sm:$0xff]  }
  0x49   :  { %2096 = vmatpush1.bf16.msra.mxu1 %v3713_v1  ;;  %v3798_v1 = vld [vmem:[%s5454_s1 + $0x16c] ss:$16 sps:$4 sm:$0xff]  }
  0x4a   :  { %2137 = vmatpush1.bf16.msra.mxu0 %v3714_v2  ;;  %2097 = vmatprep.subr.bf16.mxu1 %v3715_v3  ;;  %v3793_v2 = vld [vmem:[%s5454_s1 + $0x560] ss:$16 sps:$4 sm:$0xff]   ;;  %v3796_v3 = vld [vmem:[%s5454_s1 + $0x168] ss:$16 sps:$4 sm:$0xff]  }
  0x4b   :  { %2138 = vmatprep.subr.bf16.mxu0 %v3717_v4  ;;  %v3801_v4 = vld [vmem:[%s5454_s1 + $0x584] ss:$16 sps:$4 sm:$0xff]  }
  0x4d   :  { %2098 = vmatpush1.bf16.msra.mxu1 %v3719_v6  ;;  %v3799_v6 = vld [vmem:[%s5454_s1 + $0x580] ss:$16 sps:$4 sm:$0xff]  }
  0x4e   :  { %2139 = vmatpush1.bf16.msra.mxu0 %v3720_v7  ;;  %2099 = vmatprep.subr.bf16.mxu1 %v3721_v8  ;;  %v3802_v7 = vld [vmem:[%s5454_s1 + $0x188] ss:$16 sps:$4 sm:$0xff]   ;;  %v3807_v8 = vld [vmem:[%s5454_s1 + $0x5a4] ss:$16 sps:$4 sm:$0xff]  }
  0x4f   :  { %2140 = vmatprep.subr.bf16.mxu0 %v3723_v9  ;;  %v3810_v9 = vld [vmem:[%s5454_s1 + $0x1ac] ss:$16 sps:$4 sm:$0xff]  }
  0x51   :  { %2100 = vmatpush1.bf16.msra.mxu1 %v3725_v11  ;;  %v3805_v11 = vld [vmem:[%s5454_s1 + $0x5a0] ss:$16 sps:$4 sm:$0xff]  }
  0x52   :  { %2141 = vmatpush1.bf16.msra.mxu0 %v3726_v13  ;;  %2274 = vmatprep.subr.bf16.mxu1 %v3732_v15  ;;  %v3808_v13 = vld [vmem:[%s5454_s1 + $0x1a8] ss:$16 sps:$4 sm:$0xff]   ;;  %v3816_v15 = vld [vmem:[%s5454_s1 + $0x1cc] ss:$16 sps:$4 sm:$0xff]  }
  0x53   :  { %2151 = vmatprep.subr.bf16.mxu0 %v3729_v14  ;;  %v3813_v14 = vld [vmem:[%s5454_s1 + $0x5c4] ss:$16 sps:$4 sm:$0xff]  }
  0x54   :  { %2102 = vmatmul.mubr.bf16.vlgmr.msra.gmra.mrb[0].mxu1 %v4535_v12 }
  0x55   :  { %2143 = vmatmul.mubr.bf16.vlgmr.msra.gmra.mrb[0].mxu0 %v4553_v18  ;;  %2275 = vmatpush1.bf16.msra.mxu1 %v3730_v19  ;;  %v3819_v19 = vld [vmem:[%s5454_s1 + $0x5e4] ss:$16 sps:$4 sm:$0xff]  }
  0x56   :  { %2152 = vmatpush1.bf16.msra.mxu0 %v3727_v17  ;;  %2276 = vmatprep.subr.bf16.mxu1 %v3738_v21  ;;  %v3814_v17 = vld [vmem:[%s5454_s1 + $0x1c8] ss:$16 sps:$4 sm:$0xff]   ;;  %v3817_v21 = vld [vmem:[%s5454_s1 + $0x5e0] ss:$16 sps:$4 sm:$0xff]  }
  0x57   :  { %2153 = vmatprep.subr.bf16.mxu0 %v3735_v20  ;;  %2183 = vmatprep.mubr.bf16.mxu0 %v4565_v22  ;;  %v3822_v20 = vld [vmem:[%s5454_s1 + $0x1ec] ss:$16 sps:$4 sm:$0xff]  }
  0x58   :  { %2306 = vmatprep.mubr.bf16.mxu1 %v425_v60  ;;  %v3792_v60 = vld [vmem:[%s5454_s1 + $0x14c] ss:$16 sps:$4 sm:$0xff]  }
  0x59   :  { %2277 = vmatpush1.bf16.msra.mxu1 %v3736_v24  ;;  %v3826_v24 = vld [vmem:[%s5454_s1 + $0x604] ss:$16 sps:$4 sm:$0xff]  }
  0x5a   :  { %2154 = vmatpush1.bf16.msra.mxu0 %v3733_v23  ;;  %2278 = vmatprep.subr.bf16.mxu1 %v3744_v26  ;;  %v3820_v23 = vld [vmem:[%s5454_s1 + $0x1e8] ss:$16 sps:$4 sm:$0xff]   ;;  %v3824_v26 = vld [vmem:[%s5454_s1 + $0x600] ss:$16 sps:$4 sm:$0xff]  }
  0x5b   :  { %2155 = vmatprep.subr.bf16.mxu0 %v3741_v25  ;;  %v3829_v25 = vld [vmem:[%s5454_s1 + $0x20c] ss:$16 sps:$4 sm:$0xff]  }
  0x5d   :  { %2279 = vmatpush1.bf16.msra.mxu1 %v3742_v28  ;;  %v3827_v28 = vld [vmem:[%s5454_s1 + $0x208] ss:$16 sps:$4 sm:$0xff]  }
  0x5e   :  { %2156 = vmatpush1.bf16.msra.mxu0 %v3739_v27  ;;  %2280 = vmatprep.subr.bf16.mxu1 %v3750_v30  ;;  %v4755_v27 = vrot.slane %v4529_v10, %v4464_v49  ;;  %v3835_v30 = vld [vmem:[%s5454_s1 + $0x22c] ss:$16 sps:$4 sm:$0xff]   ;;  %v4768_v10 = vcombine.high %v4565_v22, %v4565_v22 }
  0x5f   :  { %2157 = vmatprep.subr.bf16.mxu0 %v3747_v29  ;;  %v3832_v29 = vld [vmem:[%s5454_s1 + $0x624] ss:$16 sps:$4 sm:$0xff]  }
  0x61   :  { %2281 = vmatpush1.bf16.msra.mxu1 %v3748_v32  ;;  %v3833_v32 = vld [vmem:[%s5454_s1 + $0x228] ss:$16 sps:$4 sm:$0xff]  }
  0x62   :  { %2158 = vmatpush1.bf16.msra.mxu0 %v3745_v31  ;;  %2282 = vmatprep.subr.bf16.mxu1 %v3756_v34  ;;  %v3830_v31 = vld [vmem:[%s5454_s1 + $0x620] ss:$16 sps:$4 sm:$0xff]  }
  0x63   :  { %2159 = vmatprep.subr.bf16.mxu0 %v3753_v33  ;;  %v3838_v33 = vld [vmem:[%s5454_s1 + $0x644] ss:$16 sps:$4 sm:$0xff]   ;;  %v3836_v34 = vld [vmem:[%s5454_s1 + $0x640] ss:$16 sps:$4 sm:$0xff]  }
  0x65   :  { %2283 = vmatpush1.bf16.msra.mxu1 %v3754_v36  ;;  %v3844_v36 = vld [vmem:[%s5454_s1 + $0x664] ss:$16 sps:$4 sm:$0xff]  }
  0x66   :  { %2160 = vmatpush1.bf16.msra.mxu0 %v3751_v35  ;;  %2284 = vmatprep.subr.bf16.mxu1 %v3762_v38  ;;  %v3839_v35 = vld [vmem:[%s5454_s1 + $0x248] ss:$16 sps:$4 sm:$0xff]  }
  0x67   :  { %2161 = vmatprep.subr.bf16.mxu0 %v3759_v37  ;;  %v3842_v37 = vld [vmem:[%s5454_s1 + $0x660] ss:$16 sps:$4 sm:$0xff]   ;;  %v3845_v38 = vld [vmem:[%s5454_s1 + $0x268] ss:$16 sps:$4 sm:$0xff]  }
  0x69   :  { %2285 = vmatpush1.bf16.msra.mxu1 %v3760_v40  ;;  %v3853_v40 = vld [vmem:[%s5454_s1 + $0x28c] ss:$16 sps:$4 sm:$0xff]  }
  0x6a   :  { %2162 = vmatpush1.bf16.msra.mxu0 %v3757_v39  ;;  %2286 = vmatprep.subr.bf16.mxu1 %v3768_v43  ;;  %v3850_v39 = vld [vmem:[%s5454_s1 + $0x684] ss:$16 sps:$4 sm:$0xff]   ;;  %v3851_v43 = vld [vmem:[%s5454_s1 + $0x288] ss:$16 sps:$4 sm:$0xff]  }
  0x6b   :  { %2163 = vmatprep.subr.bf16.mxu0 %v3765_v41  ;;  %v3848_v41 = vld [vmem:[%s5454_s1 + $0x680] ss:$16 sps:$4 sm:$0xff]  }
  0x6d   :  { %2287 = vmatpush1.bf16.msra.mxu1 %v3766_v45  ;;  %v3859_v45 = vld [vmem:[%s5454_s1 + $0x2ac] ss:$16 sps:$4 sm:$0xff]  }
  0x6e   :  { %2164 = vmatpush1.bf16.msra.mxu0 %v3763_v44  ;;  %2288 = vmatprep.subr.bf16.mxu1 %v3774_v47  ;;  %v3856_v44 = vld [vmem:[%s5454_s1 + $0x6a4] ss:$16 sps:$4 sm:$0xff]   ;;  %v3857_v47 = vld [vmem:[%s5454_s1 + $0x2a8] ss:$16 sps:$4 sm:$0xff]  }
  0x6f   :  { %2165 = vmatprep.subr.bf16.mxu0 %v3771_v46  ;;  %v3854_v46 = vld [vmem:[%s5454_s1 + $0x6a0] ss:$16 sps:$4 sm:$0xff]  }
  0x71   :  { %2289 = vmatpush1.bf16.msra.mxu1 %v3772_v50  ;;  %v3865_v50 = vld [vmem:[%s5454_s1 + $0x2cc] ss:$16 sps:$4 sm:$0xff]  }
  0x72   :  { %2166 = vmatpush1.bf16.msra.mxu0 %v3769_v48  ;;  %2290 = vmatprep.subr.bf16.mxu1 %v3780_v52  ;;  %v3862_v48 = vld [vmem:[%s5454_s1 + $0x6c4] ss:$16 sps:$4 sm:$0xff]   ;;  %v3863_v52 = vld [vmem:[%s5454_s1 + $0x2c8] ss:$16 sps:$4 sm:$0xff]  }
  0x73   :  { %2167 = vmatprep.subr.bf16.mxu0 %v3777_v51  ;;  %v3860_v51 = vld [vmem:[%s5454_s1 + $0x6c0] ss:$16 sps:$4 sm:$0xff]  }
  0x75   :  { %2291 = vmatpush1.bf16.msra.mxu1 %v3778_v54  ;;  %v3871_v54 = vld [vmem:[%s5454_s1 + $0x2ec] ss:$16 sps:$4 sm:$0xff]  }
  0x76   :  { %2168 = vmatpush1.bf16.msra.mxu0 %v3775_v53  ;;  %2292 = vmatprep.subr.bf16.mxu1 %v3786_v56  ;;  %v3868_v53 = vld [vmem:[%s5454_s1 + $0x6e4] ss:$16 sps:$4 sm:$0xff]   ;;  %v3869_v56 = vld [vmem:[%s5454_s1 + $0x2e8] ss:$16 sps:$4 sm:$0xff]  }
  0x77   :  { %2169 = vmatprep.subr.bf16.mxu0 %v3783_v55  ;;  %v3866_v55 = vld [vmem:[%s5454_s1 + $0x6e0] ss:$16 sps:$4 sm:$0xff]  }
  0x79   :  { %2293 = vmatpush1.bf16.msra.mxu1 %v3784_v58  ;;  %v3877_v58 = vld [vmem:[%s5454_s1 + $0x30c] ss:$16 sps:$4 sm:$0xff]  }
  0x7a   :  { %2170 = vmatpush1.bf16.msra.mxu0 %v3781_v57  ;;  %2294 = vmatprep.subr.bf16.mxu1 %v3792_v60  ;;  %v3874_v57 = vld [vmem:[%s5454_s1 + $0x704] ss:$16 sps:$4 sm:$0xff]   ;;  %v3875_v60 = vld [vmem:[%s5454_s1 + $0x308] ss:$16 sps:$4 sm:$0xff]  }
  0x7b   :  { %2171 = vmatprep.subr.bf16.mxu0 %v3789_v59  ;;  %v3872_v59 = vld [vmem:[%s5454_s1 + $0x700] ss:$16 sps:$4 sm:$0xff]  }
  0x7d   :  { %2295 = vmatpush1.bf16.msra.mxu1 %v3790_v62  ;;  %v3883_v62 = vld [vmem:[%s5454_s1 + $0x32c] ss:$16 sps:$4 sm:$0xff]  }
  0x7e   :  { %2172 = vmatpush1.bf16.msra.mxu0 %v3787_v61  ;;  %2296 = vmatprep.subr.bf16.mxu1 %v3798_v1  ;;  %v3880_v61 = vld [vmem:[%s5454_s1 + $0x724] ss:$16 sps:$4 sm:$0xff]   ;;  %v3881_v1 = vld [vmem:[%s5454_s1 + $0x328] ss:$16 sps:$4 sm:$0xff]  }
  0x7f   :  { %2173 = vmatprep.subr.bf16.mxu0 %v3795_v63  ;;  %v3878_v63 = vld [vmem:[%s5454_s1 + $0x720] ss:$16 sps:$4 sm:$0xff]  }
  0x81   :  { %2297 = vmatpush1.bf16.msra.mxu1 %v3796_v3  ;;  %v3889_v3 = vld [vmem:[%s5454_s1 + $0x34c] ss:$16 sps:$4 sm:$0xff]  }
  0x82   :  { %2174 = vmatpush1.bf16.msra.mxu0 %v3793_v2  ;;  %2298 = vmatprep.subr.bf16.mxu1 %v3804_v5  ;;  %v3886_v2 = vld [vmem:[%s5454_s1 + $0x744] ss:$16 sps:$4 sm:$0xff]   ;;  %v3887_v5 = vld [vmem:[%s5454_s1 + $0x348] ss:$16 sps:$4 sm:$0xff]  }
  0x83   :  { %2175 = vmatprep.subr.bf16.mxu0 %v3801_v4  ;;  %v3884_v4 = vld [vmem:[%s5454_s1 + $0x740] ss:$16 sps:$4 sm:$0xff]  }
  0x85   :  { %2299 = vmatpush1.bf16.msra.mxu1 %v3802_v7  ;;  %v3895_v7 = vld [vmem:[%s5454_s1 + $0x36c] ss:$16 sps:$4 sm:$0xff]  }
  0x86   :  { %2176 = vmatpush1.bf16.msra.mxu0 %v3799_v6  ;;  %2300 = vmatprep.subr.bf16.mxu1 %v3810_v9  ;;  %v3892_v6 = vld [vmem:[%s5454_s1 + $0x764] ss:$16 sps:$4 sm:$0xff]   ;;  %v3893_v9 = vld [vmem:[%s5454_s1 + $0x368] ss:$16 sps:$4 sm:$0xff]  }
  0x87   :  { %2177 = vmatprep.subr.bf16.mxu0 %v3807_v8  ;;  %v3890_v8 = vld [vmem:[%s5454_s1 + $0x760] ss:$16 sps:$4 sm:$0xff]  }
  0x89   :  { %2301 = vmatpush1.bf16.msra.mxu1 %v3808_v13  ;;  %v3901_v13 = vld [vmem:[%s5454_s1 + $0x38c] ss:$16 sps:$4 sm:$0xff]  }
  0x8a   :  { %2178 = vmatpush1.bf16.msra.mxu0 %v3805_v11  ;;  %2302 = vmatprep.subr.bf16.mxu1 %v3816_v15  ;;  %v3898_v11 = vld [vmem:[%s5454_s1 + $0x784] ss:$16 sps:$4 sm:$0xff]   ;;  %v3899_v15 = vld [vmem:[%s5454_s1 + $0x388] ss:$16 sps:$4 sm:$0xff]  }
  0x8b   :  { %2179 = vmatprep.subr.bf16.mxu0 %v3813_v14  ;;  %v3896_v14 = vld [vmem:[%s5454_s1 + $0x780] ss:$16 sps:$4 sm:$0xff]  }
  0x8d   :  { %2303 = vmatpush1.bf16.msra.mxu1 %v3814_v17  ;;  %v3907_v17 = vld [vmem:[%s5454_s1 + $0x3ac] ss:$16 sps:$4 sm:$0xff]  }
  0x8e   :  { %2180 = vmatpush1.bf16.msra.mxu0 %v3811_v16  ;;  %2304 = vmatprep.subr.bf16.mxu1 %v3822_v20  ;;  %v3904_v16 = vld [vmem:[%s5454_s1 + $0x7a4] ss:$16 sps:$4 sm:$0xff]   ;;  %v3905_v20 = vld [vmem:[%s5454_s1 + $0x3a8] ss:$16 sps:$4 sm:$0xff]  }
  0x8f   :  { %2181 = vmatprep.subr.bf16.mxu0 %v3819_v19  ;;  %v3902_v19 = vld [vmem:[%s5454_s1 + $0x7a0] ss:$16 sps:$4 sm:$0xff]  }
  0x91   :  { %2305 = vmatpush1.bf16.msra.mxu1 %v3820_v23  ;;  %v3913_v23 = vld [vmem:[%s5454_s1 + $0x3cc] ss:$16 sps:$4 sm:$0xff]  }
  0x92   :  { %2182 = vmatpush1.bf16.msra.mxu0 %v3817_v21  ;;  %2315 = vmatprep.subr.bf16.mxu1 %v3829_v25  ;;  %v3910_v21 = vld [vmem:[%s5454_s1 + $0x7c4] ss:$16 sps:$4 sm:$0xff]   ;;  %v3911_v25 = vld [vmem:[%s5454_s1 + $0x3c8] ss:$16 sps:$4 sm:$0xff]  }
  0x93   :  { %2192 = vmatprep.subr.bf16.mxu0 %v3826_v24  ;;  %v3908_v24 = vld [vmem:[%s5454_s1 + $0x7c0] ss:$16 sps:$4 sm:$0xff]  }
  0x94   :  { %2307 = vmatmul.mubr.bf16.vlgmr.msra.gmra.mrb[4].mxu1 %v4535_v12  ;;  %v3841_v12 = vld [vmem:[%s5454_s1 + $0x24c] ss:$16 sps:$4 sm:$0xff]  }
  0x95   :  { %2184 = vmatmul.mubr.bf16.vlgmr.msra.gmra.mrb[0].mxu0 %v4755_v27  ;;  %2316 = vmatpush1.bf16.msra.mxu1 %v3827_v28  ;;  %v3919_v28 = vld [vmem:[%s5454_s1 + $0x3ec] ss:$16 sps:$4 sm:$0xff]  }
  0x96   :  { %2193 = vmatpush1.bf16.msra.mxu0 %v3824_v26  ;;  %2317 = vmatprep.subr.bf16.mxu1 %v3835_v30  ;;  %v3916_v26 = vld [vmem:[%s5454_s1 + $0x7e4] ss:$16 sps:$4 sm:$0xff]   ;;  %v4948_v30 = vld.sshfl [vmem:[%s5453_s0 + $0x8] sm:$0x11 pattern:$0x75316420] }
  0x97   :  { %2194 = vmatprep.subr.bf16.mxu0 %v3832_v29  ;;  %2224 = vmatprep.mubr.bf16.mxu0 %v4768_v10  ;;  %v3914_v29 = vld [vmem:[%s5454_s1 + $0x7e0] ss:$16 sps:$4 sm:$0xff]  }
  0x98   :  { %2347 = vmatprep.mubr.bf16.mxu1 %v4501_v0  ;;  %v3847_v0 = vld [vmem:[%s5454_s1 + $0x26c] ss:$16 sps:$4 sm:$0xff]  }
  0x99   :  { %2318 = vmatpush1.bf16.msra.mxu1 %v3833_v32  ;;  %v3922_v32 = vld [vmem:[%s5454_s1 + $0x804] ss:$16 sps:$4 sm:$0xff]  }
  0x9a   :  { %2195 = vmatpush1.bf16.msra.mxu0 %v3830_v31  ;;  %2319 = vmatprep.subr.bf16.mxu1 %v3841_v12  ;;  %v3917_v31 = vld [vmem:[%s5454_s1 + $0x3e8] ss:$16 sps:$4 sm:$0xff]   ;;  %v444_v12 = vcombine.high %v4948_v30, %v4948_v30 }
  0x9b   :  { %2196 = vmatprep.subr.bf16.mxu0 %v3838_v33  ;;  %v3925_v33 = vld [vmem:[%s5454_s1 + $0x40c] ss:$16 sps:$4 sm:$0xff]  }
  0x9d   :  { %2320 = vmatpush1.bf16.msra.mxu1 %v3839_v35  ;;  %v4966_v35 = vcombine.high %v4755_v27, %v4755_v27 }
  0x9e   :  { %2197 = vmatpush1.bf16.msra.mxu0 %v3836_v34  ;;  %2321 = vmatprep.subr.bf16.mxu1 %v3847_v0  ;;  %v3920_v34 = vld [vmem:[%s5454_s1 + $0x800] ss:$16 sps:$4 sm:$0xff]   ;;  %v3928_v0 = vld [vmem:[%s5454_s1 + $0x824] ss:$16 sps:$4 sm:$0xff]  }
  0x9f   :  { %2198 = vmatprep.subr.bf16.mxu0 %v3844_v36  ;;  %v3923_v36 = vld [vmem:[%s5454_s1 + $0x408] ss:$16 sps:$4 sm:$0xff]  }
  0xa1   :  { %2322 = vmatpush1.bf16.msra.mxu1 %v3845_v38  ;;  %v3926_v38 = vld [vmem:[%s5454_s1 + $0x820] ss:$16 sps:$4 sm:$0xff]  }
  0xa2   :  { %2199 = vmatpush1.bf16.msra.mxu0 %v3842_v37  ;;  %2323 = vmatprep.subr.bf16.mxu1 %v3853_v40  ;;  %v3931_v37 = vld [vmem:[%s5454_s1 + $0x42c] ss:$16 sps:$4 sm:$0xff]   ;;  %v4984_v40 = vrot.slane %v444_v12, %v4464_v49  ;;  %v4004_v12 = vld [vmem:[%s5454_s1 + $0x9c0] ss:$16 sps:$4 sm:$0xff]  }
  0xa3   :  { %2200 = vmatprep.subr.bf16.mxu0 %v3850_v39  ;;  %v3929_v39 = vld [vmem:[%s5454_s1 + $0x428] ss:$16 sps:$4 sm:$0xff]  }
  0xa5   :  { %2324 = vmatpush1.bf16.msra.mxu1 %v3851_v43  ;;  %v3937_v43 = vld [vmem:[%s5454_s1 + $0x44c] ss:$16 sps:$4 sm:$0xff]  }
  0xa6   :  { %2201 = vmatpush1.bf16.msra.mxu0 %v3848_v41  ;;  %2325 = vmatprep.subr.bf16.mxu1 %v3859_v45  ;;  %v3934_v41 = vld [vmem:[%s5454_s1 + $0x844] ss:$16 sps:$4 sm:$0xff]  }
  0xa7   :  { %2202 = vmatprep.subr.bf16.mxu0 %v3856_v44  ;;  %v3932_v44 = vld [vmem:[%s5454_s1 + $0x840] ss:$16 sps:$4 sm:$0xff]   ;;  %v3940_v45 = vld [vmem:[%s5454_s1 + $0x864] ss:$16 sps:$4 sm:$0xff]  }
  0xa9   :  { %2326 = vmatpush1.bf16.msra.mxu1 %v3857_v47  ;;  %v3938_v47 = vld [vmem:[%s5454_s1 + $0x860] ss:$16 sps:$4 sm:$0xff]  }
  0xaa   :  { %2203 = vmatpush1.bf16.msra.mxu0 %v3854_v46  ;;  %2327 = vmatprep.subr.bf16.mxu1 %v3865_v50  ;;  %v3943_v46 = vld [vmem:[%s5454_s1 + $0x46c] ss:$16 sps:$4 sm:$0xff]  }
  0xab   :  { %2204 = vmatprep.subr.bf16.mxu0 %v3862_v48  ;;  %v3946_v48 = vld [vmem:[%s5454_s1 + $0x884] ss:$16 sps:$4 sm:$0xff]   ;;  %v3949_v50 = vld [vmem:[%s5454_s1 + $0x48c] ss:$16 sps:$4 sm:$0xff]  }
  0xad   :  { %2328 = vmatpush1.bf16.msra.mxu1 %v3863_v52  ;;  %v3947_v52 = vld [vmem:[%s5454_s1 + $0x488] ss:$16 sps:$4 sm:$0xff]  }
  0xae   :  { %2205 = vmatpush1.bf16.msra.mxu0 %v3860_v51  ;;  %2329 = vmatprep.subr.bf16.mxu1 %v3871_v54  ;;  %v3944_v51 = vld [vmem:[%s5454_s1 + $0x880] ss:$16 sps:$4 sm:$0xff]   ;;  %v3955_v54 = vld [vmem:[%s5454_s1 + $0x4ac] ss:$16 sps:$4 sm:$0xff]  }
  0xaf   :  { %2206 = vmatprep.subr.bf16.mxu0 %v3868_v53  ;;  %v3952_v53 = vld [vmem:[%s5454_s1 + $0x8a4] ss:$16 sps:$4 sm:$0xff]  }
  0xb1   :  { %2330 = vmatpush1.bf16.msra.mxu1 %v3869_v56  ;;  %v3953_v56 = vld [vmem:[%s5454_s1 + $0x4a8] ss:$16 sps:$4 sm:$0xff]  }
  0xb2   :  { %2207 = vmatpush1.bf16.msra.mxu0 %v3866_v55  ;;  %2331 = vmatprep.subr.bf16.mxu1 %v3877_v58  ;;  %v3950_v55 = vld [vmem:[%s5454_s1 + $0x8a0] ss:$16 sps:$4 sm:$0xff]   ;;  %v3961_v58 = vld [vmem:[%s5454_s1 + $0x4cc] ss:$16 sps:$4 sm:$0xff]  }
  0xb3   :  { %2208 = vmatprep.subr.bf16.mxu0 %v3874_v57  ;;  %v3958_v57 = vld [vmem:[%s5454_s1 + $0x8c4] ss:$16 sps:$4 sm:$0xff]  }
  0xb5   :  { %2332 = vmatpush1.bf16.msra.mxu1 %v3875_v60  ;;  %v3959_v60 = vld [vmem:[%s5454_s1 + $0x4c8] ss:$16 sps:$4 sm:$0xff]  }
  0xb6   :  { %2209 = vmatpush1.bf16.msra.mxu0 %v3872_v59  ;;  %2333 = vmatprep.subr.bf16.mxu1 %v3883_v62  ;;  %v3956_v59 = vld [vmem:[%s5454_s1 + $0x8c0] ss:$16 sps:$4 sm:$0xff]   ;;  %v3967_v62 = vld [vmem:[%s5454_s1 + $0x4ec] ss:$16 sps:$4 sm:$0xff]  }
  0xb7   :  { %2210 = vmatprep.subr.bf16.mxu0 %v3880_v61  ;;  %v3964_v61 = vld [vmem:[%s5454_s1 + $0x8e4] ss:$16 sps:$4 sm:$0xff]  }
  0xb9   :  { %2334 = vmatpush1.bf16.msra.mxu1 %v3881_v1  ;;  %v3965_v1 = vld [vmem:[%s5454_s1 + $0x4e8] ss:$16 sps:$4 sm:$0xff]  }
  0xba   :  { %2211 = vmatpush1.bf16.msra.mxu0 %v3878_v63  ;;  %2335 = vmatprep.subr.bf16.mxu1 %v3889_v3  ;;  %v3962_v63 = vld [vmem:[%s5454_s1 + $0x8e0] ss:$16 sps:$4 sm:$0xff]   ;;  %v3973_v3 = vld [vmem:[%s5454_s1 + $0x50c] ss:$16 sps:$4 sm:$0xff]  }
  0xbb   :  { %2212 = vmatprep.subr.bf16.mxu0 %v3886_v2  ;;  %v3970_v2 = vld [vmem:[%s5454_s1 + $0x904] ss:$16 sps:$4 sm:$0xff]  }
  0xbd   :  { %2336 = vmatpush1.bf16.msra.mxu1 %v3887_v5  ;;  %v3971_v5 = vld [vmem:[%s5454_s1 + $0x508] ss:$16 sps:$4 sm:$0xff]  }
  0xbe   :  { %2213 = vmatpush1.bf16.msra.mxu0 %v3884_v4  ;;  %2337 = vmatprep.subr.bf16.mxu1 %v3895_v7  ;;  %v3968_v4 = vld [vmem:[%s5454_s1 + $0x900] ss:$16 sps:$4 sm:$0xff]   ;;  %v3979_v7 = vld [vmem:[%s5454_s1 + $0x52c] ss:$16 sps:$4 sm:$0xff]  }
  0xbf   :  { %2214 = vmatprep.subr.bf16.mxu0 %v3892_v6  ;;  %v3976_v6 = vld [vmem:[%s5454_s1 + $0x924] ss:$16 sps:$4 sm:$0xff]  }
  0xc1   :  { %2338 = vmatpush1.bf16.msra.mxu1 %v3893_v9  ;;  %v3977_v9 = vld [vmem:[%s5454_s1 + $0x528] ss:$16 sps:$4 sm:$0xff]  }
  0xc2   :  { %2215 = vmatpush1.bf16.msra.mxu0 %v3890_v8  ;;  %2339 = vmatprep.subr.bf16.mxu1 %v3901_v13  ;;  %v3974_v8 = vld [vmem:[%s5454_s1 + $0x920] ss:$16 sps:$4 sm:$0xff]   ;;  %v3985_v13 = vld [vmem:[%s5454_s1 + $0x54c] ss:$16 sps:$4 sm:$0xff]  }
  0xc3   :  { %2216 = vmatprep.subr.bf16.mxu0 %v3898_v11  ;;  %v3982_v11 = vld [vmem:[%s5454_s1 + $0x944] ss:$16 sps:$4 sm:$0xff]  }
  0xc5   :  { %2340 = vmatpush1.bf16.msra.mxu1 %v3899_v15  ;;  %v3983_v15 = vld [vmem:[%s5454_s1 + $0x548] ss:$16 sps:$4 sm:$0xff]  }
  0xc6   :  { %2217 = vmatpush1.bf16.msra.mxu0 %v3896_v14  ;;  %2341 = vmatprep.subr.bf16.mxu1 %v3907_v17  ;;  %v3980_v14 = vld [vmem:[%s5454_s1 + $0x940] ss:$16 sps:$4 sm:$0xff]   ;;  %v3991_v17 = vld [vmem:[%s5454_s1 + $0x56c] ss:$16 sps:$4 sm:$0xff]  }
  0xc7   :  { %2218 = vmatprep.subr.bf16.mxu0 %v3904_v16  ;;  %v3988_v16 = vld [vmem:[%s5454_s1 + $0x964] ss:$16 sps:$4 sm:$0xff]  }
  0xc9   :  { %2342 = vmatpush1.bf16.msra.mxu1 %v3905_v20  ;;  %v3989_v20 = vld [vmem:[%s5454_s1 + $0x568] ss:$16 sps:$4 sm:$0xff]  }
  0xca   :  { %2219 = vmatpush1.bf16.msra.mxu0 %v3902_v19  ;;  %2343 = vmatprep.subr.bf16.mxu1 %v3913_v23  ;;  %v3986_v19 = vld [vmem:[%s5454_s1 + $0x960] ss:$16 sps:$4 sm:$0xff]   ;;  %v3997_v23 = vld [vmem:[%s5454_s1 + $0x58c] ss:$16 sps:$4 sm:$0xff]  }
  0xcb   :  { %2220 = vmatprep.subr.bf16.mxu0 %v3910_v21  ;;  %v3994_v21 = vld [vmem:[%s5454_s1 + $0x984] ss:$16 sps:$4 sm:$0xff]  }
  0xcd   :  { %2344 = vmatpush1.bf16.msra.mxu1 %v3911_v25  ;;  %v3995_v25 = vld [vmem:[%s5454_s1 + $0x588] ss:$16 sps:$4 sm:$0xff]  }
  0xce   :  { %2221 = vmatpush1.bf16.msra.mxu0 %v3908_v24  ;;  %2345 = vmatprep.subr.bf16.mxu1 %v3919_v28  ;;  %v3992_v24 = vld [vmem:[%s5454_s1 + $0x980] ss:$16 sps:$4 sm:$0xff]   ;;  %v4003_v28 = vld [vmem:[%s5454_s1 + $0x5ac] ss:$16 sps:$4 sm:$0xff]  }
  0xcf   :  { %2222 = vmatprep.subr.bf16.mxu0 %v3916_v26  ;;  %v4000_v26 = vld [vmem:[%s5454_s1 + $0x9a4] ss:$16 sps:$4 sm:$0xff]  }
  0xd1   :  { %2346 = vmatpush1.bf16.msra.mxu1 %v3917_v31  ;;  %v4001_v31 = vld [vmem:[%s5454_s1 + $0x5a8] ss:$16 sps:$4 sm:$0xff]  }
  0xd2   :  { %2223 = vmatpush1.bf16.msra.mxu0 %v3914_v29  ;;  %2356 = vmatprep.subr.bf16.mxu1 %v3925_v33  ;;  %v3998_v29 = vld [vmem:[%s5454_s1 + $0x9a0] ss:$16 sps:$4 sm:$0xff]   ;;  %v4009_v33 = vld [vmem:[%s5454_s1 + $0x5cc] ss:$16 sps:$4 sm:$0xff]  }
  0xd3   :  { %2233 = vmatprep.subr.bf16.mxu0 %v3922_v32  ;;  %v4006_v32 = vld [vmem:[%s5454_s1 + $0x9c4] ss:$16 sps:$4 sm:$0xff]  }
  0xd4   :  { %2348 = vmatmul.mubr.bf16.vlgmr.msra.gmra.mrb[4].mxu1 %v4553_v18  ;;  %v3935_v18 = vld [vmem:[%s5454_s1 + $0x448] ss:$16 sps:$4 sm:$0xff]  }
  0xd5   :  { %2225 = vmatmul.mubr.bf16.vlgmr.msra.gmra.mrb[0].mxu0 %v4966_v35  ;;  %2357 = vmatpush1.bf16.msra.mxu1 %v3923_v36  ;;  %v4012_v36 = vld [vmem:[%s5454_s1 + $0x9e4] ss:$16 sps:$4 sm:$0xff]  }
  0xd6   :  { %2234 = vmatpush1.bf16.msra.mxu0 %v3920_v34  ;;  %2358 = vmatprep.subr.bf16.mxu1 %v3931_v37  ;;  %v4007_v34 = vld [vmem:[%s5454_s1 + $0x5c8] ss:$16 sps:$4 sm:$0xff]   ;;  %v4010_v37 = vld [vmem:[%s5454_s1 + $0x9e0] ss:$16 sps:$4 sm:$0xff]  }
  0xd7   :  { %2235 = vmatprep.subr.bf16.mxu0 %v3928_v0  ;;  %2265 = vmatprep.mubr.bf16.mxu0 %v4984_v40  ;;  %v4015_v0 = vld [vmem:[%s5454_s1 + $0x5ec] ss:$16 sps:$4 sm:$0xff]  }
  0xd8   :  { %2388 = vmatprep.mubr.bf16.mxu1 %v4565_v22  ;;  %v3941_v22 = vld [vmem:[%s5454_s1 + $0x468] ss:$16 sps:$4 sm:$0xff]  }
  0xd9   :  { %2359 = vmatpush1.bf16.msra.mxu1 %v3929_v39  ;;  %v4018_v39 = vld [vmem:[%s5454_s1 + $0x60c] ss:$16 sps:$4 sm:$0xff]  }
  0xda   :  { %2236 = vmatpush1.bf16.msra.mxu0 %v3926_v38  ;;  %2360 = vmatprep.subr.bf16.mxu1 %v3937_v43  ;;  %v4013_v38 = vld [vmem:[%s5454_s1 + $0x5e8] ss:$16 sps:$4 sm:$0xff]  }
  0xdb   :  { %2237 = vmatprep.subr.bf16.mxu0 %v3934_v41  ;;  %v5163_v41 = vrot.slane %v4948_v30, %v4464_v49  ;;  %v4016_v43 = vld [vmem:[%s5454_s1 + $0x608] ss:$16 sps:$4 sm:$0xff]   ;;  %v4117_v30 = vld [vmem:[#allocation2 + $0x14] ss:$8 sps:$4 sm:$0xff]  }
  0xdc   :  { %v4019_v49 = vld [vmem:[%s5454_s1 + $0x628] ss:$16 sps:$4 sm:$0xff]  }
  0xdd   :  { %2361 = vmatpush1.bf16.msra.mxu1 %v3935_v18  ;;  %v4112_v18 = vld [vmem:[#allocation2] ss:$8 sps:$4 sm:$0xff]  }
  0xde   :  { %2238 = vmatpush1.bf16.msra.mxu0 %v3932_v44  ;;  %2362 = vmatprep.subr.bf16.mxu1 %v3943_v46  ;;  %v4021_v44 = vld [vmem:[%s5454_s1 + $0x62c] ss:$16 sps:$4 sm:$0xff]  }
  0xdf   :  { %2239 = vmatprep.subr.bf16.mxu0 %v3940_v45  ;;  %v4114_v45 = vld [vmem:[#allocation2 + $0x4] ss:$8 sps:$4 sm:$0xff]  }
  0xe0   :  { %v4024_v46 = vld [vmem:[%s5454_s1 + $0x64c] ss:$16 sps:$4 sm:$0xff]  }
  0xe1   :  { %2363 = vmatpush1.bf16.msra.mxu1 %v3941_v22  ;;  %v4022_v22 = vld [vmem:[%s5454_s1 + $0x648] ss:$16 sps:$4 sm:$0xff]  }
  0xe2   :  { %2240 = vmatpush1.bf16.msra.mxu0 %v3938_v47  ;;  %2364 = vmatprep.subr.bf16.mxu1 %v3949_v50  ;;  %v4115_v47 = vld [vmem:[#allocation2 + $0x10] ss:$8 sps:$4 sm:$0xff]   ;;  %v4123_v50 = vld [vmem:[#allocation2 + $0x34] ss:$8 sps:$4 sm:$0xff]  }
  0xe3   :  { %2241 = vmatprep.subr.bf16.mxu0 %v3946_v48  ;;  %v4118_v48 = vld [vmem:[#allocation2 + $0x20] ss:$8 sps:$4 sm:$0xff]  }
  0xe5   :  { %2365 = vmatpush1.bf16.msra.mxu1 %v3947_v52  ;;  %v4030_v52 = vld [vmem:[%s5454_s1 + $0x68c] ss:$16 sps:$4 sm:$0xff]  }
  0xe6   :  { %2242 = vmatpush1.bf16.msra.mxu0 %v3944_v51  ;;  %2366 = vmatprep.subr.bf16.mxu1 %v3955_v54  ;;  %v4025_v51 = vld [vmem:[%s5454_s1 + $0x668] ss:$16 sps:$4 sm:$0xff]   ;;  %v4126_v54 = vld [vmem:[#allocation2 + $0x44] ss:$8 sps:$4 sm:$0xff]  }
  0xe7   :  { %2243 = vmatprep.subr.bf16.mxu0 %v3952_v53  ;;  %v4121_v53 = vld [vmem:[#allocation2 + $0x30] ss:$8 sps:$4 sm:$0xff]  }
  0xe9   :  { %2367 = vmatpush1.bf16.msra.mxu1 %v3953_v56  ;;  %v4033_v56 = vld [vmem:[%s5454_s1 + $0x6ac] ss:$16 sps:$4 sm:$0xff]  }
  0xea   :  { %2244 = vmatpush1.bf16.msra.mxu0 %v3950_v55  ;;  %2368 = vmatprep.subr.bf16.mxu1 %v3961_v58  ;;  %v4028_v55 = vld [vmem:[%s5454_s1 + $0x688] ss:$16 sps:$4 sm:$0xff]   ;;  %v4129_v58 = vld [vmem:[#allocation2 + $0x54] ss:$8 sps:$4 sm:$0xff]  }
  0xeb   :  { %2245 = vmatprep.subr.bf16.mxu0 %v3958_v57  ;;  %v4124_v57 = vld [vmem:[#allocation2 + $0x40] ss:$8 sps:$4 sm:$0xff]  }
  0xed   :  { %2369 = vmatpush1.bf16.msra.mxu1 %v3959_v60  ;;  %v4036_v60 = vld [vmem:[%s5454_s1 + $0x6cc] ss:$16 sps:$4 sm:$0xff]  }
  0xee   :  { %2246 = vmatpush1.bf16.msra.mxu0 %v3956_v59  ;;  %2370 = vmatprep.subr.bf16.mxu1 %v3967_v62  ;;  %v4031_v59 = vld [vmem:[%s5454_s1 + $0x6a8] ss:$16 sps:$4 sm:$0xff]  }
  0xef   :  { %2247 = vmatprep.subr.bf16.mxu0 %v3964_v61  ;;  %v4127_v62 = vld [vmem:[#allocation2 + $0x50] ss:$8 sps:$4 sm:$0xff]  }
  0xf1   :  { %2371 = vmatpush1.bf16.msra.mxu1 %v3965_v1  ;;  %v4132_v1 = vld [vmem:[#allocation2 + $0x64] ss:$8 sps:$4 sm:$0xff]  }
  0xf2   :  { %2248 = vmatpush1.bf16.msra.mxu0 %v3962_v63  ;;  %2372 = vmatprep.subr.bf16.mxu1 %v3973_v3  ;;  %v4034_v3 = vld [vmem:[%s5454_s1 + $0x6c8] ss:$16 sps:$4 sm:$0xff]  }
  0xf3   :  { %2249 = vmatprep.subr.bf16.mxu0 %v3970_v2 }
  0xf5   :  { %2373 = vmatpush1.bf16.msra.mxu1 %v3971_v5  ;;  %v4039_v5 = vld [vmem:[%s5454_s1 + $0x6ec] ss:$16 sps:$4 sm:$0xff]  }
  0xf6   :  { %2250 = vmatpush1.bf16.msra.mxu0 %v3968_v4  ;;  %2374 = vmatprep.subr.bf16.mxu1 %v3979_v7  ;;  %v4135_v7 = vld [vmem:[#allocation2 + $0x74] ss:$8 sps:$4 sm:$0xff]  }
  0xf7   :  { %2251 = vmatprep.subr.bf16.mxu0 %v3976_v6  ;;  %v4130_v6 = vld [vmem:[#allocation2 + $0x60] ss:$8 sps:$4 sm:$0xff]  }
  0xf9   :  { %2375 = vmatpush1.bf16.msra.mxu1 %v3977_v9  ;;  %v4042_v9 = vld [vmem:[%s5454_s1 + $0x70c] ss:$16 sps:$4 sm:$0xff]  }
  0xfa   :  { %2252 = vmatpush1.bf16.msra.mxu0 %v3974_v8  ;;  %2376 = vmatprep.subr.bf16.mxu1 %v3985_v13  ;;  %v4037_v8 = vld [vmem:[%s5454_s1 + $0x6e8] ss:$16 sps:$4 sm:$0xff]   ;;  %v4138_v13 = vld [vmem:[#allocation2 + $0x84] ss:$8 sps:$4 sm:$0xff]  }
  0xfb   :  { %2253 = vmatprep.subr.bf16.mxu0 %v3982_v11  ;;  %v4133_v11 = vld [vmem:[#allocation2 + $0x70] ss:$8 sps:$4 sm:$0xff]  }
  0xfd   :  { %2377 = vmatpush1.bf16.msra.mxu1 %v3983_v15  ;;  %v4045_v15 = vld [vmem:[%s5454_s1 + $0x72c] ss:$16 sps:$4 sm:$0xff]  }
  0xfe   :  { %2254 = vmatpush1.bf16.msra.mxu0 %v3980_v14  ;;  %2378 = vmatprep.subr.bf16.mxu1 %v3991_v17  ;;  %v4040_v14 = vld [vmem:[%s5454_s1 + $0x708] ss:$16 sps:$4 sm:$0xff]   ;;  %v4141_v17 = vld [vmem:[#allocation2 + $0x94] ss:$8 sps:$4 sm:$0xff]  }
  0xff   :  { %2255 = vmatprep.subr.bf16.mxu0 %v3988_v16  ;;  %v4136_v16 = vld [vmem:[#allocation2 + $0x80] ss:$8 sps:$4 sm:$0xff]  }
 0x101   :  { %2379 = vmatpush1.bf16.msra.mxu1 %v3989_v20  ;;  %v4048_v20 = vld [vmem:[%s5454_s1 + $0x74c] ss:$16 sps:$4 sm:$0xff]  }
 0x102   :  { %2256 = vmatpush1.bf16.msra.mxu0 %v3986_v19  ;;  %2380 = vmatprep.subr.bf16.mxu1 %v3997_v23  ;;  %v4043_v19 = vld [vmem:[%s5454_s1 + $0x728] ss:$16 sps:$4 sm:$0xff]   ;;  %v4144_v23 = vld [vmem:[#allocation2 + $0xa4] ss:$8 sps:$4 sm:$0xff]  }
 0x103   :  { %2257 = vmatprep.subr.bf16.mxu0 %v3994_v21  ;;  %v4139_v21 = vld [vmem:[#allocation2 + $0x90] ss:$8 sps:$4 sm:$0xff]  }
 0x105   :  { %2381 = vmatpush1.bf16.msra.mxu1 %v3995_v25  ;;  %v4051_v25 = vld [vmem:[%s5454_s1 + $0x76c] ss:$16 sps:$4 sm:$0xff]  }
 0x106   :  { %2258 = vmatpush1.bf16.msra.mxu0 %v3992_v24  ;;  %2382 = vmatprep.subr.bf16.mxu1 %v4003_v28  ;;  %v4046_v24 = vld [vmem:[%s5454_s1 + $0x748] ss:$16 sps:$4 sm:$0xff]   ;;  %v4147_v28 = vld [vmem:[#allocation2 + $0xb4] ss:$8 sps:$4 sm:$0xff]  }
 0x107   :  { %2259 = vmatprep.subr.bf16.mxu0 %v4000_v26  ;;  %v4142_v26 = vld [vmem:[#allocation2 + $0xa0] ss:$8 sps:$4 sm:$0xff]  }
 0x109   :  { %2383 = vmatpush1.bf16.msra.mxu1 %v4001_v31  ;;  %v4054_v31 = vld [vmem:[%s5454_s1 + $0x78c] ss:$16 sps:$4 sm:$0xff]  }
 0x10a   :  { %2260 = vmatpush1.bf16.msra.mxu0 %v3998_v29  ;;  %2384 = vmatprep.subr.bf16.mxu1 %v4009_v33  ;;  %v4049_v29 = vld [vmem:[%s5454_s1 + $0x768] ss:$16 sps:$4 sm:$0xff]   ;;  %v4150_v33 = vld [vmem:[#allocation2 + $0xc4] ss:$8 sps:$4 sm:$0xff]  }
 0x10b   :  { %2261 = vmatprep.subr.bf16.mxu0 %v4006_v32  ;;  %v4145_v32 = vld [vmem:[#allocation2 + $0xb0] ss:$8 sps:$4 sm:$0xff]  }
 0x10d   :  { %2385 = vmatpush1.bf16.msra.mxu1 %v4007_v34  ;;  %v4057_v34 = vld [vmem:[%s5454_s1 + $0x7ac] ss:$16 sps:$4 sm:$0xff]  }
 0x10e   :  { %2262 = vmatpush1.bf16.msra.mxu0 %v4004_v12  ;;  %2386 = vmatprep.subr.bf16.mxu1 %v4015_v0  ;;  %v4052_v12 = vld [vmem:[%s5454_s1 + $0x788] ss:$16 sps:$4 sm:$0xff]   ;;  %v4153_v0 = vld [vmem:[#allocation2 + $0xd4] ss:$8 sps:$4 sm:$0xff]  }
 0x10f   :  { %2263 = vmatprep.subr.bf16.mxu0 %v4012_v36  ;;  %v4148_v36 = vld [vmem:[#allocation2 + $0xc0] ss:$8 sps:$4 sm:$0xff]  }
 0x111   :  { %2387 = vmatpush1.bf16.msra.mxu1 %v4013_v38  ;;  %v4060_v38 = vld [vmem:[%s5454_s1 + $0x7cc] ss:$16 sps:$4 sm:$0xff]  }
 0x112   :  { %2264 = vmatpush1.bf16.msra.mxu0 %v4010_v37  ;;  %2397 = vmatprep.subr.bf16.mxu1 %v4018_v39  ;;  %v4055_v37 = vld [vmem:[%s5454_s1 + $0x7a8] ss:$16 sps:$4 sm:$0xff]  }
 0x113   :  { %2883 = vmatprep.subr.bf16.mxu0 %v4114_v45  ;;  %v4151_v39 = vld [vmem:[#allocation2 + $0xd0] ss:$8 sps:$4 sm:$0xff]   ;;  %v4066_v45 = vld [vmem:[%s5454_s1 + $0x80c] ss:$16 sps:$4 sm:$0xff]  }
 0x114   :  { %2389 = vmatmul.mubr.bf16.vlgmr.msra.gmra.mrb[4].mxu1 %v4755_v27  ;;  %v4120_v27 = vld [vmem:[#allocation2 + $0x24] ss:$8 sps:$4 sm:$0xff]  }
 0x115   :  { %2266 = vmatmul.mubr.bf16.vlgmr.msra.gmra.mrb[0].mxu0 %v5163_v41  ;;  %2398 = vmatpush1.bf16.msra.mxu1 %v4016_v43  ;;  %v4058_v43 = vld [vmem:[%s5454_s1 + $0x7c8] ss:$16 sps:$4 sm:$0xff]  }
 0x116   :  { %2429 = vmatprep.mubr.bf16.mxu1 %v4768_v10  ;;  %2399 = vmatprep.subr.bf16.mxu1 %v4021_v44  ;;  %v4027_v10 = vld [vmem:[%s5454_s1 + $0x66c] ss:$16 sps:$4 sm:$0xff]  }
 0x117   :  { %2884 = vmatpush1.bf16.msra.mxu0 %v4112_v18  ;;  %v4063_v44 = vld [vmem:[%s5454_s1 + $0x7ec] ss:$16 sps:$4 sm:$0xff]   ;;  %v4061_v18 = vld [vmem:[%s5454_s1 + $0x7e8] ss:$16 sps:$4 sm:$0xff]  }
 0x118   :  { %2885 = vmatprep.subr.bf16.mxu0 %v4117_v30  ;;  %v4069_v30 = vld [vmem:[%s5454_s1 + $0x82c] ss:$16 sps:$4 sm:$0xff]  }
 0x119   :  { %2400 = vmatpush1.bf16.msra.mxu1 %v4019_v49  ;;  %v4064_v49 = vld [vmem:[%s5454_s1 + $0x808] ss:$16 sps:$4 sm:$0xff]  }
 0x11a   :  { %2401 = vmatprep.subr.bf16.mxu1 %v4024_v46  ;;  %v4067_v46 = vld [vmem:[%s5454_s1 + $0x828] ss:$16 sps:$4 sm:$0xff]  }
 0x11b   :  { %2886 = vmatpush1.bf16.msra.mxu0 %v4115_v47  ;;  %v4072_v47 = vld [vmem:[%s5454_s1 + $0x84c] ss:$16 sps:$4 sm:$0xff]  }
 0x11c   :  { %2887 = vmatprep.subr.bf16.mxu0 %v4120_v27  ;;  %v4070_v27 = vld [vmem:[%s5454_s1 + $0x848] ss:$16 sps:$4 sm:$0xff]  }
 0x11d   :  { %2402 = vmatpush1.bf16.msra.mxu1 %v4022_v22  ;;  %v4078_v22 = vld [vmem:[%s5454_s1 + $0x88c] ss:$16 sps:$4 sm:$0xff]  }
 0x11e   :  { %2403 = vmatprep.subr.bf16.mxu1 %v4027_v10  ;;  %v4076_v10 = vld [vmem:[%s5454_s1 + $0x888] ss:$16 sps:$4 sm:$0xff]  }
 0x11f   :  { %2888 = vmatpush1.bf16.msra.mxu0 %v4118_v48  ;;  %v4081_v48 = vld [vmem:[%s5454_s1 + $0x8ac] ss:$16 sps:$4 sm:$0xff]  }
 0x120   :  { %2889 = vmatprep.subr.bf16.mxu0 %v4123_v50  ;;  %v4079_v50 = vld [vmem:[%s5454_s1 + $0x8a8] ss:$16 sps:$4 sm:$0xff]  }
 0x121   :  { %2404 = vmatpush1.bf16.msra.mxu1 %v4025_v51  ;;  %v4084_v51 = vld [vmem:[%s5454_s1 + $0x8cc] ss:$16 sps:$4 sm:$0xff]  }
 0x122   :  { %2405 = vmatprep.subr.bf16.mxu1 %v4030_v52  ;;  %v4156_v52 = vld [vmem:[#allocation2 + $0xe4] ss:$8 sps:$4 sm:$0xff]  }
 0x123   :  { %2890 = vmatpush1.bf16.msra.mxu0 %v4121_v53  ;;  %v4154_v53 = vld [vmem:[#allocation2 + $0xe0] ss:$8 sps:$4 sm:$0xff]  }
 0x124   :  { %2891 = vmatprep.subr.bf16.mxu0 %v4126_v54  ;;  %v4082_v54 = vld [vmem:[%s5454_s1 + $0x8c8] ss:$16 sps:$4 sm:$0xff]  }
 0x125   :  { %2406 = vmatpush1.bf16.msra.mxu1 %v4028_v55  ;;  %v4087_v55 = vld [vmem:[%s5454_s1 + $0x8ec] ss:$16 sps:$4 sm:$0xff]  }
 0x126   :  { %2407 = vmatprep.subr.bf16.mxu1 %v4033_v56  ;;  %v4159_v56 = vld [vmem:[#allocation2 + $0xf4] ss:$8 sps:$4 sm:$0xff]  }
 0x127   :  { %v5204_v61 = vpop.f32.mrb[0].mxu1  ;;  %2892 = vmatpush1.bf16.msra.mxu0 %v4124_v57  ;;  %v4157_v57 = vld [vmem:[#allocation2 + $0xf0] ss:$8 sps:$4 sm:$0xff]  }
 0x128   :  { %v5206_v63 = vpop.f32.mrb[1].mxu1  ;;  %2893 = vmatprep.subr.bf16.mxu0 %v4129_v58  ;;  %v4085_v58 = vld [vmem:[%s5454_s1 + $0x8e8] ss:$16 sps:$4 sm:$0xff]  }
 0x129   :  { %v2107_v2 = vpop.f32.mrb[2].mxu1  ;;  %2408 = vmatpush1.bf16.msra.mxu1 %v4031_v59  ;;  %v4090_v59 = vld [vmem:[%s5454_s1 + $0x90c] ss:$16 sps:$4 sm:$0xff]  }
 0x12a   :  { %v2108_v4 = vpop.f32.mrb[3].mxu1  ;;  %2409 = vmatprep.subr.bf16.mxu1 %v4036_v60  ;;  %v4162_v60 = vld [vmem:[#allocation2 + $0x104] ss:$8 sps:$4 sm:$0xff]   ;;  %v4091_v2 = vld [vmem:[%s5454_s1 + $0x928] ss:$16 sps:$4 sm:$0xff]  }
 0x12b   :  { %2894 = vmatpush1.bf16.msra.mxu0 %v4127_v62  ;;  %v4088_v62 = vld [vmem:[%s5454_s1 + $0x908] ss:$16 sps:$4 sm:$0xff]  }
 0x12c   :  { %2895 = vmatprep.subr.bf16.mxu0 %v4132_v1  ;;  %v4093_v1 = vld [vmem:[%s5454_s1 + $0x92c] ss:$16 sps:$4 sm:$0xff]   ;;  %v4094_v4 = vld [vmem:[%s5454_s1 + $0x948] ss:$16 sps:$4 sm:$0xff]  }
 0x12d   :  { %2410 = vmatpush1.bf16.msra.mxu1 %v4034_v3  ;;  %v4096_v3 = vld [vmem:[%s5454_s1 + $0x94c] ss:$16 sps:$4 sm:$0xff]  }
 0x12e   :  { %2411 = vmatprep.subr.bf16.mxu1 %v4039_v5  ;;  %v4099_v5 = vld [vmem:[%s5454_s1 + $0x96c] ss:$16 sps:$4 sm:$0xff]  }
 0x12f   :  { %2896 = vmatpush1.bf16.msra.mxu0 %v4130_v6  ;;  %v4097_v6 = vld [vmem:[%s5454_s1 + $0x968] ss:$16 sps:$4 sm:$0xff]  }
 0x130   :  { %2897 = vmatprep.subr.bf16.mxu0 %v4135_v7  ;;  %v4102_v7 = vld [vmem:[%s5454_s1 + $0x98c] ss:$16 sps:$4 sm:$0xff]  }
 0x131   :  { %2412 = vmatpush1.bf16.msra.mxu1 %v4037_v8  ;;  %v4100_v8 = vld [vmem:[%s5454_s1 + $0x988] ss:$16 sps:$4 sm:$0xff]  }
 0x132   :  { %2413 = vmatprep.subr.bf16.mxu1 %v4042_v9  ;;  %v4105_v9 = vld [vmem:[%s5454_s1 + $0x9ac] ss:$16 sps:$4 sm:$0xff]  }
 0x133   :  { %2898 = vmatpush1.bf16.msra.mxu0 %v4133_v11  ;;  %v4103_v11 = vld [vmem:[%s5454_s1 + $0x9a8] ss:$16 sps:$4 sm:$0xff]  }
 0x134   :  { %2899 = vmatprep.subr.bf16.mxu0 %v4138_v13  ;;  %v4108_v13 = vld [vmem:[%s5454_s1 + $0x9cc] ss:$16 sps:$4 sm:$0xff]  }
 0x135   :  { %2414 = vmatpush1.bf16.msra.mxu1 %v4040_v14  ;;  %v4106_v14 = vld [vmem:[%s5454_s1 + $0x9c8] ss:$16 sps:$4 sm:$0xff]  }
 0x136   :  { %2415 = vmatprep.subr.bf16.mxu1 %v4045_v15  ;;  %v4111_v15 = vld [vmem:[%s5454_s1 + $0x9ec] ss:$16 sps:$4 sm:$0xff]  }
 0x137   :  { %2900 = vmatpush1.bf16.msra.mxu0 %v4136_v16  ;;  %v4109_v16 = vld [vmem:[%s5454_s1 + $0x9e8] ss:$16 sps:$4 sm:$0xff]  }
 0x138   :  { %2901 = vmatprep.subr.bf16.mxu0 %v4141_v17  ;;  %v368_v17 = vsub.s32 0, %v4446_v42 }
 0x139   :  { %2416 = vmatpush1.bf16.msra.mxu1 %v4043_v19  ;;  %v5368_v19 = vld [vmem:[%s5455_s2] sm:$0xf] }
 0x13a   :  { %2417 = vmatprep.subr.bf16.mxu1 %v4048_v20  ;;  %v372_v20 = vsub.s32 1, %v4446_v42 }
 0x13b   :  { %2902 = vmatpush1.bf16.msra.mxu0 %v4139_v21  ;;  %v369_v21 = vrot.slane %v5368_v19, %v368_v17 }
 0x13c   :  { %2903 = vmatprep.subr.bf16.mxu0 %v4144_v23  ;;  %v373_v23 = vrot.slane %v5368_v19, %v372_v20 }
 0x13d   :  { %2418 = vmatpush1.bf16.msra.mxu1 %v4046_v24  ;;  %v2104_v24 = vadd.f32 %v5204_v61, %v369_v21  ;;  %v4208_v61 = vld [vmem:[%s5458_s5 + $0x40] sm:$0xff]  }
 0x13e   :  { %2419 = vmatprep.subr.bf16.mxu1 %v4051_v25 }
 0x13f   :  { %2904 = vmatpush1.bf16.msra.mxu0 %v4142_v26 }
 0x140   :  { %2905 = vmatprep.subr.bf16.mxu0 %v4147_v28 }
 0x141   :  { %2420 = vmatpush1.bf16.msra.mxu1 %v4049_v29 }
 0x142   :  { %2421 = vmatprep.subr.bf16.mxu1 %v4054_v31 }
 0x143   :  { %2906 = vmatpush1.bf16.msra.mxu0 %v4145_v32 }
 0x144   :  { %2907 = vmatprep.subr.bf16.mxu0 %v4150_v33 }
 0x145   :  { %2422 = vmatpush1.bf16.msra.mxu1 %v4052_v12 }
 0x146   :  { %2423 = vmatprep.subr.bf16.mxu1 %v4057_v34 }
 0x147   :  { %2908 = vmatpush1.bf16.msra.mxu0 %v4148_v36  ;;  %v4160_v36 = vld [vmem:[#allocation2 + $0x100] ss:$8 sps:$4 sm:$0xff]  }
 0x148   :  { %2909 = vmatprep.subr.bf16.mxu0 %v4153_v0 }
 0x149   :  { %2424 = vmatpush1.bf16.msra.mxu1 %v4055_v37  ;;  %v4165_v37 = vld [vmem:[#allocation2 + $0x114] ss:$8 sps:$4 sm:$0xff]  }
 0x14a   :  { %2425 = vmatprep.subr.bf16.mxu1 %v4060_v38  ;;  %v4210_v38 = vld [vmem:[%s5458_s5 + $0x48] sm:$0xff]  }
 0x14b   :  { %2910 = vmatpush1.bf16.msra.mxu0 %v4151_v39  ;;  %v4163_v39 = vld [vmem:[#allocation2 + $0x110] ss:$8 sps:$4 sm:$0xff]  }
 0x14c   :  { %2911 = vmatprep.subr.bf16.mxu0 %v4156_v52  ;;  %v4180_v52 = vld [vmem:[#allocation2 + $0x164] ss:$8 sps:$4 sm:$0xff]  }
 0x14d   :  { %2426 = vmatpush1.bf16.msra.mxu1 %v4058_v43  ;;  %v4168_v43 = vld [vmem:[#allocation2 + $0x124] ss:$8 sps:$4 sm:$0xff]  }
 0x14e   :  { %2427 = vmatprep.subr.bf16.mxu1 %v4063_v44  ;;  %v4211_v44 = vld [vmem:[%s5458_s5 + $0x8] sm:$0xff]  }
 0x14f   :  { %2912 = vmatpush1.bf16.msra.mxu0 %v4154_v53  ;;  %v4219_v53 = vld [vmem:[%s5458_s5 + $0x28] sm:$0xff]  }
 0x150   :  { %2913 = vmatprep.subr.bf16.mxu0 %v4159_v56  ;;  %v4181_v56 = vld [vmem:[#allocation2 + $0x170] ss:$8 sps:$4 sm:$0xff]  }
 0x151   :  { %2428 = vmatpush1.bf16.msra.mxu1 %v4061_v18  ;;  %v4212_v18 = vld [vmem:[%s5458_s5 + $0x50] sm:$0xff]  }
 0x152   :  { %2438 = vmatprep.subr.bf16.mxu1 %v4066_v45  ;;  %v4166_v45 = vld [vmem:[#allocation2 + $0x120] ss:$8 sps:$4 sm:$0xff]  }
 0x153   :  { %2914 = vmatpush1.bf16.msra.mxu0 %v4157_v57  ;;  %v4186_v57 = vld [vmem:[#allocation2 + $0x184] ss:$8 sps:$4 sm:$0xff]  }
 0x154   :  { %2430 = vmatmul.mubr.bf16.vlgmr.msra.gmra.mrb[4].mxu1 %v4966_v35  ;;  %v4075_v35 = vld [vmem:[%s5454_s1 + $0x86c] ss:$16 sps:$4 sm:$0xff]   ;;  %2924 = vmatprep.subr.bf16.mxu0 %v4162_v60  ;;  %v4187_v60 = vld [vmem:[#allocation2 + $0x190] ss:$8 sps:$4 sm:$0xff]  }
 0x155   :  { %2439 = vmatpush1.bf16.msra.mxu1 %v4064_v49  ;;  %2470 = vmatprep.mubr.bf16.mxu1 %v4984_v40  ;;  %v4073_v40 = vld [vmem:[%s5454_s1 + $0x868] ss:$16 sps:$4 sm:$0xff]   ;;  %v4171_v49 = vld [vmem:[#allocation2 + $0x134] ss:$8 sps:$4 sm:$0xff]  }
 0x156   :  { %2440 = vmatprep.subr.bf16.mxu1 %v4069_v30  ;;  %v4213_v30 = vld [vmem:[%s5458_s5 + $0x10] sm:$0xff]  }
 0x159   :  { %2441 = vmatpush1.bf16.msra.mxu1 %v4067_v46  ;;  %v4214_v46 = vld [vmem:[%s5458_s5 + $0x58] sm:$0xff]  }
 0x15a   :  { %2442 = vmatprep.subr.bf16.mxu1 %v4072_v47  ;;  %v4169_v47 = vld [vmem:[#allocation2 + $0x130] ss:$8 sps:$4 sm:$0xff]  }
 0x15d   :  { %2443 = vmatpush1.bf16.msra.mxu1 %v4070_v27  ;;  %v4174_v27 = vld [vmem:[#allocation2 + $0x144] ss:$8 sps:$4 sm:$0xff]  }
 0x15e   :  { %2444 = vmatprep.subr.bf16.mxu1 %v4075_v35  ;;  %v4215_v35 = vld [vmem:[%s5458_s5 + $0x18] sm:$0xff]  }
 0x161   :  { %2445 = vmatpush1.bf16.msra.mxu1 %v4073_v40  ;;  %v4216_v40 = vld [vmem:[%s5458_s5 + $0x60] sm:$0xff]  }
 0x162   :  { %2446 = vmatprep.subr.bf16.mxu1 %v4078_v22  ;;  %v4172_v22 = vld [vmem:[#allocation2 + $0x140] ss:$8 sps:$4 sm:$0xff]  }
 0x165   :  { %2447 = vmatpush1.bf16.msra.mxu1 %v4076_v10  ;;  %v4177_v10 = vld [vmem:[#allocation2 + $0x154] ss:$8 sps:$4 sm:$0xff]  }
 0x166   :  { %2448 = vmatprep.subr.bf16.mxu1 %v4081_v48  ;;  %v4217_v48 = vld [vmem:[%s5458_s5 + $0x20] sm:$0xff]  }
 0x169   :  { %2449 = vmatpush1.bf16.msra.mxu1 %v4079_v50  ;;  %v4218_v50 = vld [vmem:[%s5458_s5 + $0x68] sm:$0xff]  }
 0x16a   :  { %2450 = vmatprep.subr.bf16.mxu1 %v4084_v51  ;;  %v4175_v51 = vld [vmem:[#allocation2 + $0x150] ss:$8 sps:$4 sm:$0xff]  }
 0x16d   :  { %2451 = vmatpush1.bf16.msra.mxu1 %v4082_v54  ;;  %v4178_v54 = vld [vmem:[#allocation2 + $0x160] ss:$8 sps:$4 sm:$0xff]  }
 0x16e   :  { %2452 = vmatprep.subr.bf16.mxu1 %v4087_v55  ;;  %v4183_v55 = vld [vmem:[#allocation2 + $0x174] ss:$8 sps:$4 sm:$0xff]  }
 0x171   :  { %2453 = vmatpush1.bf16.msra.mxu1 %v4085_v58  ;;  %v4184_v58 = vld [vmem:[#allocation2 + $0x180] ss:$8 sps:$4 sm:$0xff]  }
 0x172   :  { %2454 = vmatprep.subr.bf16.mxu1 %v4090_v59  ;;  %v4189_v59 = vld [vmem:[#allocation2 + $0x194] ss:$8 sps:$4 sm:$0xff]  }
 0x175   :  { %2455 = vmatpush1.bf16.msra.mxu1 %v4088_v62  ;;  %v4192_v62 = vld [vmem:[#allocation2 + $0x1a4] ss:$8 sps:$4 sm:$0xff]  }
 0x176   :  { %2456 = vmatprep.subr.bf16.mxu1 %v4093_v1  ;;  %v4190_v1 = vld [vmem:[#allocation2 + $0x1a0] ss:$8 sps:$4 sm:$0xff]  }
 0x179   :  { %2457 = vmatpush1.bf16.msra.mxu1 %v4091_v2  ;;  %v4195_v2 = vld [vmem:[#allocation2 + $0x1b4] ss:$8 sps:$4 sm:$0xff]  }
 0x17a   :  { %2458 = vmatprep.subr.bf16.mxu1 %v4096_v3  ;;  %v4193_v3 = vld [vmem:[#allocation2 + $0x1b0] ss:$8 sps:$4 sm:$0xff]  }
 0x17d   :  { %2459 = vmatpush1.bf16.msra.mxu1 %v4094_v4  ;;  %v4198_v4 = vld [vmem:[#allocation2 + $0x1c4] ss:$8 sps:$4 sm:$0xff]  }
 0x17e   :  { %2460 = vmatprep.subr.bf16.mxu1 %v4099_v5  ;;  %v4196_v5 = vld [vmem:[#allocation2 + $0x1c0] ss:$8 sps:$4 sm:$0xff]  }
 0x181   :  { %2461 = vmatpush1.bf16.msra.mxu1 %v4097_v6  ;;  %v4201_v6 = vld [vmem:[#allocation2 + $0x1d4] ss:$8 sps:$4 sm:$0xff]  }
 0x182   :  { %2462 = vmatprep.subr.bf16.mxu1 %v4102_v7  ;;  %v4199_v7 = vld [vmem:[#allocation2 + $0x1d0] ss:$8 sps:$4 sm:$0xff]  }
 0x185   :  { %2463 = vmatpush1.bf16.msra.mxu1 %v4100_v8  ;;  %v4204_v8 = vld [vmem:[#allocation2 + $0x1e4] ss:$8 sps:$4 sm:$0xff]  }
 0x186   :  { %2464 = vmatprep.subr.bf16.mxu1 %v4105_v9  ;;  %v4202_v9 = vld [vmem:[#allocation2 + $0x1e0] ss:$8 sps:$4 sm:$0xff]  }
 0x189   :  { %2465 = vmatpush1.bf16.msra.mxu1 %v4103_v11  ;;  %v4207_v11 = vld [vmem:[#allocation2 + $0x1f4] ss:$8 sps:$4 sm:$0xff]  }
 0x18a   :  { %2466 = vmatprep.subr.bf16.mxu1 %v4108_v13  ;;  %v4205_v13 = vld [vmem:[#allocation2 + $0x1f0] ss:$8 sps:$4 sm:$0xff]  }
 0x18d   :  { %2467 = vmatpush1.bf16.msra.mxu1 %v4106_v14  ;;  %v376_v14 = vsub.s32 2, %v4446_v42 }
 0x18e   :  { %2468 = vmatprep.subr.bf16.mxu1 %v4111_v15  ;;  %v380_v15 = vsub.s32 3, %v4446_v42 }
 0x190   :  { %v381_v21 = vrot.slane %v5368_v19, %v380_v15 }
 0x191   :  { %2469 = vmatpush1.bf16.msra.mxu1 %v4109_v16  ;;  %v377_v16 = vrot.slane %v5368_v19, %v376_v14  ;;  %v4221_v19 = vld [vmem:[%s5458_s5 + $0x30] sm:$0xff]  }
 0x192   :  { %3564 = vmatprep.subr.bf16.mxu1 %v4208_v61 }
 0x194   :  { %2471 = vmatmul.mubr.bf16.vlgmr.msra.gmra.mrb[4].mxu1 %v5163_v41  ;;  %v2106_v41 = vadd.f32 %v5206_v63, %v373_v23  ;;  %v4209_v63 = vld [vmem:[%s5458_s5] sm:$0xff]  }
 0x195   :  { %3565 = vmatpush3.bf16.msra.mxu1 %v4209_v63 }
 0x196   :  { %3566 = vmatprep.subr.bf16.mxu1 %v4210_v38 }
 0x199   :  { %3567 = vmatpush3.bf16.msra.mxu1 %v4211_v44 }
 0x19a   :  { %3568 = vmatprep.subr.bf16.mxu1 %v4212_v18 }
 0x19d   :  { %3569 = vmatpush3.bf16.msra.mxu1 %v4213_v30 }
 0x19e   :  { %3570 = vmatprep.subr.bf16.mxu1 %v4214_v46 }
 0x1a1   :  { %3571 = vmatpush3.bf16.msra.mxu1 %v4215_v35 }
 0x1a2   :  { %3572 = vmatprep.subr.bf16.mxu1 %v4216_v40 }
 0x1a5   :  { %3573 = vmatpush3.bf16.msra.mxu1 %v4217_v48 }
 0x1a6   :  { %3574 = vmatprep.subr.bf16.mxu1 %v4218_v50 }
 0x1a9   :  { %3575 = vmatpush3.bf16.msra.mxu1 %v4219_v53 }
 0x1e8   :  { %v2267_v25 = vpop.f32.mrb[0].mxu0 }
 0x1e9   :  { %v3587_v26 = vadd.f32 %v2267_v25, %v2104_v24  ;;  %v2269_v28 = vpop.f32.mrb[1].mxu0 }
 0x1ea   :  { %v3589_v29 = vadd.f32 %v2269_v28, %v2106_v41  ;;  %v2271_v31 = vpop.f32.mrb[2].mxu0 }
 0x1eb   :  { %v2479_v32 = vmax.f32 %v3587_v26, 0.0  ;;  %v2272_v33 = vpop.f32.mrb[3].mxu0 }
 0x1ec   :  { %v2480_v12 = vmax.f32 %v3589_v29, 0.0 }
 0x1ed   :  { %v2483_v0 = vpack.c.bf16 %v2479_v32, %v2479_v32 }
 0x1ee   :  { %v2484_v34 = vpack.c.bf16 %v2480_v12, %v2480_v12  ;;  %v4220_v12 = vld [vmem:[%s5458_s5 + $0x70] sm:$0xff]  }
 0x1ef   :  { %3576 = vmatprep.subr.bf16.mxu1 %v4220_v12 }
 0x1f0   :  { %2915 = vmatprep.mubr.bf16.mxu0 %v2484_v34  ;;  %3577 = vmatpush3.bf16.msra.mxu1 %v4221_v19  ;;  %v4222_v34 = vld [vmem:[%s5458_s5 + $0x78] sm:$0xff]  }
 0x1f1   :  { %2916 = vmatmul.mubr.bf16.vlgmr.msra.gmra.mrb[4].mxu0 %v2483_v0  ;;  %3578 = vmatprep.subr.bf16.mxu1 %v4222_v34  ;;  %v2551_v0 = vld [vmem:[%s5457_s4] sm:$0x3] }
 0x1f2   :  { %2925 = vmatpush1.bf16.msra.mxu0 %v4160_v36  ;;  %v4223_v36 = vld [vmem:[%s5458_s5 + $0x38] sm:$0xff]   ;;  %v2560_v61 = vrot.slane %v2551_v0, %v372_v20 }
 0x1f3   :  { %2926 = vmatprep.subr.bf16.mxu0 %v4165_v37  ;;  %v2556_v37 = vrot.slane %v2551_v0, %v368_v17  ;;  %v3547_v17 = vld [vmem:[%s5459_s6] ss:$0 sm:$0xff] }
 0x1f4   :  { %3579 = vmatpush3.bf16.msra.mxu1 %v4223_v36 }
 0x1f6   :  { %2927 = vmatpush1.bf16.msra.mxu0 %v4163_v39 }
 0x1f7   :  { %2928 = vmatprep.subr.bf16.mxu0 %v4168_v43 }
 0x1fa   :  { %2929 = vmatpush1.bf16.msra.mxu0 %v4166_v45 }
 0x1fb   :  { %2930 = vmatprep.subr.bf16.mxu0 %v4171_v49 }
 0x1fe   :  { %2931 = vmatpush1.bf16.msra.mxu0 %v4169_v47 }
 0x1ff   :  { %2932 = vmatprep.subr.bf16.mxu0 %v4174_v27 }
 0x202   :  { %2933 = vmatpush1.bf16.msra.mxu0 %v4172_v22 }
 0x203   :  { %2934 = vmatprep.subr.bf16.mxu0 %v4177_v10 }
 0x206   :  { %2935 = vmatpush1.bf16.msra.mxu0 %v4175_v51 }
 0x207   :  { %2936 = vmatprep.subr.bf16.mxu0 %v4180_v52 }
 0x20a   :  { %2937 = vmatpush1.bf16.msra.mxu0 %v4178_v54 }
 0x20b   :  { %2938 = vmatprep.subr.bf16.mxu0 %v4183_v55 }
 0x20e   :  { %2939 = vmatpush1.bf16.msra.mxu0 %v4181_v56 }
 0x20f   :  { %2940 = vmatprep.subr.bf16.mxu0 %v4186_v57 }
 0x212   :  { %2941 = vmatpush1.bf16.msra.mxu0 %v4184_v58 }
 0x213   :  { %2942 = vmatprep.subr.bf16.mxu0 %v4189_v59 }
 0x216   :  { %2943 = vmatpush1.bf16.msra.mxu0 %v4187_v60 }
 0x217   :  { %2944 = vmatprep.subr.bf16.mxu0 %v4192_v62 }
 0x21a   :  { %2945 = vmatpush1.bf16.msra.mxu0 %v4190_v1 }
 0x21b   :  { %2946 = vmatprep.subr.bf16.mxu0 %v4195_v2 }
 0x21e   :  { %2947 = vmatpush1.bf16.msra.mxu0 %v4193_v3 }
 0x21f   :  { %2948 = vmatprep.subr.bf16.mxu0 %v4198_v4 }
 0x222   :  { %2949 = vmatpush1.bf16.msra.mxu0 %v4196_v5 }
 0x223   :  { %2950 = vmatprep.subr.bf16.mxu0 %v4201_v6 }
 0x226   :  { %2951 = vmatpush1.bf16.msra.mxu0 %v4199_v7 }
 0x227   :  { %2952 = vmatprep.subr.bf16.mxu0 %v4204_v8 }
 0x22a   :  { %2953 = vmatpush1.bf16.msra.mxu0 %v4202_v9 }
 0x22b   :  { %2954 = vmatprep.subr.bf16.mxu0 %v4207_v11 }
 0x22e   :  { %2955 = vmatpush1.bf16.msra.mxu0 %v4205_v13 }
 0x267   :  { %v2472_v23 = vpop.f32.mrb[4].mxu1 }
 0x268   :  { %v3590_v24 = vadd.f32 %v2472_v23, %v377_v16  ;;  %v2474_v41 = vpop.f32.mrb[5].mxu1 }
 0x269   :  { %v3591_v25 = vadd.f32 %v2474_v41, %v381_v21  ;;  %v2476_v26 = vpop.f32.mrb[6].mxu1 }
 0x26a   :  { %v2481_v28 = vmax.f32 %v3590_v24, 0.0  ;;  %v2477_v29 = vpop.f32.mrb[7].mxu1 }
 0x26b   :  { %v2482_v31 = vmax.f32 %v3591_v25, 0.0 }
 0x26c   :  { %v2485_v33 = vpack.c.bf16 %v2481_v28, %v2481_v28 }
 0x26d   :  { %v2486_v32 = vpack.c.bf16 %v2482_v31, %v2482_v31 }
 0x26f   :  { %2956 = vmatprep.mubr.bf16.mxu0 %v2486_v32 }
 0x270   :  { %2957 = vmatmul.mubr.bf16.vlgmr.msra.gmra.mrb[4].mxu0 %v2485_v33 }
 0x343   :  { %v2958_v63 = vpop.f32.mrb[4].mxu0 }
 0x344   :  { %v3592_v38 = vadd.f32 %v2958_v63, %v2556_v37  ;;  %v2960_v39 = vpop.f32.mrb[5].mxu0 }
 0x345   :  { %v3593_v43 = vadd.f32 %v2960_v39, %v2560_v61  ;;  %v2962_v44 = vpop.f32.mrb[6].mxu0 }
 0x346   :  { %v2965_v18 = vmax.f32 %v3592_v38, 0.0  ;;  %v2963_v45 = vpop.f32.mrb[7].mxu0 }
 0x347   :  { %v2966_v49 = vmax.f32 %v3593_v43, 0.0 }
 0x348   :  { %v2967_v46 = vpack.c.bf16 %v2965_v18, %v2965_v18 }
 0x349   :  { %v2968_v30 = vpack.c.bf16 %v2966_v49, %v2966_v49 }
 0x34b   :  { %3136 = vmatprep.mubr.bf16.mxu1 %v2968_v30 }
 0x34c   :  { %3137 = vmatmul.mubr.bf16.vlgmr.msra.gmra.mrb[8].mxu1 %v2967_v46 }
 0x41f   :  { %v3580_v47 = vpop.f32.mrb[8].mxu1 }
 0x420   :  { %v3581_v27 = vpop.f32.mrb[9].mxu1 }
 0x421   :  { %v3582_v42 = vadd.f32 %v3581_v27, %v3580_v47  ;;  %v3583_v20 = vpop.f32.mrb[10].mxu1 }
 0x422   :  { %v3584_v35 = vpop.f32.mrb[11].mxu1 }
 0x423   :  { %v3139_v40 = vadd.f32 %v3582_v42, %v3547_v17 }
 0x425   :  { %v3144_v22 = vmax.f32 %v3139_v40, 0.0 }
 0x427   :  { %3146 = vst.msk [vmem:[#allocation5] sm:$0x3] %vm3145_vm0, %v3144_v22 }
 0x428   :  { %4257 = shalt.err (!%p4254_p12)
}
 0x429   :  { %s4258_s11 = scalar_lea.hbm %s5460_s7, 32 }
 0x42a   :  { %p4259_p13 = scmp.ne.s32.totalorder %s5460_s7, %s4258_s11  ;;  %p4262_p0 = scmp.lt.u32.totalorder %s4258_s11, %s5460_s7 }
 0x42c   :  { %p4264_p1 = pnand %p4262_p0, %p4259_p13 }
 0x42e   :  { %4267 = shalt.err (!%p4264_p1)
}
 0x42f   :  { %3156 = dma.vmem_to_hbm [thread:$0]  %s3154_s8, 32, %s5460_s7, [#allocation4]  }
 0x430   :  { %4270 = dma.done.wait [#allocation4], 32  }
 0x431   :  { %4271 = vsyncadd [#allocation4], 4294967264 }
 0x432   :  { %3160 = vsyncpa [#allocation3], 1 }
 0x433   :  { %3161 = vsyncpa [#allocation4], 1 }

// kernel: convnet_forward.2
= control target key start
LH: loop header
LB: loop body
LE: loop exit
PB: predicated region body
PF: predicated region fallthrough
CT: control target
= control target key end

     0   :  { %14 = vsyncpa [#allocation7], 0  ;;  %s7382_s0 = inlined_call_operand.vmem [shape: f32[2,240,1], index: 0, kind: input, shape index: {}]   ;;  %s7383_s1 = inlined_call_operand.hbm [shape: f32[5,1,128], index: 1, kind: input, shape index: {}]   ;;  %s7384_s2 = inlined_call_operand.hbm [shape: bf16[4,640,128], index: 2, kind: input, shape index: {}]   ;;  %s7385_s3 = inlined_call_operand.hbm [shape: f32[5,1,128], index: 3, kind: input, shape index: {}]   ;;  %s7386_s4 = inlined_call_operand.hbm [shape: bf16[144,159], index: 4, kind: input, shape index: {}]   ;;  %s7387_s5 = inlined_call_operand.hbm [shape: bf16[96,95], index: 5, kind: input, shape index: {}]   ;;  %s7388_s6 = inlined_call_operand.vmem [shape: bf16[72,63], index: 6, kind: input, shape index: {}]   ;;  %s7389_s7 = inlined_call_operand.vmem [shape: bf16[60,47], index: 7, kind: input, shape index: {}]   ;;  %s7390_s8 = inlined_call_operand.hbm [shape: bf16[32,39], index: 8, kind: input, shape index: {}]   ;;  %s7391_s9 = inlined_call_operand.vmem [shape: bf16[2,32,40], index: 9, kind: output, shape index: {}]  }
   0x1   :  { %15 = vsyncpa [#allocation9], 0 }
   0x2   :  { %16 = vsyncpa [#allocation12], 0 }
   0x3   :  { %17 = vsyncpa [#allocation15], 0  ;;  %s6545_s30 = smov 0  }
   0x4 LB: > { %s6479_s10 = smov [#allocation8]   ;;  %s6551_s12 = sadd.s32 4294967295, %s6477_s30   ;;  %s6477_s30 = sphi %s6545_s30, %s23_s30  }
   0x5   : > { %s273_s11 = sshll.u32 %s6479_s10, 4  ;;  %p5024_p0 = scmp.ge.s32.totalorder %s6477_s30, 1  ;;  %s6556_s11 = int_to_ptr.vmem [resolvable:$true] %s273_s11 }
   0x6   : > { %p248_p1 = scmp.lt.s32.totalorder %s6477_s30, 3  ;;  %p7392_p2 = scmp.eq.s32.totalorder %s6551_s12, 0 }
   0x7   : > { %s6480_s14 = smov [#allocation11]   ;;  %s6481_s17 = smov [#allocation6]  }
   0x8   : > { %p6558_p3 = pnand %p5024_p0, %p248_p1  ;;  %s299_s15 = sshll.u32 %s6480_s14, 4  ;;  %s6564_s15 = int_to_ptr.vmem [resolvable:$true] %s299_s15 }
   0x9   : > { %s6572_s18 = sshll.u32 %s6481_s17, 4  ;;  %s6287_s21 = scalar_lea.hbm %s7384_s2, 20480  ;;  %s261_s18 = int_to_ptr.vmem [resolvable:$true] %s6572_s18 }
   0xa   : > { %s7394_s13 = scalar_select %p6558_p3, 1, 0 }
   0xb   : > { %p5997_p4 = pneg %p6558_p3  ;;  %p6288_p6 = scmp.ne.s32.totalorder %s7384_s2, %s6287_s21 }
   0xc   : > { %p6294_p10 = scmp.lt.u32.totalorder %s6287_s21, %s7384_s2 }
   0xd   : > { %p6568_p5 = pnand %p7392_p2, %p5997_p4 }
   0xf   : > { %p6582_p7 = pneg %p6568_p5 }
  0x11   : > { %p6290_p8 = pnand %p6582_p7, %p6288_p6 }
  0x13   : > { %p6291_p9 = pneg %p6290_p8 }
  0x15   : > { %p6296_p11 = pnand %p6294_p10, %p6291_p9 }
  0x17   : > { %6299 = shalt.err (!%p6296_p11)
}
  0x18   : > { %s6300_s27 = scalar_lea.vmem %s6556_s11, 20480  ;;  %p6308_p1 = scmp.lt.s32.totalorder %s6556_s11, %s6556_s11 }
  0x19   : > { %p6301_p12 = scmp.ne.s32.totalorder %s6556_s11, %s6300_s27  ;;  %p6309_p4 = scmp.lt.s32.totalorder %s6300_s27, %s6300_s27 }
  0x1b   : > { %p6303_p13 = pnand %p6301_p12, %p6582_p7  ;;  %p6310_p6 = por %p6309_p4, %p6308_p1 }
  0x1d   : > { %p6304_p0 = pneg %p6303_p13 }
  0x1f   : > { %p6311_p8 = pnand %p6310_p6, %p6304_p0 }
  0x21   : > { %6314 = shalt.err (!%p6311_p8)
}
  0x22   : > { %s6482_s28 = smov 64   ;;  %s6483_s29 = smov 4  }
  0x23   : > { %6003 = dma.hbm_to_vmem [thread:$0]  (!%p6568_p5), %s7384_s2, 20480, %s6556_s11, [#allocation9], %s6482_s28, %s6482_s28, %s6483_s29  }
  0x24   : > { %s6315_s20 = scalar_lea.hbm %s7386_s4, 2304 }
  0x25   : > { %p6316_p9 = scmp.ne.s32.totalorder %s7386_s4, %s6315_s20  ;;  %p6322_p12 = scmp.lt.u32.totalorder %s6315_s20, %s7386_s4 }
  0x27   : > { %p6318_p10 = pnand %p6316_p9, %p6582_p7 }
  0x29   : > { %p6319_p11 = pneg %p6318_p10 }
  0x2b   : > { %p6324_p13 = pnand %p6322_p12, %p6319_p11 }
  0x2d   : > { %6327 = shalt.err (!%p6324_p13)
}
  0x2e   : > { %s6328_s11 = scalar_lea.vmem %s6564_s15, 2304  ;;  %p6336_p6 = scmp.lt.s32.totalorder %s6564_s15, %s6564_s15 }
  0x2f   : > { %p6329_p0 = scmp.ne.s32.totalorder %s6564_s15, %s6328_s11  ;;  %p6337_p8 = scmp.lt.s32.totalorder %s6328_s11, %s6328_s11 }
  0x31   : > { %p6331_p1 = pnand %p6329_p0, %p6582_p7  ;;  %p6338_p9 = por %p6337_p8, %p6336_p6 }
  0x33   : > { %p6332_p4 = pneg %p6331_p1 }
  0x35   : > { %p6339_p10 = pnand %p6338_p9, %p6332_p4 }
  0x37   : > { %6342 = shalt.err (!%p6339_p10)
}
  0x38   : > { %s6484_s26 = smov 128   ;;  %s6485_s27 = smov 8  }
  0x39   : > { %6009 = dma.hbm_to_vmem [thread:$0]  (!%p6568_p5), %s7386_s4, 2304, %s6564_s15, [#allocation12], %s6484_s26, %s6484_s26, %s6485_s27  }
  0x3a   : > { %s6343_s20 = scalar_lea.hbm %s7383_s1, 80 }
  0x3b   : > { %p6344_p11 = scmp.ne.s32.totalorder %s7383_s1, %s6343_s20  ;;  %p6350_p0 = scmp.lt.u32.totalorder %s6343_s20, %s7383_s1 }
  0x3d   : > { %p6346_p12 = pnand %p6344_p11, %p6582_p7 }
  0x3f   : > { %p6347_p13 = pneg %p6346_p12 }
  0x41   : > { %p6352_p1 = pnand %p6350_p0, %p6347_p13 }
  0x43   : > { %6355 = shalt.err (!%p6352_p1)
}
  0x44   : > { %s6356_s11 = scalar_lea.vmem %s261_s18, 80  ;;  %s6363_s15 = scalar_lea.vmem %s261_s18, 96 }
  0x45   : > { %p6357_p4 = scmp.ne.s32.totalorder %s261_s18, %s6356_s11  ;;  %p6364_p9 = scmp.lt.s32.totalorder %s261_s18, %s261_s18 }
  0x46   : > { %p6365_p10 = scmp.lt.s32.totalorder %s6363_s15, %s6356_s11 }
  0x47   : > { %p6359_p6 = pnand %p6357_p4, %p6582_p7 }
  0x48   : > { %p6366_p2 = por %p6365_p10, %p6364_p9 }
  0x49   : > { %p6360_p8 = pneg %p6359_p6 }
  0x4b   : > { %p6367_p3 = pnand %p6366_p2, %p6360_p8 }
  0x4d   : > { %6370 = shalt.err (!%p6367_p3)
}
  0x4e   : > { %s6486_s26 = smov 16   ;;  %s6487_s27 = smov 1  }
  0x4f   : > { %6000 = dma.hbm_to_vmem [thread:$0]  (!%p6568_p5), %s7383_s1, 80, %s261_s18, [#allocation7], %s6486_s26, %s6486_s26, %s6487_s27  }
  0x50   : > { %s6488_s17 = smov [#allocation10]   ;;  %s6489_s20 = smov [#allocation13]  }
  0x51   : > { %s286_s19 = sshll.u32 %s6488_s17, 4  ;;  %s312_s21 = sshll.u32 %s6489_s20, 4  ;;  %s287_s19 = int_to_ptr.vmem [resolvable:$true] %s286_s19  ;;  %s6648_s21 = int_to_ptr.vmem [resolvable:$true] %s312_s21 }
  0x52   : > { %s6371_s25 = scalar_lea.hbm %s7385_s3, 80 }
  0x53   : > { %p6372_p2 = scmp.ne.s32.totalorder %s7385_s3, %s6371_s25  ;;  %p6378_p12 = scmp.lt.u32.totalorder %s6371_s25, %s7385_s3 }
  0x55   : > { %p6374_p3 = pnand %p6372_p2, %p6582_p7 }
  0x57   : > { %p6375_p11 = pneg %p6374_p3 }
  0x59   : > { %p6380_p13 = pnand %p6378_p12, %p6375_p11 }
  0x5b   : > { %6383 = shalt.err (!%p6380_p13)
}
  0x5c   : > { %s6384_s14 = scalar_lea.vmem %s287_s19, 80  ;;  %s6391_s17 = scalar_lea.vmem %s287_s19, 96 }
  0x5d   : > { %p6385_p0 = scmp.ne.s32.totalorder %s287_s19, %s6384_s14  ;;  %p6392_p6 = scmp.lt.s32.totalorder %s287_s19, %s287_s19 }
  0x5e   : > { %p6393_p8 = scmp.lt.s32.totalorder %s6391_s17, %s6384_s14 }
  0x5f   : > { %p6387_p1 = pnand %p6385_p0, %p6582_p7 }
  0x60   : > { %p6394_p9 = por %p6393_p8, %p6392_p6 }
  0x61   : > { %p6388_p4 = pneg %p6387_p1 }
  0x63   : > { %p6395_p10 = pnand %p6394_p9, %p6388_p4 }
  0x65   : > { %6398 = shalt.err (!%p6395_p10)
}
  0x66   : > { %6006 = dma.hbm_to_vmem [thread:$0]  (!%p6568_p5), %s7385_s3, 80, %s287_s19, [#allocation9], %s6486_s26, %s6486_s26, %s6487_s27  }
  0x67   : > { %s6399_s11 = scalar_lea.hbm %s7387_s5, 768 }
  0x68   : > { %p6400_p2 = scmp.ne.s32.totalorder %s7387_s5, %s6399_s11  ;;  %p6406_p12 = scmp.lt.u32.totalorder %s6399_s11, %s7387_s5 }
  0x6a   : > { %p6402_p3 = pnand %p6400_p2, %p6582_p7 }
  0x6c   : > { %p6403_p11 = pneg %p6402_p3 }
  0x6e   : > { %p6408_p13 = pnand %p6406_p12, %p6403_p11 }
  0x70   : > { %6411 = shalt.err (!%p6408_p13)
}
  0x71   : > { %s6412_s26 = scalar_lea.vmem %s6648_s21, 768  ;;  %p6420_p6 = scmp.lt.s32.totalorder %s6648_s21, %s6648_s21 }
  0x72   : > { %p6413_p0 = scmp.ne.s32.totalorder %s6648_s21, %s6412_s26  ;;  %p6421_p8 = scmp.lt.s32.totalorder %s6412_s26, %s6412_s26 }
  0x74   : > { %p6415_p1 = pnand %p6413_p0, %p6582_p7  ;;  %p6422_p9 = por %p6421_p8, %p6420_p6 }
  0x76   : > { %p6416_p4 = pneg %p6415_p1 }
  0x78   : > { %p6423_p10 = pnand %p6422_p9, %p6416_p4 }
  0x7a   : > { %6426 = shalt.err (!%p6423_p10)
}
  0x7b   : > { %6012 = dma.hbm_to_vmem [thread:$0]  (!%p6568_p5), %s7387_s5, 768, %s6648_s21, [#allocation12], %s6482_s28, %s6482_s28, %s6483_s29  }
  0x7c   : > { %s6490_s17 = smov [#allocation14]   ;;  %s6427_s25 = scalar_lea.hbm %s7390_s8, 256 }
  0x7d   : > { %s331_s20 = sshll.u32 %s6490_s17, 4  ;;  %p6428_p2 = scmp.ne.s32.totalorder %s7390_s8, %s6427_s25  ;;  %s332_s20 = int_to_ptr.vmem [resolvable:$true] %s331_s20 }
  0x7e   : > { %p6434_p12 = scmp.lt.u32.totalorder %s6427_s25, %s7390_s8 }
  0x7f   : > { %p6430_p3 = pnand %p6428_p2, %p6582_p7 }
  0x81   : > { %p6431_p11 = pneg %p6430_p3 }
  0x83   : > { %p6436_p13 = pnand %p6434_p12, %p6431_p11 }
  0x85   : > { %6439 = shalt.err (!%p6436_p13)
}
  0x86   : > { %s6440_s21 = scalar_lea.vmem %s332_s20, 256  ;;  %p6448_p6 = scmp.lt.s32.totalorder %s332_s20, %s332_s20 }
  0x87   : > { %p6441_p0 = scmp.ne.s32.totalorder %s332_s20, %s6440_s21  ;;  %p6449_p8 = scmp.lt.s32.totalorder %s6440_s21, %s6440_s21 }
  0x89   : > { %p6443_p1 = pnand %p6441_p0, %p6582_p7  ;;  %p6450_p9 = por %p6449_p8, %p6448_p6 }
  0x8b   : > { %p6444_p4 = pneg %p6443_p1 }
  0x8d   : > { %p6451_p10 = pnand %p6450_p9, %p6444_p4 }
  0x8f   : > { %6454 = shalt.err (!%p6451_p10)
}
  0x90   : > { %6015 = dma.hbm_to_vmem [thread:$0]  (!%p6568_p5), %s7390_s8, 256, %s332_s20, [#allocation15], %s6482_s28, %s6482_s28, %s6483_s29  }
  0x91   : > { %p7397_p2 = scmp.ne.s32.totalorder %s7394_s13, 0 }
  0x92   : > { %p7398_p7 = scmp.eq.s32.totalorder (!%p7397_p2), %s6551_s12, 0 }
  0x93   : > { %355 = sbr.rel (%p7397_p2) target bundleno = 2838 (0xb16), region = 56 }
  0x9a   : > { %6460 = dma.done.wait (%p7398_p7), [#allocation7], 80   ;;  %p7399_p3 = pmov %p7398_p7 }
  0x9c   : > { %6462 = vsyncadd (%p7399_p3), [#allocation7], 4294967216  ;;  %p7400_p11 = pmov %p7399_p3 }
  0x9d   : > { %p7401_p12 = pmov %p7399_p3 }
  0x9e   : > { %6464 = dma.done.wait (%p7400_p11), [#allocation9], 20560  }
  0x9f   : > { %6466 = vsyncadd (%p7401_p12), [#allocation9], 4294946736  ;;  %p7402_p13 = pmov %p7399_p3 }
  0xa0   : > { %p7403_p5 = pmov %p7399_p3 }
  0xa1   : > { %6468 = dma.done.wait (%p7402_p13), [#allocation12], 3072  }
  0xa2   : > { %6470 = vsyncadd (%p7403_p5), [#allocation12], 4294964224  ;;  %p7404_p0 = pmov %p7399_p3 }
  0xa4   : > { %6472 = dma.done.wait (%p7404_p0), [#allocation15], 256   ;;  %p7405_p1 = pmov %p7404_p0 }
  0xa5   : > { %p411_p4 = scmp.lt.s32.totalorder %s6551_s12, 1  ;;  %v6491_v0 = vmov 0   ;;  %v6817_v58 = vld [vmem:[#allocation6 + $0x1] ss:$0 sm:$0xff]  ;;  %v6823_v60 = vld [vmem:[#allocation6] ss:$0 sm:$0xff] }
  0xa6   : > { %6474 = vsyncadd (%p7405_p1), [#allocation15], 4294967040  ;;  %6053 = vset.pattern.permute.xlu1 %v6491_v0  ;;  %6052 = vset.pattern.permute.xlu0 %v6491_v0  ;;  %v6825_v61 = vld [vmem:[#allocation6 + $0x2] ss:$0 sm:$0xff]  ;;  %vm1308_vm0 = vcmask 1046528   ;;  %vm1497_vm1 = vcmask 252928  }
  0xa7   : > { %s7407_s12 = smov (!%p411_p4, %s6551_s12), 1  ;;  %1531 = vmatprep.subr.bf16.mxu0 %v6491_v0  ;;  %vm1525_vm2 = vcmask 1047552   ;;  %vm1680_vm3 = vcmask 1041408   ;;  %vm1703_vm4 = vcmask 1043456   ;;  %vm1730_vm5 = vcmask 1045504  }
  0xa8   : > { %s5972_s13 = smul.u32 240, %s7407_s12  ;;  %vm2440_vm6 = vcmask 777216   ;;  %vm6494_vm7 = vmmov 0   ;;  %vm3211_vm8 = vcmask 515072   ;;  %vm3391_vm9 = vcmask 1044480  }
  0xa9   : > { %vm4025_vm10 = vcmask 384000   ;;  %vm4182_vm11 = vsmask.f32 5376  ;;  %vm4235_vm12 = vsmask.f32 4352  ;;  %vm4823_vm13 = vcmask 318464  }
  0xaa   : > { %s6744_s28 = scalar_lea.vmem %s7382_s0, %s5972_s13  ;;  %vm4830_vm14 = vcmask 1042432   ;;  %vm4902_vm15 = vcmask 322560  }
  0xab   : > { %v424_v1 = vld [vmem:[%s6744_s28 + $0x10] sm:$0xff]  ;;  %v422_v2 = vld [vmem:[%s6744_s28] sm:$0xff]  ;;  %v423_v4 = vld [vmem:[%s6744_s28 + $0x8] sm:$0xff] }
  0xac   : > { %455 = vperm.xlu1 %6053, %v424_v1   ;;  %445 = vperm.xlu0 %6052, %v422_v2   ;;  %v569_v3 = vld [vmem:[%s6744_s28 + $0x14] sm:$0xff]  ;;  %v571_v5 = vld [vmem:[%s6744_s28 + $0x24] sm:$0xff]  ;;  %v570_v6 = vld [vmem:[%s6744_s28 + $0x1c] sm:$0xff] }
  0xad   : > { %v738_v7 = vld [vmem:[%s6744_s28 + $0x30] sm:$0xff]  ;;  %v737_v8 = vld [vmem:[%s6744_s28 + $0x28] sm:$0xff]  ;;  %v425_v9 = vld [vmem:[%s6744_s28 + $0x18] sm:$0xff] }
  0xae   : > { %v739_v10 = vld [vmem:[%s6744_s28 + $0x38] sm:$0xff]  ;;  %v572_v11 = vld [vmem:[%s6744_s28 + $0x2c] sm:$0xff]  ;;  %v426_v12 = vld [vmem:[%s6744_s28 + $0x20] sm:$0xff] }
  0xaf   : > { %v905_v13 = vld [vmem:[%s6744_s28 + $0x3c] sm:$0xff]  ;;  %v573_v14 = vld [vmem:[%s6744_s28 + $0x34] sm:$0xff]  ;;  %v907_v15 = vld [vmem:[%s6744_s28 + $0x4c] sm:$0xff] }
  0xb0   : > { %593 = vperm.xlu1 %6053, %v569_v3   ;;  %450 = vperm.xlu0 %6052, %v423_v4   ;;  %v906_v16 = vld [vmem:[%s6744_s28 + $0x44] sm:$0xff]  ;;  %v1074_v19 = vld [vmem:[%s6744_s28 + $0x58] sm:$0xff]  ;;  %v1073_v20 = vld [vmem:[%s6744_s28 + $0x50] sm:$0xff] }
  0xb1   : > { %v741_v17 = vld [vmem:[%s6744_s28 + $0x48] sm:$0xff]  ;;  %v740_v18 = vld [vmem:[%s6744_s28 + $0x40] sm:$0xff]  ;;  %v908_v22 = vld [vmem:[%s6744_s28 + $0x54] sm:$0xff] }
  0xb2   : > { %v1075_v21 = vld [vmem:[%s6744_s28 + $0x60] sm:$0xff]  ;;  %v1076_v24 = vld [vmem:[%s6744_s28 + $0x68] sm:$0xff]  ;;  %v1077_v25 = vld [vmem:[%s6744_s28 + $0x70] sm:$0xff] }
  0xb3   : > { %v909_v23 = vld [vmem:[%s6744_s28 + $0x5c] sm:$0xff]  ;;  %v910_v26 = vld [vmem:[%s6744_s28 + $0x64] sm:$0xff]  ;;  %v911_v27 = vld [vmem:[%s6744_s28 + $0x6c] sm:$0xff] }
  0xb4   : > { %603 = vperm.xlu1 %6053, %v571_v5   ;;  %598 = vperm.xlu0 %6052, %v570_v6   ;;  %v1078_v28 = vld [vmem:[%s6744_s28 + $0x78] sm:$0xff]  ;;  %v1079_v29 = vld [vmem:[%s6744_s28 + $0x80] sm:$0xff]  ;;  %v6778_v32 = vld [vmem:[%s6744_s28 + $0x88] sm:$0xff] }
  0xb5   : > { %v912_v30 = vld [vmem:[%s6744_s28 + $0x74] sm:$0xff]  ;;  %v913_v31 = vld [vmem:[%s6744_s28 + $0x7c] sm:$0xff]  ;;  %v914_v34 = vld [vmem:[%s6744_s28 + $0x84] sm:$0xff] }
  0xb6   : > { %v6781_v33 = vld [vmem:[%s6744_s28 + $0x90] sm:$0xff]  ;;  %v6788_v36 = vld [vmem:[%s6744_s28 + $0x98] sm:$0xff]  ;;  %v1083_v37 = vld [vmem:[%s6744_s28 + $0xa0] sm:$0xff] }
  0xb7   : > { %v915_v35 = vld [vmem:[%s6744_s28 + $0x8c] sm:$0xff]  ;;  %v916_v38 = vld [vmem:[%s6744_s28 + $0x94] sm:$0xff]  ;;  %v6795_v41 = vld [vmem:[%s6744_s28 + $0x9c] sm:$0xff] }
  0xb8   : > { %766 = vperm.xlu1 %6053, %v738_v7   ;;  %761 = vperm.xlu0 %6052, %v737_v8   ;;  %v1084_v44 = vld [vmem:[%s6744_s28 + $0xa8] sm:$0xff]  ;;  %v6801_v47 = vld [vmem:[%s6744_s28 + $0xb0] sm:$0xff]  ;;  %v6821_v59 = vld [vmem:[%s6744_s28 + $0xb8] sm:$0xff] }
  0xb9   : > { %v918_v52 = vld [vmem:[%s6744_s28 + $0xa4] sm:$0xff]  ;;  %v6813_v55 = vld [vmem:[%s6744_s28 + $0xac] sm:$0xff]  ;;  %v6829_v3 = vld [vmem:[#allocation6 + $0x3] ss:$0 sm:$0xff] }
  0xba   : > { %v6835_v6 = vld [vmem:[%s6744_s28 + $0xc0] sm:$0xff] }
  0xbc   : > { %460 = vperm.xlu1 %6053, %v425_v9   ;;  %771 = vperm.xlu0 %6052, %v739_v10  }
  0xc0   : > { %608 = vperm.xlu1 %6053, %v572_v11   ;;  %465 = vperm.xlu0 %6052, %v426_v12  }
  0xc4   : > { %929 = vperm.xlu1 %6053, %v905_v13   ;;  %613 = vperm.xlu0 %6052, %v573_v14  }
  0xc8   : > { %939 = vperm.xlu1 %6053, %v907_v15   ;;  %934 = vperm.xlu0 %6052, %v906_v16  }
  0xcc   : > { %781 = vperm.xlu1 %6053, %v741_v17   ;;  %776 = vperm.xlu0 %6052, %v740_v18  }
  0xd0   : > { %1102 = vperm.xlu1 %6053, %v1074_v19   ;;  %1097 = vperm.xlu0 %6052, %v1073_v20  }
  0xd4   : > { %470 = vperm.xlu1 %6053, %v737_v8   ;;  %1107 = vperm.xlu0 %6052, %v1075_v21  }
  0xd8   : > { %618 = vperm.xlu1 %6053, %v905_v13   ;;  %475 = vperm.xlu0 %6052, %v738_v7  }
  0xdc   : > { %944 = vperm.xlu1 %6053, %v908_v22   ;;  %623 = vperm.xlu0 %6052, %v906_v16  }
  0xe0   : > { %786 = vperm.xlu1 %6053, %v1073_v20   ;;  %949 = vperm.xlu0 %6052, %v909_v23  }
  0xe4   : > { %1112 = vperm.xlu1 %6053, %v1076_v24   ;;  %791 = vperm.xlu0 %6052, %v1074_v19  }
  0xe8   : > { %480 = vperm.xlu1 %6053, %v739_v10   ;;  %1117 = vperm.xlu0 %6052, %v1077_v25  }
  0xec   : > { %628 = vperm.xlu1 %6053, %v907_v15   ;;  %485 = vperm.xlu0 %6052, %v740_v18   ;;  %v6847_v18 = vld [vmem:[#allocation6 + $0x4] ss:$0 sm:$0xff] }
  0xf0   : > { %954 = vperm.xlu1 %6053, %v910_v26   ;;  %633 = vperm.xlu0 %6052, %v908_v22  }
  0xf4   : > { %796 = vperm.xlu1 %6053, %v1075_v21   ;;  %959 = vperm.xlu0 %6052, %v911_v27  }
  0xf8   : > { %1122 = vperm.xlu1 %6053, %v1078_v28   ;;  %801 = vperm.xlu0 %6052, %v1076_v24  }
  0xfc   : > { %490 = vperm.xlu1 %6053, %v741_v17   ;;  %1127 = vperm.xlu0 %6052, %v1079_v29  }
 0x100   : > { %638 = vperm.xlu1 %6053, %v909_v23   ;;  %495 = vperm.xlu0 %6052, %v1073_v20  }
 0x104   : > { %964 = vperm.xlu1 %6053, %v912_v30   ;;  %643 = vperm.xlu0 %6052, %v910_v26  }
 0x108   : > { %806 = vperm.xlu1 %6053, %v1077_v25   ;;  %969 = vperm.xlu0 %6052, %v913_v31  }
 0x10c   : > { %1132 = vperm.xlu1 %6053, %v6778_v32   ;;  %811 = vperm.xlu0 %6052, %v1078_v28  }
 0x110   : > { %500 = vperm.xlu1 %6053, %v1074_v19   ;;  %1137 = vperm.xlu0 %6052, %v6781_v33  }
 0x114   : > { %648 = vperm.xlu1 %6053, %v911_v27   ;;  %505 = vperm.xlu0 %6052, %v1075_v21  }
 0x118   : > { %974 = vperm.xlu1 %6053, %v914_v34   ;;  %653 = vperm.xlu0 %6052, %v912_v30   ;;  %v920_v30 = vld [vmem:[%s6744_s28 + $0xb4] sm:$0xff] }
 0x11c   : > { %816 = vperm.xlu1 %6053, %v1079_v29   ;;  %979 = vperm.xlu0 %6052, %v915_v35  }
 0x120   : > { %1142 = vperm.xlu1 %6053, %v6788_v36   ;;  %821 = vperm.xlu0 %6052, %v6778_v32  }
 0x124   : > { %510 = vperm.xlu1 %6053, %v1076_v24   ;;  %1147 = vperm.xlu0 %6052, %v1083_v37  }
 0x128   : > { %658 = vperm.xlu1 %6053, %v913_v31   ;;  %515 = vperm.xlu0 %6052, %v1077_v25  }
 0x12b   : > { %v456_v39 = vpop.permute.xlu1 %455  ;;  %v446_v40 = vpop.permute.xlu0 %445 }
 0x12c   : > { %984 = vperm.xlu1 %6053, %v916_v38   ;;  %663 = vperm.xlu0 %6052, %v914_v34   ;;  %v549_v4 = vmul.f32 %v6823_v60, %v446_v40  ;;  %v551_v16 = vmul.f32 %v6823_v60, %v456_v39 }
 0x12f   : > { %v594_v42 = vpop.permute.xlu1 %593  ;;  %v451_v43 = vpop.permute.xlu0 %450 }
 0x130   : > { %826 = vperm.xlu1 %6053, %v6781_v33   ;;  %989 = vperm.xlu0 %6052, %v6795_v41   ;;  %v697_v62 = vmul.f32 %v6817_v58, %v594_v42  ;;  %v550_v7 = vmul.f32 %v6823_v60, %v451_v43 }
 0x132   : > { %v717_v9 = vadd.f32 %v697_v62, %v549_v4 }
 0x133   : > { %v604_v45 = vpop.permute.xlu1 %603  ;;  %v599_v46 = vpop.permute.xlu0 %598 }
 0x134   : > { %1152 = vperm.xlu1 %6053, %v1084_v44   ;;  %831 = vperm.xlu0 %6052, %v6788_v36   ;;  %v698_v2 = vmul.f32 %v6817_v58, %v599_v46  ;;  %v699_v10 = vmul.f32 %v6817_v58, %v604_v45 }
 0x136   : > { %v718_v14 = vadd.f32 %v698_v2, %v550_v7  ;;  %v719_v21 = vadd.f32 %v699_v10, %v551_v16 }
 0x137   : > { %v767_v48 = vpop.permute.xlu1 %766  ;;  %v762_v49 = vpop.permute.xlu0 %761 }
 0x138   : > { %520 = vperm.xlu1 %6053, %v1078_v28   ;;  %1157 = vperm.xlu0 %6052, %v6801_v47   ;;  %v865_v5 = vmul.f32 %v6825_v61, %v762_v49  ;;  %v866_v8 = vmul.f32 %v6825_v61, %v767_v48 }
 0x13a   : > { %v885_v17 = vadd.f32 %v865_v5, %v717_v9  ;;  %v886_v19 = vadd.f32 %v866_v8, %v718_v14 }
 0x13b   : > { %v6805_v50 = vpop.permute.xlu1 %460  ;;  %v772_v51 = vpop.permute.xlu0 %771 }
 0x13c   : > { %668 = vperm.xlu1 %6053, %v915_v35   ;;  %525 = vperm.xlu0 %6052, %v1079_v29   ;;  %v867_v20 = vmul.f32 %v6825_v61, %v772_v51  ;;  %v6855_v29 = vld [vmem:[#allocation10] ss:$0 sm:$0xff]  ;;  %v552_v4 = vmul.f32 %v6823_v60, %v6805_v50 }
 0x13e   : > { %v887_v31 = vadd.f32 %v867_v20, %v719_v21 }
 0x13f   : > { %v6808_v53 = vpop.permute.xlu1 %608  ;;  %v6810_v54 = vpop.permute.xlu0 %465 }
 0x140   : > { %994 = vperm.xlu1 %6053, %v918_v52   ;;  %673 = vperm.xlu0 %6052, %v916_v38  }
 0x143   : > { %v930_v56 = vpop.permute.xlu1 %929  ;;  %v6815_v57 = vpop.permute.xlu0 %613 }
 0x144   : > { %836 = vperm.xlu1 %6053, %v1083_v37   ;;  %999 = vperm.xlu0 %6052, %v6813_v55   ;;  %v1033_v11 = vmul.f32 %v6829_v3, %v930_v56 }
 0x146   : > { %v1053_v22 = vadd.f32 %v1033_v11, %v885_v17 }
 0x147   : > { %v940_v63 = vpop.permute.xlu1 %939  ;;  %v935_v1 = vpop.permute.xlu0 %934 }
 0x148   : > { %1162 = vperm.xlu1 %6053, %v6821_v59   ;;  %841 = vperm.xlu0 %6052, %v1084_v44   ;;  %v1034_v15 = vmul.f32 %v6829_v3, %v935_v1  ;;  %v1035_v23 = vmul.f32 %v6829_v3, %v940_v63  ;;  %v921_v44 = vld [vmem:[%s6744_s28 + $0xbc] sm:$0xff]  ;;  %v700_v63 = vmul.f32 %v6817_v58, %v6808_v53 }
 0x149   : > { %v701_v53 = vmul.f32 %v6817_v58, %v6815_v57 }
 0x14a   : > { %v1054_v26 = vadd.f32 %v1034_v15, %v886_v19  ;;  %v1055_v38 = vadd.f32 %v1035_v23, %v887_v31  ;;  %v720_v11 = vadd.f32 %v700_v63, %v552_v4  ;;  %v1089_v15 = vld [vmem:[%s6744_s28 + $0xd0] sm:$0xff]  ;;  %v922_v23 = vld [vmem:[%s6744_s28 + $0xc4] sm:$0xff] }
 0x14b   : > { %v6841_v12 = vpop.permute.xlu1 %781  ;;  %v777_v13 = vpop.permute.xlu0 %776 }
 0x14c   : > { %530 = vperm.xlu1 %6053, %v6778_v32   ;;  %1167 = vperm.xlu0 %6052, %v6835_v6   ;;  %v868_v5 = vmul.f32 %v6825_v61, %v777_v13  ;;  %v869_v13 = vmul.f32 %v6825_v61, %v6841_v12 }
 0x14e   : > { %v888_v57 = vadd.f32 %v868_v5, %v720_v11 }
 0x14f   : > { %v1103_v24 = vpop.permute.xlu1 %1102  ;;  %v1098_v25 = vpop.permute.xlu0 %1097 }
 0x150   : > { %v1202_v27 = vmul.f32 %v6847_v18, %v1103_v24  ;;  %v1201_v28 = vmul.f32 %v6847_v18, %v1098_v25  ;;  %678 = vperm.xlu1 %6053, %v6795_v41   ;;  %535 = vperm.xlu0 %6052, %v6781_v33  }
 0x152   : > { %v1222_v32 = vadd.f32 %v1202_v27, %v1054_v26  ;;  %v1221_v34 = vadd.f32 %v1201_v28, %v1053_v22 }
 0x153   : > { %v6858_v35 = vpop.permute.xlu1 %470  ;;  %v1108_v37 = vpop.permute.xlu0 %1107 }
 0x154   : > { %v1249_v39 = vadd.f32 %v6855_v29, %v1222_v32  ;;  %v1248_v40 = vadd.f32 %v6855_v29, %v1221_v34  ;;  %v1203_v42 = vmul.f32 %v6847_v18, %v1108_v37  ;;  %1004 = vperm.xlu1 %6053, %v920_v30   ;;  %683 = vperm.xlu0 %6052, %v918_v52   ;;  %v924_v32 = vld [vmem:[%s6744_s28 + $0xd4] sm:$0xff] }
 0x156   : > { %v1269_v33 = vmax.f32 %v1249_v39, 0.0  ;;  %v1268_v41 = vmax.f32 %v1248_v40, 0.0  ;;  %v1223_v43 = vadd.f32 %v1203_v42, %v1055_v38  ;;  %v1092_v40 = vld [vmem:[%s6744_s28 + $0xe8] sm:$0xff] }
 0x157   : > { %v6864_v45 = vpop.permute.xlu1 %618  ;;  %v6866_v46 = vpop.permute.xlu0 %475 }
 0x158   : > { %v1310_v48 = vrot.slane %v1269_v33, 1  ;;  %v1309_v49 = vrot.slane %v1268_v41, 1  ;;  %v6869_v51 = vadd.f32 %v6855_v29, %v1223_v43  ;;  %540 = vperm.xlu1 %6053, %v6788_v36   ;;  %1009 = vperm.xlu0 %6052, %v921_v44   ;;  %v1088_v36 = vld [vmem:[%s6744_s28 + $0xc8] sm:$0xff]  ;;  %v702_v44 = vmul.f32 %v6817_v58, %v6864_v45 }
 0x15a   : > { %v1270_v52 = vmax.f32 %v6869_v51, 0.0  ;;  %v1311_v2 = vsel %vm1308_vm0, %v1309_v49, %v1310_v48 }
 0x15b   : > { %v945_v56 = vpop.permute.xlu1 %944  ;;  %v6873_v62 = vpop.permute.xlu0 %623  ;;  %v1368_v10 = vmax.f32 %v1268_v41, %v1311_v2 }
 0x15c   : > { %v1312_v1 = vrot.slane %v1270_v52, 1  ;;  %846 = vperm.xlu1 %6053, %v6801_v47   ;;  %688 = vperm.xlu0 %6052, %v6813_v55   ;;  %v1036_v14 = vmul.f32 %v6829_v3, %v945_v56  ;;  %v553_v55 = vmul.f32 %v6823_v60, %v6810_v54  ;;  %v554_v56 = vmul.f32 %v6823_v60, %v6858_v35 }
 0x15d   : > { %v703_v45 = vmul.f32 %v6817_v58, %v6873_v62  ;;  %v555_v35 = vmul.f32 %v6823_v60, %v6866_v46 }
 0x15e   : > { %v1313_v7 = vsel %vm1308_vm0, %v1310_v48, %v1312_v1  ;;  %v721_v16 = vadd.f32 %v701_v53, %v553_v55  ;;  %v1056_v20 = vadd.f32 %v1036_v14, %v888_v57  ;;  %v722_v53 = vadd.f32 %v702_v44, %v554_v56 }
 0x15f   : > { %v787_v8 = vpop.permute.xlu1 %786  ;;  %v950_v9 = vpop.permute.xlu0 %949  ;;  %v1369_v47 = vmax.f32 %v1269_v33, %v1313_v7  ;;  %v1091_v33 = vld [vmem:[%s6744_s28 + $0xe0] sm:$0xff]  ;;  %v723_v14 = vadd.f32 %v703_v45, %v555_v35 }
 0x160   : > { %1172 = vperm.xlu1 %6053, %v1088_v36   ;;  %851 = vperm.xlu0 %6052, %v6821_v59   ;;  %v1037_v21 = vmul.f32 %v6829_v3, %v950_v9  ;;  %v923_v59 = vld [vmem:[%s6744_s28 + $0xcc] sm:$0xff]  ;;  %v889_v12 = vadd.f32 %v869_v13, %v721_v16  ;;  %v870_v63 = vmul.f32 %v6825_v61, %v787_v8 }
 0x161   : > { %v1388_v50 = vpack.c.bf16 %v1369_v47, %v1368_v10 }
 0x162   : > { %v1057_v26 = vadd.f32 %v1037_v21, %v889_v12  ;;  %v890_v10 = vadd.f32 %v870_v63, %v722_v53 }
 0x163   : > { %v1113_v17 = vpop.permute.xlu1 %1112  ;;  %1532 = vmatpush1.bf16.msra.mxu0 %v1388_v50  ;;  %v792_v19 = vpop.permute.xlu0 %791 }
 0x164   : > { %v1204_v54 = vmul.f32 %v6847_v18, %v1113_v17  ;;  %856 = vperm.xlu1 %6053, %v6835_v6   ;;  %1533 = vmatprep.subr.bf16.mxu0 %v6491_v0  ;;  %v1090_v6 = vld [vmem:[%s6744_s28 + $0xd8] sm:$0xff]  ;;  %v871_v8 = vmul.f32 %v6825_v61, %v792_v19  ;;  %s5325_s28 = sshll.u32 %s7407_s12, 4 }
 0x165   : > { %1177 = vperm.xlu0 %6052, %v1089_v15   ;;  %s420_s19 = scalar_lea.vmem %s7391_s9, %s5325_s28 }
 0x166   : > { %v1224_v22 = vadd.f32 %v1204_v54, %v1056_v20  ;;  %v891_v62 = vadd.f32 %v871_v8, %v723_v14 }
 0x167   : > { %v6902_v24 = vpop.permute.xlu1 %480  ;;  %v1118_v25 = vpop.permute.xlu0 %1117 }
 0x168   : > { %v1251_v27 = vadd.f32 %v6855_v29, %v1224_v22  ;;  %v1205_v28 = vmul.f32 %v6847_v18, %v1118_v25  ;;  %1019 = vperm.xlu1 %6053, %v923_v59  }
 0x169   : > { %1014 = vperm.xlu0 %6052, %v922_v23  }
 0x16a   : > { %v1271_v30 = vmax.f32 %v1251_v27, 0.0  ;;  %v1225_v31 = vadd.f32 %v1205_v28, %v1057_v26  ;;  %v6056_v28 = vld [vmem:[#allocation11 + $0x4] ss:$8 sps:$4 sm:$0xff]  }
 0x16b   : > { %v629_v34 = vpop.permute.xlu1 %628  ;;  %v6908_v37 = vpop.permute.xlu0 %485  ;;  %5066 = vmatprep.mubr.msk.bf16.mxu0 %vm1497_vm1, %v6056_v28 }
 0x16c   : > { %v1314_v38 = vrot.slane %v1271_v30, 1  ;;  %v6911_v39 = vadd.f32 %v6855_v29, %v1225_v31  ;;  %1182 = vperm.xlu1 %6053, %v1090_v6   ;;  %v704_v25 = vmul.f32 %v6817_v58, %v629_v34  ;;  %v556_v6 = vmul.f32 %v6823_v60, %v6902_v24 }
 0x16d   : > { %1024 = vperm.xlu0 %6052, %v924_v32  }
 0x16e   : > { %v1272_v42 = vmax.f32 %v6911_v39, 0.0  ;;  %v1315_v49 = vsel %vm1308_vm0, %v1312_v1, %v1314_v38 }
 0x16f   : > { %v955_v41 = vpop.permute.xlu1 %954  ;;  %v634_v43 = vpop.permute.xlu0 %633  ;;  %v1370_v5 = vmax.f32 %v1270_v52, %v1315_v49 }
 0x170   : > { %v1316_v48 = vrot.slane %v1272_v42, 1  ;;  %1192 = vperm.xlu1 %6053, %v1092_v40   ;;  %v1038_v1 = vmul.f32 %v6829_v3, %v955_v41  ;;  %v705_v34 = vmul.f32 %v6817_v58, %v634_v43 }
 0x171   : > { %1187 = vperm.xlu0 %6052, %v1091_v33   ;;  %v724_v33 = vadd.f32 %v704_v25, %v556_v6 }
 0x172   : > { %v1317_v2 = vsel %vm1308_vm0, %v1314_v38, %v1316_v48  ;;  %v1058_v51 = vadd.f32 %v1038_v1, %v890_v10 }
 0x173   : > { %v797_v36 = vpop.permute.xlu1 %796  ;;  %v960_v4 = vpop.permute.xlu0 %959  ;;  %v1371_v7 = vmax.f32 %v1271_v30, %v1317_v2 }
 0x174   : > { %v1039_v52 = vmul.f32 %v6829_v3, %v960_v4  ;;  %v872_v30 = vmul.f32 %v6825_v61, %v797_v36 }
 0x175   : > { %v1389_v9 = vpack.c.bf16 %v1371_v7, %v1370_v5 }
 0x176   : > { %v1059_v15 = vadd.f32 %v1039_v52, %v891_v62  ;;  %v892_v24 = vadd.f32 %v872_v30, %v724_v33 }
 0x177   : > { %v1123_v47 = vpop.permute.xlu1 %1122  ;;  %1534 = vmatpush1.bf16.msra.mxu0 %v1389_v9  ;;  %v802_v11 = vpop.permute.xlu0 %801 }
 0x178   : > { %v1206_v55 = vmul.f32 %v6847_v18, %v1123_v47  ;;  %1535 = vmatprep.subr.bf16.mxu0 %v6491_v0  ;;  %v873_v49 = vmul.f32 %v6825_v61, %v802_v11 }
 0x17a   : > { %v1226_v50 = vadd.f32 %v1206_v55, %v1058_v51 }
 0x17b   : > { %v491_v13 = vpop.permute.xlu1 %490  ;;  %v1128_v57 = vpop.permute.xlu0 %1127 }
 0x17c   : > { %v1253_v46 = vadd.f32 %v6855_v29, %v1226_v50  ;;  %v1207_v16 = vmul.f32 %v6847_v18, %v1128_v57  ;;  %v558_v57 = vmul.f32 %v6823_v60, %v491_v13 }
 0x17e   : > { %v1273_v17 = vmax.f32 %v1253_v46, 0.0  ;;  %v1227_v19 = vadd.f32 %v1207_v16, %v1059_v15 }
 0x17f   : > { %v639_v20 = vpop.permute.xlu1 %638  ;;  %v6936_v21 = vpop.permute.xlu0 %495 }
 0x180   : > { %v1318_v54 = vrot.slane %v1273_v17, 1  ;;  %v1254_v59 = vadd.f32 %v6855_v29, %v1227_v19  ;;  %v706_v55 = vmul.f32 %v6817_v58, %v639_v20  ;;  %v559_v20 = vmul.f32 %v6823_v60, %v6936_v21 }
 0x182   : > { %v1274_v12 = vmax.f32 %v1254_v59, 0.0  ;;  %v1319_v27 = vsel %vm1308_vm0, %v1316_v48, %v1318_v54  ;;  %v557_v48 = vmul.f32 %v6823_v60, %v6908_v37  ;;  %v726_v59 = vadd.f32 %v706_v55, %v558_v57 }
 0x183   : > { %v965_v22 = vpop.permute.xlu1 %964  ;;  %v644_v23 = vpop.permute.xlu0 %643  ;;  %v1372_v39 = vmax.f32 %v1272_v42, %v1319_v27 }
 0x184   : > { %v1320_v26 = vrot.slane %v1274_v12, 1  ;;  %v1040_v41 = vmul.f32 %v6829_v3, %v965_v22  ;;  %v725_v2 = vadd.f32 %v705_v34, %v557_v48  ;;  %v707_v22 = vmul.f32 %v6817_v58, %v644_v23 }
 0x186   : > { %v1321_v31 = vsel %vm1308_vm0, %v1318_v54, %v1320_v26  ;;  %v1060_v36 = vadd.f32 %v1040_v41, %v892_v24  ;;  %v893_v43 = vadd.f32 %v873_v49, %v725_v2  ;;  %v727_v30 = vadd.f32 %v707_v22, %v559_v20 }
 0x187   : > { %v807_v32 = vpop.permute.xlu1 %806  ;;  %v970_v38 = vpop.permute.xlu0 %969  ;;  %v1373_v40 = vmax.f32 %v1273_v17, %v1321_v31 }
 0x188   : > { %v1041_v42 = vmul.f32 %v6829_v3, %v970_v38  ;;  %v874_v15 = vmul.f32 %v6825_v61, %v807_v32 }
 0x189   : > { %v1390_v44 = vpack.c.bf16 %v1373_v40, %v1372_v39 }
 0x18a   : > { %v1061_v45 = vadd.f32 %v1041_v42, %v893_v43 }
 0x18b   : > { %v1133_v56 = vpop.permute.xlu1 %1132  ;;  %1536 = vmatpush1.bf16.msra.mxu0 %v1390_v44  ;;  %v812_v63 = vpop.permute.xlu0 %811 }
 0x18c   : > { %v1208_v4 = vmul.f32 %v6847_v18, %v1133_v56  ;;  %1537 = vmatprep.subr.bf16.mxu0 %v6491_v0  ;;  %v875_v13 = vmul.f32 %v6825_v61, %v812_v63 }
 0x18e   : > { %v1228_v5 = vadd.f32 %v1208_v4, %v1060_v36  ;;  %v895_v23 = vadd.f32 %v875_v13, %v727_v30 }
 0x18f   : > { %v501_v7 = vpop.permute.xlu1 %500  ;;  %v1138_v53 = vpop.permute.xlu0 %1137 }
 0x190   : > { %v1255_v37 = vadd.f32 %v6855_v29, %v1228_v5  ;;  %v1209_v1 = vmul.f32 %v6847_v18, %v1138_v53  ;;  %v560_v5 = vmul.f32 %v6823_v60, %v501_v7 }
 0x192   : > { %v1275_v9 = vmax.f32 %v1255_v37, 0.0  ;;  %v1229_v35 = vadd.f32 %v1209_v1, %v1061_v45 }
 0x193   : > { %v649_v10 = vpop.permute.xlu1 %648  ;;  %v506_v8 = vpop.permute.xlu0 %505 }
 0x194   : > { %v1322_v47 = vrot.slane %v1275_v9, 1  ;;  %v1256_v11 = vadd.f32 %v6855_v29, %v1229_v35  ;;  %v708_v42 = vmul.f32 %v6817_v58, %v649_v10  ;;  %v561_v10 = vmul.f32 %v6823_v60, %v506_v8 }
 0x196   : > { %v1276_v14 = vmax.f32 %v1256_v11, 0.0  ;;  %v1323_v50 = vsel %vm1308_vm0, %v1320_v26, %v1322_v47  ;;  %v894_v26 = vadd.f32 %v874_v15, %v726_v59 }
 0x197   : > { %v975_v51 = vpop.permute.xlu1 %974  ;;  %v654_v52 = vpop.permute.xlu0 %653  ;;  %v1374_v19 = vmax.f32 %v1274_v12, %v1323_v50 }
 0x198   : > { %v1324_v62 = vrot.slane %v1276_v14, 1  ;;  %v1042_v25 = vmul.f32 %v6829_v3, %v975_v51  ;;  %v709_v11 = vmul.f32 %v6817_v58, %v654_v52 }
 0x19a   : > { %v1325_v46 = vsel %vm1308_vm0, %v1322_v47, %v1324_v62  ;;  %v1062_v31 = vadd.f32 %v1042_v25, %v894_v26  ;;  %v728_v47 = vadd.f32 %v708_v42, %v560_v5  ;;  %v729_v15 = vadd.f32 %v709_v11, %v561_v10 }
 0x19b   : > { %v817_v16 = vpop.permute.xlu1 %816  ;;  %v980_v17 = vpop.permute.xlu0 %979  ;;  %v1375_v54 = vmax.f32 %v1275_v9, %v1325_v46 }
 0x19c   : > { %v1043_v12 = vmul.f32 %v6829_v3, %v980_v17  ;;  %v876_v53 = vmul.f32 %v6825_v61, %v817_v16 }
 0x19d   : > { %v1391_v27 = vpack.c.bf16 %v1375_v54, %v1374_v19 }
 0x19e   : > { %v1063_v33 = vadd.f32 %v1043_v12, %v895_v23  ;;  %v896_v50 = vadd.f32 %v876_v53, %v728_v47  ;;  %v6081_v53 = vld [vmem:[#allocation8 + $0x40] sm:$0xff]   ;;  %v6084_v47 = vld [vmem:[#allocation8 + $0x8] sm:$0xff]  }
 0x19f   : > { %v1143_v28 = vpop.permute.xlu1 %1142  ;;  %1538 = vmatpush1.bf16.msra.mxu0 %v1391_v27  ;;  %v822_v6 = vpop.permute.xlu0 %821  ;;  %5387 = vmatprep.subr.bf16.mxu1 %v6081_v53 }
 0x1a0   : > { %v1210_v32 = vmul.f32 %v6847_v18, %v1143_v28  ;;  %1539 = vmatprep.subr.bf16.mxu0 %v6491_v0 }
 0x1a2   : > { %v1230_v38 = vadd.f32 %v1210_v32, %v1062_v31 }
 0x1a3   : > { %v511_v39 = vpop.permute.xlu1 %510  ;;  %v1148_v40 = vpop.permute.xlu0 %1147 }
 0x1a4   : > { %v1257_v21 = vadd.f32 %v6855_v29, %v1230_v38  ;;  %v1211_v34 = vmul.f32 %v6847_v18, %v1148_v40  ;;  %v562_v38 = vmul.f32 %v6823_v60, %v511_v39 }
 0x1a6   : > { %v1277_v41 = vmax.f32 %v1257_v21, 0.0  ;;  %v1231_v44 = vadd.f32 %v1211_v34, %v1063_v33 }
 0x1a7   : > { %v659_v48 = vpop.permute.xlu1 %658  ;;  %v516_v24 = vpop.permute.xlu0 %515 }
 0x1a8   : > { %v1326_v49 = vrot.slane %v1277_v41, 1  ;;  %v1258_v56 = vadd.f32 %v6855_v29, %v1231_v44  ;;  %v710_v12 = vmul.f32 %v6817_v58, %v659_v48  ;;  %v563_v48 = vmul.f32 %v6823_v60, %v516_v24 }
 0x1aa   : > { %v1278_v63 = vmax.f32 %v1258_v56, 0.0  ;;  %v1327_v43 = vsel %vm1308_vm0, %v1324_v62, %v1326_v49  ;;  %v877_v62 = vmul.f32 %v6825_v61, %v822_v6 }
 0x1ab   : > { %v985_v2 = vpop.permute.xlu1 %984  ;;  %v664_v36 = vpop.permute.xlu0 %663  ;;  %v1376_v9 = vmax.f32 %v1276_v14, %v1327_v43 }
 0x1ac   : > { %v1328_v4 = vrot.slane %v1278_v63, 1  ;;  %v1044_v51 = vmul.f32 %v6829_v3, %v985_v2  ;;  %v897_v52 = vadd.f32 %v877_v62, %v729_v15  ;;  %v711_v56 = vmul.f32 %v6817_v58, %v664_v36 }
 0x1ae   : > { %v1329_v45 = vsel %vm1308_vm0, %v1326_v49, %v1328_v4  ;;  %v1064_v46 = vadd.f32 %v1044_v51, %v896_v50  ;;  %v730_v49 = vadd.f32 %v710_v12, %v562_v38 }
 0x1af   : > { %v827_v37 = vpop.permute.xlu1 %826  ;;  %v990_v1 = vpop.permute.xlu0 %989  ;;  %v1377_v35 = vmax.f32 %v1277_v41, %v1329_v45  ;;  %v6082_v45 = vld [vmem:[#allocation8] sm:$0xff]  }
 0x1b0   : > { %v1045_v16 = vmul.f32 %v6829_v3, %v990_v1  ;;  %v878_v40 = vmul.f32 %v6825_v61, %v827_v37  ;;  %v6083_v37 = vld [vmem:[#allocation8 + $0x48] sm:$0xff]   ;;  %v731_v1 = vadd.f32 %v711_v56, %v563_v48  ;;  %5388 = vmatpush3.bf16.msra.mxu1 %v6082_v45 }
 0x1b1   : > { %v1392_v55 = vpack.c.bf16 %v1377_v35, %v1376_v9  ;;  %5389 = vmatprep.subr.bf16.mxu1 %v6083_v37 }
 0x1b2   : > { %v1065_v8 = vadd.f32 %v1045_v16, %v897_v52  ;;  %v898_v43 = vadd.f32 %v878_v40, %v730_v49 }
 0x1b3   : > { %v1153_v7 = vpop.permute.xlu1 %1152  ;;  %1540 = vmatpush1.bf16.msra.mxu0 %v1392_v55  ;;  %v832_v57 = vpop.permute.xlu0 %831 }
 0x1b4   : > { %v1212_v14 = vmul.f32 %v6847_v18, %v1153_v7  ;;  %1541 = vmatprep.subr.bf16.mxu0 %v6491_v0  ;;  %5390 = vmatpush3.bf16.msra.mxu1 %v6084_v47 }
 0x1b6   : > { %v1232_v17 = vadd.f32 %v1212_v14, %v1064_v46 }
 0x1b7   : > { %v6985_v19 = vpop.permute.xlu1 %520  ;;  %v1158_v54 = vpop.permute.xlu0 %1157 }
 0x1b8   : > { %v1259_v59 = vadd.f32 %v6855_v29, %v1232_v17  ;;  %v1213_v22 = vmul.f32 %v6847_v18, %v1158_v54  ;;  %v564_v12 = vmul.f32 %v6823_v60, %v6985_v19 }
 0x1ba   : > { %v1279_v25 = vmax.f32 %v1259_v59, 0.0  ;;  %v1233_v27 = vadd.f32 %v1213_v22, %v1065_v8 }
 0x1bb   : > { %v669_v20 = vpop.permute.xlu1 %668  ;;  %v6989_v26 = vpop.permute.xlu0 %525 }
 0x1bc   : > { %v1330_v13 = vrot.slane %v1279_v25, 1  ;;  %v1260_v28 = vadd.f32 %v6855_v29, %v1233_v27 }
 0x1be   : > { %v1280_v6 = vmax.f32 %v1260_v28, 0.0  ;;  %v1331_v23 = vsel %vm1308_vm0, %v1328_v4, %v1330_v13  ;;  %v879_v4 = vmul.f32 %v6825_v61, %v832_v57 }
 0x1bf   : > { %v995_v30 = vpop.permute.xlu1 %994  ;;  %v6992_v31 = vpop.permute.xlu0 %673  ;;  %v1378_v41 = vmax.f32 %v1278_v63, %v1331_v23 }
 0x1c0   : > { %v1332_v32 = vrot.slane %v1280_v6, 1  ;;  %v1046_v2 = vmul.f32 %v6829_v3, %v995_v30  ;;  %v899_v35 = vadd.f32 %v879_v4, %v731_v1 }
 0x1c2   : > { %v1333_v33 = vsel %vm1308_vm0, %v1330_v13, %v1332_v32  ;;  %v1066_v63 = vadd.f32 %v1046_v2, %v898_v43  ;;  %v712_v13 = vmul.f32 %v6817_v58, %v669_v20  ;;  %v565_v20 = vmul.f32 %v6823_v60, %v6989_v26 }
 0x1c3   : > { %v837_v21 = vpop.permute.xlu1 %836  ;;  %v1000_v34 = vpop.permute.xlu0 %999  ;;  %v1379_v44 = vmax.f32 %v1279_v25, %v1333_v33 }
 0x1c4   : > { %v1047_v9 = vmul.f32 %v6829_v3, %v1000_v34  ;;  %v880_v23 = vmul.f32 %v6825_v61, %v837_v21  ;;  %v732_v40 = vadd.f32 %v712_v13, %v564_v12 }
 0x1c5   : > { %v1393_v42 = vpack.c.bf16 %v1379_v44, %v1378_v41 }
 0x1c6   : > { %v1067_v55 = vadd.f32 %v1047_v9, %v899_v35  ;;  %v900_v34 = vadd.f32 %v880_v23, %v732_v40 }
 0x1c7   : > { %v1163_v39 = vpop.permute.xlu1 %1162  ;;  %1542 = vmatpush1.bf16.msra.mxu0 %v1393_v42  ;;  %v842_v5 = vpop.permute.xlu0 %841 }
 0x1c8   : > { %v1214_v36 = vmul.f32 %v6847_v18, %v1163_v39  ;;  %1543 = vmatprep.subr.bf16.mxu0 %v6491_v0  ;;  %v881_v41 = vmul.f32 %v6825_v61, %v842_v5 }
 0x1ca   : > { %v1234_v24 = vadd.f32 %v1214_v36, %v1066_v63 }
 0x1cb   : > { %v531_v11 = vpop.permute.xlu1 %530  ;;  %v1168_v51 = vpop.permute.xlu0 %1167 }
 0x1cc   : > { %v1261_v10 = vadd.f32 %v6855_v29, %v1234_v24  ;;  %v1215_v50 = vmul.f32 %v6847_v18, %v1168_v51  ;;  %v566_v5 = vmul.f32 %v6823_v60, %v531_v11 }
 0x1ce   : > { %v1281_v62 = vmax.f32 %v1261_v10, 0.0  ;;  %v1235_v7 = vadd.f32 %v1215_v50, %v1067_v55 }
 0x1cf   : > { %v679_v57 = vpop.permute.xlu1 %678  ;;  %v536_v15 = vpop.permute.xlu0 %535 }
 0x1d0   : > { %v1334_v46 = vrot.slane %v1281_v62, 1  ;;  %v7009_v16 = vadd.f32 %v6855_v29, %v1235_v7  ;;  %v714_v4 = vmul.f32 %v6817_v58, %v679_v57 }
 0x1d2   : > { %v1282_v14 = vmax.f32 %v7009_v16, 0.0  ;;  %v1335_v8 = vsel %vm1308_vm0, %v1332_v32, %v1334_v46  ;;  %v734_v9 = vadd.f32 %v714_v4, %v566_v5 }
 0x1d3   : > { %v1005_v52 = vpop.permute.xlu1 %1004  ;;  %v684_v54 = vpop.permute.xlu0 %683  ;;  %v1380_v25 = vmax.f32 %v1280_v6, %v1335_v8  ;;  %v713_v6 = vmul.f32 %v6817_v58, %v6992_v31 }
 0x1d4   : > { %v1336_v17 = vrot.slane %v1282_v14, 1  ;;  %v1048_v33 = vmul.f32 %v6829_v3, %v1005_v52  ;;  %v715_v47 = vmul.f32 %v6817_v58, %v684_v54 }
 0x1d5   : > { %v733_v56 = vadd.f32 %v713_v6, %v565_v20 }
 0x1d6   : > { %v1337_v59 = vsel %vm1308_vm0, %v1334_v46, %v1336_v17  ;;  %v1068_v44 = vadd.f32 %v1048_v33, %v900_v34 }
 0x1d7   : > { %v541_v22 = vpop.permute.xlu1 %540  ;;  %v1381_v27 = vmax.f32 %v1281_v62, %v1337_v59  ;;  %v1010_v28 = vpop.permute.xlu0 %1009  ;;  %v901_v48 = vadd.f32 %v881_v41, %v733_v56  ;;  %v567_v62 = vmul.f32 %v6823_v60, %v536_v15 }
 0x1d8   : > { %v1049_v2 = vmul.f32 %v6829_v3, %v1010_v28  ;;  %v568_v10 = vmul.f32 %v6823_v60, %v541_v22 }
 0x1d9   : > { %v1394_v30 = vpack.c.bf16 %v1381_v27, %v1380_v25  ;;  %v735_v25 = vadd.f32 %v715_v47, %v567_v62  ;;  %v6068_v47 = vld [vmem:[#allocation11 + $0x40] ss:$8 sps:$4 sm:$0xff]   ;;  %v6077_v62 = vld [vmem:[#allocation11 + $0x70] ss:$8 sps:$4 sm:$0xff]  }
 0x1da   : > { %v1069_v53 = vadd.f32 %v1049_v2, %v901_v48 }
 0x1db   : > { %v847_v38 = vpop.permute.xlu1 %846  ;;  %1544 = vmatpush1.bf16.msra.mxu0 %v1394_v30  ;;  %v689_v32 = vpop.permute.xlu0 %688 }
 0x1dc   : > { %1545 = vmatprep.subr.bf16.mxu0 %v6491_v0  ;;  %v882_v45 = vmul.f32 %v6825_v61, %v847_v38  ;;  %v716_v36 = vmul.f32 %v6817_v58, %v689_v32 }
 0x1de   : > { %v902_v50 = vadd.f32 %v882_v45, %v734_v9  ;;  %v736_v52 = vadd.f32 %v716_v36, %v568_v10  ;;  %v6060_v9 = vld [vmem:[#allocation11 + $0x24] ss:$8 sps:$4 sm:$0xff]   ;;  %v6062_v36 = vld [vmem:[#allocation11 + $0x20] ss:$8 sps:$4 sm:$0xff]  }
 0x1df   : > { %v1173_v19 = vpop.permute.xlu1 %1172  ;;  %v852_v49 = vpop.permute.xlu0 %851  ;;  %v6072_v10 = vld [vmem:[#allocation11 + $0x64] ss:$8 sps:$4 sm:$0xff]  }
 0x1e0   : > { %v1216_v21 = vmul.f32 %v6847_v18, %v1173_v19  ;;  %v883_v7 = vmul.f32 %v6825_v61, %v852_v49 }
 0x1e2   : > { %v1236_v42 = vadd.f32 %v1216_v21, %v1068_v44  ;;  %v903_v60 = vadd.f32 %v883_v7, %v735_v25  ;;  %v6078_v7 = vld [vmem:[#allocation11 + $0x84] ss:$8 sps:$4 sm:$0xff]  }
 0x1e3   : > { %v857_v43 = vpop.permute.xlu1 %856  ;;  %v6091_v25 = vld [vmem:[#allocation8 + $0x68] sm:$0xff]  }
 0x1e4   : > { %v1263_v31 = vadd.f32 %v6855_v29, %v1236_v42  ;;  %v1178_v39 = vpop.permute.xlu0 %1177  ;;  %v884_v11 = vmul.f32 %v6825_v61, %v857_v43 }
 0x1e5   : > { %v1217_v26 = vmul.f32 %v6847_v18, %v1178_v39  ;;  %v6492_v39 = vmov 65535  }
 0x1e6   : > { %v1283_v37 = vmax.f32 %v1263_v31, 0.0  ;;  %v904_v28 = vadd.f32 %v884_v11, %v736_v52  ;;  %v6075_v11 = vld [vmem:[#allocation11 + $0x74] ss:$8 sps:$4 sm:$0xff]   ;;  %v6086_v52 = vld [vmem:[#allocation8 + $0x10] sm:$0xff]  }
 0x1e7   : > { %v1237_v1 = vadd.f32 %v1217_v26, %v1069_v53  ;;  %v1020_v63 = vpop.permute.xlu1 %1019 }
 0x1e8   : > { %v1338_v35 = vrot.slane %v1283_v37, 1  ;;  %v1015_v24 = vpop.permute.xlu0 %1014  ;;  %v1051_v22 = vmul.f32 %v6829_v3, %v1020_v63  ;;  %v6059_v63 = vld [vmem:[#allocation11 + $0x10] ss:$8 sps:$4 sm:$0xff]  }
 0x1e9   : > { %v1264_v51 = vadd.f32 %v6855_v29, %v1237_v1  ;;  %v1050_v55 = vmul.f32 %v6829_v3, %v1015_v24  ;;  %v6057_v1 = vld [vmem:[#allocation11 + $0x14] ss:$8 sps:$4 sm:$0xff]   ;;  %v6065_v24 = vld [vmem:[#allocation11 + $0x30] ss:$8 sps:$4 sm:$0xff]  }
 0x1ea   : > { %v1339_v54 = vsel %vm1308_vm0, %v1336_v17, %v1338_v35  ;;  %v1071_v32 = vadd.f32 %v1051_v22, %v903_v60  ;;  %v6093_v22 = vld [vmem:[#allocation8 + $0x28] sm:$0xff]   ;;  %v6097_v60 = vld [vmem:[#allocation8 + $0x78] sm:$0xff]  }
 0x1eb   : > { %v1284_v57 = vmax.f32 %v1264_v51, 0.0  ;;  %v1183_v46 = vpop.permute.xlu1 %1182  ;;  %v1070_v8 = vadd.f32 %v1050_v55, %v902_v50  ;;  %v1382_v12 = vmax.f32 %v1282_v14, %v1339_v54  ;;  %v6069_v51 = vld [vmem:[#allocation11 + $0x54] ss:$8 sps:$4 sm:$0xff]   ;;  %v6071_v55 = vld [vmem:[#allocation11 + $0x50] ss:$8 sps:$4 sm:$0xff]  }
 0x1ec   : > { %v1218_v59 = vmul.f32 %v6847_v18, %v1183_v46  ;;  %v1025_v58 = vpop.permute.xlu0 %1024  ;;  %v6074_v50 = vld [vmem:[#allocation11 + $0x60] ss:$8 sps:$4 sm:$0xff]  }
 0x1ed   : > { %v1340_v27 = vrot.slane %v1284_v57, 1  ;;  %v1052_v13 = vmul.f32 %v6829_v3, %v1025_v58  ;;  %v6085_v46 = vld [vmem:[#allocation8 + $0x50] sm:$0xff]   ;;  %v6089_v58 = vld [vmem:[#allocation8 + $0x60] sm:$0xff]  }
 0x1ee   : > { %v1238_v30 = vadd.f32 %v1218_v59, %v1070_v8  ;;  %5391 = vmatprep.subr.bf16.mxu1 %v6085_v46  ;;  %v6087_v8 = vld [vmem:[#allocation8 + $0x58] sm:$0xff]   ;;  %v6090_v54 = vld [vmem:[#allocation8 + $0x20] sm:$0xff]  }
 0x1ef   : > { %v1193_v15 = vpop.permute.xlu1 %1192  ;;  %v1341_v61 = vsel %vm1308_vm0, %v1338_v35, %v1340_v27  ;;  %v1072_v38 = vadd.f32 %v1052_v13, %v904_v28  ;;  %v6063_v35 = vld [vmem:[#allocation11 + $0x34] ss:$8 sps:$4 sm:$0xff]   ;;  %5392 = vmatpush3.bf16.msra.mxu1 %v6086_v52  ;;  %v6094_v13 = vld [vmem:[#allocation8 + $0x70] sm:$0xff]   ;;  %v6095_v28 = vld [vmem:[#allocation8 + $0x108] sm:$0xff]  }
 0x1f0   : > { %v1265_v23 = vadd.f32 %v6855_v29, %v1238_v30  ;;  %v1220_v17 = vmul.f32 %v6847_v18, %v1193_v15  ;;  %v1188_v40 = vpop.permute.xlu0 %1187  ;;  %v1383_v33 = vmax.f32 %v1283_v37, %v1341_v61  ;;  %v6054_v37 = vld [vmem:[#allocation11] ss:$8 sps:$4 sm:$0xff]   ;;  %v6088_v59 = vld [vmem:[#allocation8 + $0x18] sm:$0xff]   ;;  %5393 = vmatprep.subr.bf16.mxu1 %v6087_v8 }
 0x1f1   : > { %v1219_v6 = vmul.f32 %v6847_v18, %v1188_v40  ;;  %v6096_v30 = vld [vmem:[#allocation8 + $0x30] sm:$0xff]   ;;  %v6099_v61 = vld [vmem:[#allocation8 + $0x38] sm:$0xff]  }
 0x1f2   : > { %v1285_v3 = vmax.f32 %v1265_v23, 0.0  ;;  %v1240_v34 = vadd.f32 %v1220_v17, %v1072_v38  ;;  %v1395_v20 = vpack.c.bf16 %v1383_v33, %v1382_v12  ;;  %v6098_v15 = vld [vmem:[#allocation8 + $0x110] sm:$0xff]   ;;  %v6100_v12 = vld [vmem:[#allocation8 + $0x118] sm:$0xff]   ;;  %v6101_v23 = vld [vmem:[#allocation8 + $0x120] sm:$0xff]  }
 0x1f3   : > { %v1239_v41 = vadd.f32 %v1219_v6, %v1071_v32  ;;  %5394 = vmatpush3.bf16.msra.mxu1 %v6088_v59  ;;  %v6103_v38 = vld [vmem:[#allocation8 + $0x128] sm:$0xff]   ;;  %v6105_v17 = vld [vmem:[#allocation8 + $0x130] sm:$0xff]   ;;  %v6108_v40 = vld [vmem:[#allocation8 + $0x138] sm:$0xff]  }
 0x1f4   : > { %v1267_v19 = vadd.f32 %v6855_v29, %v1240_v34  ;;  %1546 = vmatpush1.bf16.msra.mxu0 %v1395_v20  ;;  %v1342_v44 = vrot.slane %v1285_v3, 1  ;;  %5395 = vmatprep.subr.bf16.mxu1 %v6089_v58  ;;  %v6102_v33 = vld [vmem:[#allocation8 + $0xc0] sm:$0xff]   ;;  %v6116_v59 = vld [vmem:[#allocation8 + $0xa8] sm:$0xff]  }
 0x1f5   : > { %v1266_v16 = vadd.f32 %v6855_v29, %v1239_v41  ;;  %1547 = vmatprep.subr.bf16.mxu0 %v6491_v0  ;;  %v1526_v29 = vsel %vm1308_vm0, 4294967295, %v6492_v39 }
 0x1f6   : > { %v1287_v14 = vmax.f32 %v1267_v19, 0.0  ;;  %v1343_v2 = vsel %vm1308_vm0, %v1340_v27, %v1342_v44  ;;  %v7060_v5 = vsel %vm1525_vm2, %v1526_v29, 0  ;;  %v6092_v27 = vld [vmem:[#allocation8 + $0x100] sm:$0xff]  }
 0x1f7   : > { %v1286_v21 = vmax.f32 %v1266_v16, 0.0  ;;  %v1384_v4 = vmax.f32 %v1284_v57, %v1343_v2  ;;  %v6080_v57 = vld [vmem:[#allocation11 + $0x80] ss:$8 sps:$4 sm:$0xff]   ;;  %5396 = vmatpush3.bf16.msra.mxu1 %v6090_v54 }
 0x1f8   : > { %v1346_v49 = vrot.slane %v1287_v14, 1  ;;  %5397 = vmatprep.subr.bf16.mxu1 %v6091_v25  ;;  %v6104_v2 = vld [vmem:[#allocation8 + $0x80] sm:$0xff]   ;;  %v6117_v25 = vld [vmem:[#allocation8 + $0xf0] sm:$0xff]  }
 0x1f9   : > { %v1344_v56 = vrot.slane %v1286_v21, 1 }
 0x1fa   : > { %v1387_v42 = vmax.f32 %v1287_v14, %v1346_v49 }
 0x1fb   : > { %v1347_v18 = vsel %vm1308_vm0, %v1344_v56, %v1346_v49  ;;  %v1345_v48 = vsel %vm1308_vm0, %v1342_v44, %v1344_v56  ;;  %5398 = vmatpush3.bf16.msra.mxu1 %v6093_v22 }
 0x1fc   : > { %v1386_v43 = vmax.f32 %v1286_v21, %v1347_v18  ;;  %v1385_v31 = vmax.f32 %v1285_v3, %v1345_v48  ;;  %5399 = vmatprep.subr.bf16.mxu1 %v6094_v13  ;;  %v6106_v18 = vld [vmem:[#allocation8 + $0xc8] sm:$0xff]  }
 0x1fe   : > { %v1396_v53 = vpack.c.bf16 %v1385_v31, %v1384_v4  ;;  %v1397_v26 = vpack.c.bf16 %v1387_v42, %v1386_v43  ;;  %v6107_v31 = vld [vmem:[#allocation8 + $0x88] sm:$0xff]  }
 0x1ff   : > { %5400 = vmatpush3.bf16.msra.mxu1 %v6096_v30  ;;  %v6118_v30 = vld [vmem:[#allocation8 + $0xb0] sm:$0xff]  }
 0x200   : > { %1548 = vmatpush1.bf16.msra.mxu0 %v1396_v53  ;;  %v1529_v45 = vand.u32 %v7060_v5, %v1397_v26  ;;  %5401 = vmatprep.subr.bf16.mxu1 %v6097_v60  ;;  %v6109_v26 = vld [vmem:[#allocation8 + $0xd0] sm:$0xff]  }
 0x201   : > { %1549 = vmatprep.subr.bf16.mxu0 %v6491_v0  ;;  %v6066_v0 = vld [vmem:[#allocation11 + $0x44] ss:$8 sps:$4 sm:$0xff]  }
 0x203   : > { %5402 = vmatpush3.bf16.msra.mxu1 %v6099_v61 }
 0x204   : > { %1550 = vmatpush1.bf16.msra.mxu0 %v1529_v45  ;;  %5439 = vmatprep.subr.bf16.mxu1 %v6102_v33 }
 0x205   : > { %5788 = vmatprep.subr.bf16.mxu0 %v6092_v27 }
 0x207   : > { %1564 = vmatmul.mubr.bf16.vlgmr.msra.gmra.mrb[0].mxu0 %v6054_v37  ;;  %v6110_v37 = vld [vmem:[#allocation8 + $0x90] sm:$0xff]  }
 0x208   : > { %5067 = vmatprep.mubr.msk.bf16.mxu0 %vm1497_vm1, %v6057_v1  ;;  %5789 = vmatpush3.bf16.msra.mxu0 %v6092_v27 }
 0x209   : > { %5790 = vmatprep.subr.bf16.mxu0 %v6095_v28 }
 0x20c   : > { %5791 = vmatpush3.bf16.msra.mxu0 %v6095_v28 }
 0x20d   : > { %5792 = vmatprep.subr.bf16.mxu0 %v6098_v15 }
 0x20f   : > { %1572 = vmatmul.mubr.bf16.gmra.mrb[4].mxu0 %v6059_v63  ;;  %v6111_v63 = vld [vmem:[#allocation8 + $0xd8] sm:$0xff]  }
 0x210   : > { %5068 = vmatprep.mubr.msk.bf16.mxu0 %vm1497_vm1, %v6060_v9  ;;  %5793 = vmatpush3.bf16.msra.mxu0 %v6098_v15  ;;  %v6119_v15 = vld [vmem:[#allocation8 + $0xf8] sm:$0xff]  }
 0x211   : > { %5794 = vmatprep.subr.bf16.mxu0 %v6100_v12 }
 0x214   : > { %5795 = vmatpush3.bf16.msra.mxu0 %v6100_v12 }
 0x215   : > { %5796 = vmatprep.subr.bf16.mxu0 %v6101_v23 }
 0x217   : > { %1580 = vmatmul.mubr.bf16.gmra.mrb[8].mxu0 %v6062_v36 }
 0x218   : > { %5069 = vmatprep.mubr.msk.bf16.mxu0 %vm1497_vm1, %v6063_v35  ;;  %5797 = vmatpush3.bf16.msra.mxu0 %v6101_v23 }
 0x219   : > { %5798 = vmatprep.subr.bf16.mxu0 %v6103_v38 }
 0x21c   : > { %5799 = vmatpush3.bf16.msra.mxu0 %v6103_v38 }
 0x21d   : > { %5800 = vmatprep.subr.bf16.mxu0 %v6105_v17 }
 0x21f   : > { %1588 = vmatmul.mubr.bf16.gmra.mrb[12].mxu0 %v6065_v24  ;;  %v6112_v24 = vld [vmem:[#allocation8 + $0x98] sm:$0xff]  }
 0x220   : > { %5070 = vmatprep.mubr.msk.bf16.mxu0 %vm1497_vm1, %v6066_v0  ;;  %5801 = vmatpush3.bf16.msra.mxu0 %v6105_v17 }
 0x221   : > { %5802 = vmatprep.subr.bf16.mxu0 %v6108_v40 }
 0x224   : > { %5803 = vmatpush3.bf16.msra.mxu0 %v6108_v40  ;;  %v6120_v40 = vld [vmem:[#allocation8 + $0xb8] sm:$0xff]  }
 0x227   : > { %1596 = vmatmul.mubr.bf16.gmra.mrb[16].mxu0 %v6068_v47 }
 0x228   : > { %5071 = vmatprep.mubr.msk.bf16.mxu0 %vm1497_vm1, %v6069_v51  ;;  %v6113_v51 = vld [vmem:[#allocation8 + $0xe0] sm:$0xff]  }
 0x22f   : > { %1604 = vmatmul.mubr.bf16.gmra.mrb[20].mxu0 %v6071_v55 }
 0x230   : > { %5072 = vmatprep.mubr.msk.bf16.mxu0 %vm1497_vm1, %v6072_v10 }
 0x237   : > { %1612 = vmatmul.mubr.bf16.gmra.mrb[24].mxu0 %v6074_v50 }
 0x238   : > { %5073 = vmatprep.mubr.msk.bf16.mxu0 %vm1497_vm1, %v6075_v11  ;;  %v6114_v11 = vld [vmem:[#allocation8 + $0xa0] sm:$0xff]  }
 0x23f   : > { %1620 = vmatmul.mubr.bf16.gmra.mrb[28].mxu0 %v6077_v62 }
 0x240   : > { %5074 = vmatprep.mubr.msk.bf16.mxu0 %vm1497_vm1, %v6078_v7  ;;  %v6115_v7 = vld [vmem:[#allocation8 + $0xe8] sm:$0xff]  }
 0x247   : > { %1628 = vmatmul.mubr.bf16.gmra.mrb[32].mxu0 %v6080_v57 }
 0x2da   : > { %v1565_v32 = vpop.f32.mrb[0].mxu0 }
 0x2db   : > { %v1567_v6 = vpop.f32.mrb[1].mxu0 }
 0x2dc   : > { %v1568_v3 = vpop.f32.mrb[2].mxu0 }
 0x2dd   : > { %v1636_v34 = vpack.c.bf16 %v1568_v3, %v1565_v32  ;;  %v1570_v20 = vpop.f32.mrb[3].mxu0 }
 0x2df   : > { %1645 = vst [vmem:[#allocation2] sm:$0xff] %v1636_v34 }
 0x2e2   : > { %v1573_v41 = vpop.f32.mrb[4].mxu0 }
 0x2e3   : > { %v1575_v19 = vpop.f32.mrb[5].mxu0 }
 0x2e4   : > { %v1576_v44 = vpop.f32.mrb[6].mxu0 }
 0x2e5   : > { %v1637_v16 = vpack.c.bf16 %v1576_v44, %v1573_v41  ;;  %v1578_v14 = vpop.f32.mrb[7].mxu0 }
 0x2e6   : > { %v1660_v21 = vld [vmem:[#allocation2] sm:$0xc0] }
 0x2e7   : > { %1646 = vst [vmem:[#allocation2 + $0x8] sm:$0xff] %v1637_v16  ;;  %v1681_v49 = vrot.slane %v1660_v21, 6  ;;  %v1682_v56 = vrot.slane %v1637_v16, 6 }
 0x2e9   : > { %v1683_v42 = vsel %vm1680_vm3, %v1681_v49, %v1682_v56 }
 0x2ea   : > { %v1581_v48 = vpop.f32.mrb[8].mxu0  ;;  %2110 = vmatprep.mubr.bf16.mxu1 %v1683_v42 }
 0x2eb   : > { %v1583_v43 = vpop.f32.mrb[9].mxu0  ;;  %2111 = vmatmul.mubr.bf16.vlgmr.msra.gmra.mrb[0].mxu1 %v1636_v34 }
 0x2ec   : > { %v1584_v4 = vpop.f32.mrb[10].mxu0  ;;  %5440 = vmatpush3.bf16.msra.mxu1 %v6104_v2 }
 0x2ed   : > { %v7073_v29 = vpack.c.bf16 %v1584_v4, %v1581_v48  ;;  %v1586_v53 = vpop.f32.mrb[11].mxu0  ;;  %5441 = vmatprep.subr.bf16.mxu1 %v6106_v18 }
 0x2ef   : > { %1647 = vst [vmem:[#allocation2 + $0x10] sm:$0xff] %v7073_v29  ;;  %v1684_v45 = vrot.slane %v7073_v29, 6  ;;  %v1705_v10 = vrot.slane %v7073_v29, 4 }
 0x2f0   : > { %5442 = vmatpush3.bf16.msra.mxu1 %v6107_v31 }
 0x2f1   : > { %v1685_v1 = vsel %vm1680_vm3, %v1682_v56, %v1684_v45  ;;  %5443 = vmatprep.subr.bf16.mxu1 %v6109_v26 }
 0x2f2   : > { %v1589_v9 = vpop.f32.mrb[12].mxu0  ;;  %2118 = vmatprep.mubr.bf16.mxu1 %v1685_v1 }
 0x2f3   : > { %v1591_v36 = vpop.f32.mrb[13].mxu0  ;;  %2119 = vmatmul.mubr.bf16.gmra.mrb[4].mxu1 %v1637_v16 }
 0x2f4   : > { %v1592_v35 = vpop.f32.mrb[14].mxu0  ;;  %5444 = vmatpush3.bf16.msra.mxu1 %v6110_v37 }
 0x2f5   : > { %v7078_v0 = vpack.c.bf16 %v1592_v35, %v1589_v9  ;;  %v1594_v47 = vpop.f32.mrb[15].mxu0  ;;  %5445 = vmatprep.subr.bf16.mxu1 %v6111_v63 }
 0x2f6   : > { %v1665_v31 = vld [vmem:[#allocation2 + $0x10] sm:$0xfc] }
 0x2f7   : > { %5804 = vmatprep.mubr.bf16.mxu0 %v7078_v0  ;;  %v1686_v55 = vrot.slane %v7078_v0, 6  ;;  %v1707_v50 = vrot.slane %v7078_v0, 4  ;;  %v1732_v27 = vrot.slane %v7078_v0, 2  ;;  %v1731_v1 = vrot.slane %v1665_v31, 2 }
 0x2f8   : > { %5446 = vmatpush3.bf16.msra.mxu1 %v6112_v24 }
 0x2f9   : > { %v1687_v62 = vsel %vm1680_vm3, %v1684_v45, %v1686_v55  ;;  %5447 = vmatprep.subr.bf16.mxu1 %v6113_v51  ;;  %v7088_v57 = vsel %vm1703_vm4, %v1705_v10, %v1707_v50  ;;  %v1733_v24 = vsel %vm1730_vm5, %v1731_v1, %v1732_v27 }
 0x2fa   : > { %v1597_v46 = vpop.f32.mrb[16].mxu0  ;;  %2126 = vmatprep.mubr.bf16.mxu1 %v1687_v62 }
 0x2fb   : > { %v1599_v52 = vpop.f32.mrb[17].mxu0  ;;  %2127 = vmatmul.mubr.bf16.gmra.mrb[8].mxu1 %v7073_v29 }
 0x2fc   : > { %v1600_v8 = vpop.f32.mrb[18].mxu0  ;;  %5448 = vmatpush3.bf16.msra.mxu1 %v6114_v11 }
 0x2fd   : > { %v1640_v58 = vpack.c.bf16 %v1600_v8, %v1597_v46  ;;  %v1602_v54 = vpop.f32.mrb[19].mxu0  ;;  %5449 = vmatprep.subr.bf16.mxu1 %v6115_v7 }
 0x2ff   : > { %5805 = vmatmul.mubr.bf16.vlgmr.msra.gmra.mrb[36].mxu0 %v1640_v58  ;;  %v1688_v22 = vrot.slane %v1640_v58, 6  ;;  %v1734_v13 = vrot.slane %v1640_v58, 2  ;;  %v1709_v28 = vrot.slane %v1640_v58, 4 }
 0x300   : > { %5450 = vmatpush3.bf16.msra.mxu1 %v6116_v59  ;;  %v6121_v59 = vld [vmem:[#allocation13] sm:$0xff]  }
 0x301   : > { %v1689_v60 = vsel %vm1680_vm3, %v1686_v55, %v1688_v22  ;;  %5451 = vmatprep.subr.bf16.mxu1 %v6117_v25  ;;  %v1735_v61 = vsel %vm1730_vm5, %v1732_v27, %v1734_v13  ;;  %v7095_v12 = vsel %vm1703_vm4, %v1707_v50, %v1709_v28 }
 0x302   : > { %v1605_v23 = vpop.f32.mrb[20].mxu0  ;;  %2134 = vmatprep.mubr.bf16.mxu1 %v1689_v60  ;;  %v6128_v60 = vld [vmem:[#allocation8 + $0x140] sm:$0xff]  }
 0x303   : > { %v1607_v38 = vpop.f32.mrb[21].mxu0  ;;  %2135 = vmatmul.mubr.bf16.gmra.mrb[12].mxu1 %v7078_v0  ;;  %v1662_v0 = vld [vmem:[#allocation2 + $0x8] sm:$0xf0] }
 0x304   : > { %v1608_v17 = vpop.f32.mrb[22].mxu0  ;;  %5452 = vmatpush3.bf16.msra.mxu1 %v6118_v30  ;;  %v1704_v11 = vrot.slane %v1662_v0, 4  ;;  %v6127_v30 = vld [vmem:[#allocation8 + $0x180] sm:$0xff]  }
 0x305   : > { %v1641_v33 = vpack.c.bf16 %v1608_v17, %v1605_v23  ;;  %v1610_v32 = vpop.f32.mrb[23].mxu0  ;;  %5453 = vmatprep.subr.bf16.mxu1 %v6119_v15  ;;  %v6129_v15 = vld [vmem:[#allocation8 + $0x188] sm:$0xff]   ;;  %5517 = vmatprep.subr.bf16.mxu0 %v6127_v30 }
 0x306   : > { %v1706_v62 = vsel %vm1703_vm4, %v1704_v11, %v1705_v10  ;;  %5518 = vmatpush3.bf16.msra.mxu0 %v6128_v60  ;;  %v6130_v17 = vld [vmem:[#allocation8 + $0x148] sm:$0xff]   ;;  %v6133_v32 = vld [vmem:[#allocation8 + $0x150] sm:$0xff]  }
 0x307   : > { %v1736_v6 = vrot.slane %v1641_v33, 2  ;;  %5808 = vmatprep.mubr.bf16.mxu0 %v1641_v33  ;;  %v1690_v3 = vrot.slane %v1641_v33, 6  ;;  %v1711_v34 = vrot.slane %v1641_v33, 4  ;;  %5519 = vmatprep.subr.bf16.mxu0 %v6129_v15 }
 0x308   : > { %5454 = vmatpush3.bf16.msra.mxu1 %v6120_v40  ;;  %v6131_v40 = vld [vmem:[#allocation8 + $0x190] sm:$0xff]  }
 0x309   : > { %v1691_v20 = vsel %vm1680_vm3, %v1688_v22, %v1690_v3  ;;  %v1737_v41 = vsel %vm1730_vm5, %v1734_v13, %v1736_v6  ;;  %v1712_v19 = vsel %vm1703_vm4, %v1709_v28, %v1711_v34 }
 0x30a   : > { %v1613_v44 = vpop.f32.mrb[24].mxu0  ;;  %2142 = vmatprep.mubr.bf16.mxu1 %v1691_v20  ;;  %5520 = vmatpush3.bf16.msra.mxu0 %v6130_v17 }
 0x30b   : > { %v1615_v16 = vpop.f32.mrb[25].mxu0  ;;  %2143 = vmatmul.mubr.bf16.gmra.mrb[16].mxu1 %v1640_v58  ;;  %5521 = vmatprep.subr.bf16.mxu0 %v6131_v40 }
 0x30c   : > { %v1616_v14 = vpop.f32.mrb[26].mxu0  ;;  %v6137_v16 = vld [vmem:[#allocation8 + $0x158] sm:$0xff]  }
 0x30d   : > { %v1642_v21 = vpack.c.bf16 %v1616_v14, %v1613_v44  ;;  %v1618_v49 = vpop.f32.mrb[27].mxu0 }
 0x30e   : > { %5522 = vmatpush3.bf16.msra.mxu0 %v6133_v32 }
 0x30f   : > { %1651 = vst [vmem:[#allocation2 + $0x30] sm:$0xff] %v1642_v21  ;;  %v1738_v56 = vrot.slane %v1642_v21, 2  ;;  %5809 = vmatmul.mubr.bf16.gmra.mrb[40].mxu0 %v1642_v21  ;;  %v1713_v2 = vrot.slane %v1642_v21, 4 }
 0x311   : > { %v1739_v42 = vsel %vm1730_vm5, %v1736_v6, %v1738_v56  ;;  %v1714_v18 = vsel %vm1703_vm4, %v1711_v34, %v1713_v2 }
 0x312   : > { %v1621_v48 = vpop.f32.mrb[28].mxu0 }
 0x313   : > { %v1623_v43 = vpop.f32.mrb[29].mxu0 }
 0x314   : > { %v1624_v4 = vpop.f32.mrb[30].mxu0 }
 0x315   : > { %v1643_v53 = vpack.c.bf16 %v1624_v4, %v1621_v48  ;;  %v1626_v26 = vpop.f32.mrb[31].mxu0 }
 0x316   : > { %v1661_v45 = vld [vmem:[#allocation2 + $0x30] sm:$0x3f] }
 0x317   : > { %1652 = vst [vmem:[#allocation2 + $0x38] sm:$0xff] %v1643_v53  ;;  %v1692_v37 = vrot.slane %v1661_v45, 6  ;;  %v1740_v63 = vrot.slane %v1643_v53, 2  ;;  %5812 = vmatprep.mubr.bf16.mxu0 %v1643_v53 }
 0x319   : > { %v1693_v9 = vsel %vm1680_vm3, %v1690_v3, %v1692_v37  ;;  %v1741_v36 = vsel %vm1730_vm5, %v1738_v56, %v1740_v63  ;;  %v6135_v3 = vld [vmem:[#allocation8 + $0x198] sm:$0xff]  }
 0x31a   : > { %2150 = vmatprep.mubr.bf16.mxu1 %v1693_v9  ;;  %v1629_v35 = vpop.f32.mrb[32].mxu0  ;;  %5523 = vmatprep.subr.bf16.mxu0 %v6135_v3 }
 0x31b   : > { %2151 = vmatmul.mubr.bf16.gmra.mrb[20].mxu1 %v1641_v33  ;;  %v1631_v47 = vpop.f32.mrb[33].mxu0  ;;  %5524 = vmatpush3.bf16.msra.mxu0 %v6137_v16 }
 0x31c   : > { %2191 = vmatprep.mubr.bf16.mxu1 %v1733_v24  ;;  %v1632_v51 = vpop.f32.mrb[34].mxu0 }
 0x31d   : > { %v1644_v55 = vpack.c.bf16 %v1632_v51, %v1629_v35  ;;  %v1634_v50 = vpop.f32.mrb[35].mxu0 }
 0x31e   : > { %v1664_v8 = vld [vmem:[#allocation2 + $0x38] sm:$0xf] }
 0x31f   : > { %1653 = vst [vmem:[#allocation2 + $0x40] sm:$0xff] %v1644_v55  ;;  %5813 = vmatmul.mubr.bf16.gmra.mrb[44].mxu0 %v1644_v55  ;;  %v1715_v29 = vrot.slane %v1664_v8, 4 }
 0x321   : > { %v1716_v10 = vsel %vm1703_vm4, %v1713_v2, %v1715_v29 }
 0x323   : > { %2192 = vmatmul.mubr.bf16.vlgmr.msra.gmra.mrb[24].mxu1 %v1706_v62 }
 0x324   : > { %2199 = vmatprep.mubr.bf16.mxu1 %v1735_v61 }
 0x326   : > { %v1671_v7 = vld [vmem:[#allocation2 + $0x40] sm:$0x3] }
 0x327   : > { %v1742_v46 = vrot.slane %v1671_v7, 2  ;;  %v7150_v7 = vld [vmem:[#allocation10 + $0x1] ss:$0 sm:$0xff] }
 0x329   : > { %v1743_v52 = vsel %vm1730_vm5, %v1740_v63, %v1742_v46 }
 0x32b   : > { %2200 = vmatmul.mubr.bf16.gmra.mrb[28].mxu1 %v7088_v57 }
 0x32c   : > { %2207 = vmatprep.mubr.bf16.mxu1 %v1737_v41 }
 0x333   : > { %2208 = vmatmul.mubr.bf16.gmra.mrb[32].mxu1 %v7095_v12 }
 0x334   : > { %2215 = vmatprep.mubr.bf16.mxu1 %v1739_v42 }
 0x33b   : > { %2216 = vmatmul.mubr.bf16.gmra.mrb[36].mxu1 %v1712_v19 }
 0x33c   : > { %2223 = vmatprep.mubr.bf16.mxu1 %v1741_v36 }
 0x343   : > { %2224 = vmatmul.mubr.bf16.gmra.mrb[40].mxu1 %v1714_v18 }
 0x344   : > { %2231 = vmatprep.mubr.bf16.mxu1 %v1743_v52 }
 0x34b   : > { %2232 = vmatmul.mubr.bf16.gmra.mrb[44].mxu1 %v1716_v10 }
 0x34c   : > { %5828 = vmatprep.mubr.msk.bf16.mxu1 %vm2440_vm6, %v6121_v59 }
 0x3be   : > { %v5403_v57 = vpop.f32.mrb[0].mxu1 }
 0x3bf   : > { %v5404_v58 = vpop.f32.mrb[1].mxu1 }
 0x3c0   : > { %v7114_v54 = vadd.f32 %v5404_v58, %v5403_v57  ;;  %v5406_v25 = vpop.f32.mrb[2].mxu1 }
 0x3c1   : > { %v5407_v27 = vpop.f32.mrb[3].mxu1 }
 0x3c2   : > { %v7116_v22 = vadd.f32 %v5407_v27, %v5406_v25  ;;  %v2113_v29 = vadd.f32 %v7114_v54, %v7150_v7 }
 0x3c4   : > { %v2116_v58 = vadd.f32 %v7116_v22, %v7150_v7 }
 0x3c6   : > { %v5409_v13 = vpop.f32.mrb[4].mxu1 }
 0x3c7   : > { %v5410_v28 = vpop.f32.mrb[5].mxu1 }
 0x3c8   : > { %v7118_v61 = vadd.f32 %v5410_v28, %v5409_v13  ;;  %v5412_v12 = vpop.f32.mrb[6].mxu1 }
 0x3c9   : > { %v5413_v23 = vpop.f32.mrb[7].mxu1 }
 0x3ca   : > { %v7120_v38 = vadd.f32 %v5413_v23, %v5412_v12  ;;  %v2121_v23 = vadd.f32 %v7118_v61, %v7150_v7 }
 0x3ce   : > { %v5415_v33 = vpop.f32.mrb[8].mxu1 }
 0x3cf   : > { %v5416_v6 = vpop.f32.mrb[9].mxu1 }
 0x3d0   : > { %v7122_v34 = vadd.f32 %v5416_v6, %v5415_v33  ;;  %v5418_v20 = vpop.f32.mrb[10].mxu1  ;;  %v2124_v33 = vadd.f32 %v7120_v38, %v7150_v7 }
 0x3d1   : > { %v5419_v41 = vpop.f32.mrb[11].mxu1 }
 0x3d2   : > { %v7124_v19 = vadd.f32 %v5419_v41, %v5418_v20  ;;  %v5806_v44 = vpop.f32.mrb[36].mxu0 }
 0x3d3   : > { %v2274_v14 = vpop.f32.mrb[37].mxu0 }
 0x3d4   : > { %v5807_v21 = vpop.f32.mrb[38].mxu0 }
 0x3d5   : > { %v2277_v49 = vpop.f32.mrb[39].mxu0 }
 0x3d6   : > { %v5421_v56 = vpop.f32.mrb[12].mxu1 }
 0x3d7   : > { %v5422_v2 = vpop.f32.mrb[13].mxu1 }
 0x3d8   : > { %v7126_v42 = vadd.f32 %v5422_v2, %v5421_v56  ;;  %v5424_v18 = vpop.f32.mrb[14].mxu1 }
 0x3d9   : > { %v5425_v48 = vpop.f32.mrb[15].mxu1 }
 0x3da   : > { %v7128_v43 = vadd.f32 %v5425_v48, %v5424_v18  ;;  %v2129_v48 = vadd.f32 %v7122_v34, %v7150_v7 }
 0x3de   : > { %v5427_v4 = vpop.f32.mrb[16].mxu1 }
 0x3df   : > { %v5428_v31 = vpop.f32.mrb[17].mxu1 }
 0x3e0   : > { %v7130_v53 = vadd.f32 %v5428_v31, %v5427_v4  ;;  %v5430_v26 = vpop.f32.mrb[18].mxu1 }
 0x3e1   : > { %v5431_v45 = vpop.f32.mrb[19].mxu1 }
 0x3e2   : > { %v7132_v37 = vadd.f32 %v5431_v45, %v5430_v26  ;;  %v7134_v1 = vpop.f32.mrb[40].mxu0  ;;  %v2132_v45 = vadd.f32 %v7124_v19, %v7150_v7  ;;  %v2137_v19 = vadd.f32 %v7126_v42, %v7150_v7 }
 0x3e3   : > { %v2290_v63 = vpop.f32.mrb[41].mxu0 }
 0x3e4   : > { %v7136_v9 = vpop.f32.mrb[42].mxu0 }
 0x3e5   : > { %v7138_v36 = vpop.f32.mrb[43].mxu0 }
 0x3ee   : > { %v5433_v35 = vpop.f32.mrb[20].mxu1 }
 0x3ef   : > { %v5434_v24 = vpop.f32.mrb[21].mxu1 }
 0x3f0   : > { %v7140_v0 = vadd.f32 %v5434_v24, %v5433_v35  ;;  %v5436_v47 = vpop.f32.mrb[22].mxu1 }
 0x3f1   : > { %v5437_v51 = vpop.f32.mrb[23].mxu1 }
 0x3f2   : > { %v7142_v55 = vadd.f32 %v5437_v51, %v5436_v47  ;;  %v7144_v50 = vpop.f32.mrb[44].mxu0 }
 0x3f3   : > { %v7146_v11 = vpop.f32.mrb[45].mxu0 }
 0x3f4   : > { %v7148_v62 = vpop.f32.mrb[46].mxu0 }
 0x3f5   : > { %v7152_v46 = vpop.f32.mrb[47].mxu0 }
 0x3f6   : > { %v5455_v52 = vpop.f32.mrb[24].mxu1 }
 0x3f7   : > { %v5456_v8 = vpop.f32.mrb[25].mxu1 }
 0x3f8   : > { %v5457_v10 = vadd.f32 %v5456_v8, %v5455_v52  ;;  %v5458_v59 = vpop.f32.mrb[26].mxu1 }
 0x3f9   : > { %v5459_v57 = vpop.f32.mrb[27].mxu1 }
 0x3fa   : > { %v2194_v25 = vadd.f32 %v5457_v10, %v2113_v29  ;;  %v5460_v27 = vadd.f32 %v5459_v57, %v5458_v59 }
 0x3fc   : > { %v2275_v13 = vadd.f32 %v2274_v14, %v2194_v25  ;;  %v2197_v28 = vadd.f32 %v5460_v27, %v2116_v58 }
 0x3fe   : > { %v2321_v30 = vmax.f32 %v2275_v13, 0.0  ;;  %v2278_v60 = vadd.f32 %v2277_v49, %v2197_v28  ;;  %v5461_v15 = vpop.f32.mrb[28].mxu1 }
 0x3ff   : > { %v5462_v12 = vpop.f32.mrb[29].mxu1 }
 0x400   : > { %v2322_v17 = vmax.f32 %v2278_v60, 0.0  ;;  %v5463_v40 = vadd.f32 %v5462_v12, %v5461_v15  ;;  %v5464_v54 = vpop.f32.mrb[30].mxu1  ;;  %v2345_v6 = vrot.slane %v2321_v30, 1 }
 0x401   : > { %v5465_v32 = vpop.f32.mrb[31].mxu1 }
 0x402   : > { %v2346_v22 = vrot.slane %v2322_v17, 1  ;;  %v2202_v3 = vadd.f32 %v5463_v40, %v2121_v23  ;;  %v5466_v20 = vadd.f32 %v5465_v32, %v5464_v54 }
 0x404   : > { %v2283_v41 = vadd.f32 %v5806_v44, %v2202_v3  ;;  %v2205_v16 = vadd.f32 %v5466_v20, %v2124_v33  ;;  %v2347_v14 = vsel %vm1308_vm0, %v2345_v6, %v2346_v22 }
 0x405   : > { %v2380_v49 = vmax.f32 %v2321_v30, %v2347_v14 }
 0x406   : > { %v2323_v56 = vmax.f32 %v2283_v41, 0.0  ;;  %v2286_v2 = vadd.f32 %v5807_v21, %v2205_v16  ;;  %v5467_v18 = vpop.f32.mrb[32].mxu1 }
 0x407   : > { %v5468_v61 = vpop.f32.mrb[33].mxu1 }
 0x408   : > { %v2348_v4 = vrot.slane %v2323_v56, 1  ;;  %v2324_v31 = vmax.f32 %v2286_v2, 0.0  ;;  %v5469_v38 = vadd.f32 %v5468_v61, %v5467_v18  ;;  %v5470_v26 = vpop.f32.mrb[34].mxu1 }
 0x409   : > { %v5471_v35 = vpop.f32.mrb[35].mxu1 }
 0x40a   : > { %v2350_v44 = vrot.slane %v2324_v31, 1  ;;  %v2210_v24 = vadd.f32 %v5469_v38, %v2129_v48  ;;  %v5472_v47 = vadd.f32 %v5471_v35, %v5470_v26  ;;  %v2349_v51 = vsel %vm1308_vm0, %v2346_v22, %v2348_v4 }
 0x40b   : > { %v2381_v52 = vmax.f32 %v2322_v17, %v2349_v51 }
 0x40c   : > { %v2291_v21 = vadd.f32 %v2290_v63, %v2210_v24  ;;  %v2213_v8 = vadd.f32 %v5472_v47, %v2132_v45  ;;  %v2351_v29 = vsel %vm1308_vm0, %v2348_v4, %v2350_v44  ;;  %v2140_v63 = vadd.f32 %v7128_v43, %v7150_v7 }
 0x40d   : > { %v2392_v10 = vpack.c.bf16 %v2381_v52, %v2380_v49  ;;  %v2382_v34 = vmax.f32 %v2323_v56, %v2351_v29  ;;  %v2145_v43 = vadd.f32 %v7130_v53, %v7150_v7 }
 0x40e   : > { %v2325_v59 = vmax.f32 %v2291_v21, 0.0  ;;  %v2294_v57 = vadd.f32 %v7138_v36, %v2213_v8  ;;  %v5473_v58 = vpop.f32.mrb[36].mxu1 }
 0x40f   : > { %v5474_v25 = vpop.f32.mrb[37].mxu1  ;;  %5816 = vmatprep.subr.bf16.mxu1 %v2392_v10 }
 0x410   : > { %v2352_v27 = vrot.slane %v2325_v59, 1  ;;  %v2326_v13 = vmax.f32 %v2294_v57, 0.0  ;;  %v5475_v28 = vadd.f32 %v5474_v25, %v5473_v58  ;;  %v5476_v30 = vpop.f32.mrb[38].mxu1  ;;  %5817 = vmatpush3.bf16.msra.mxu1 %v2392_v10 }
 0x411   : > { %v5477_v60 = vpop.f32.mrb[39].mxu1 }
 0x412   : > { %v2354_v15 = vrot.slane %v2326_v13, 1  ;;  %v2218_v12 = vadd.f32 %v5475_v28, %v2137_v19  ;;  %v5478_v23 = vadd.f32 %v5477_v60, %v5476_v30  ;;  %v2353_v36 = vsel %vm1308_vm0, %v2350_v44, %v2352_v27 }
 0x413   : > { %v2383_v17 = vmax.f32 %v2324_v31, %v2353_v36 }
 0x414   : > { %v2299_v40 = vadd.f32 %v7134_v1, %v2218_v12  ;;  %v2221_v54 = vadd.f32 %v5478_v23, %v2140_v63  ;;  %v2355_v42 = vsel %vm1308_vm0, %v2352_v27, %v2354_v15  ;;  %v2148_v1 = vadd.f32 %v7132_v37, %v7150_v7 }
 0x415   : > { %v2393_v33 = vpack.c.bf16 %v2383_v17, %v2382_v34  ;;  %v2384_v32 = vmax.f32 %v2325_v59, %v2355_v42  ;;  %v2153_v37 = vadd.f32 %v7140_v0, %v7150_v7  ;;  %v6132_v17 = vld [vmem:[#allocation8 + $0x200] sm:$0xff]   ;;  %v6136_v42 = vld [vmem:[#allocation8 + $0x208] sm:$0xff]  }
 0x416   : > { %v2327_v6 = vmax.f32 %v2299_v40, 0.0  ;;  %v2302_v22 = vadd.f32 %v7136_v9, %v2221_v54  ;;  %v5479_v3 = vpop.f32.mrb[40].mxu1  ;;  %v6123_v40 = vld [vmem:[#allocation13 + $0x10] sm:$0xff]  }
 0x417   : > { %v5480_v20 = vpop.f32.mrb[41].mxu1  ;;  %5818 = vmatprep.subr.bf16.mxu1 %v2393_v33  ;;  %v6134_v54 = vld [vmem:[#allocation8 + $0x1c0] sm:$0xff]  }
 0x418   : > { %v2356_v41 = vrot.slane %v2327_v6, 1  ;;  %v2328_v16 = vmax.f32 %v2302_v22, 0.0  ;;  %v5481_v14 = vadd.f32 %v5480_v20, %v5479_v3  ;;  %v5482_v49 = vpop.f32.mrb[42].mxu1  ;;  %5819 = vmatpush3.bf16.msra.mxu1 %v2393_v33  ;;  %v6138_v33 = vld [vmem:[#allocation8 + $0x1c8] sm:$0xff]   ;;  %v6126_v22 = vld [vmem:[#allocation13 + $0x28] sm:$0xff]   ;;  %v6140_v3 = vld [vmem:[#allocation8 + $0x210] sm:$0xff]  }
 0x419   : > { %v5483_v56 = vpop.f32.mrb[43].mxu1  ;;  %v6142_v20 = vld [vmem:[#allocation8 + $0x1d0] sm:$0xff]  }
 0x41a   : > { %v2358_v2 = vrot.slane %v2328_v16, 1  ;;  %v2226_v18 = vadd.f32 %v5481_v14, %v2145_v43  ;;  %v5484_v61 = vadd.f32 %v5483_v56, %v5482_v49  ;;  %v2357_v9 = vsel %vm1308_vm0, %v2354_v15, %v2356_v41  ;;  %v6144_v43 = vld [vmem:[#allocation8 + $0x218] sm:$0xff]   ;;  %v6148_v14 = vld [vmem:[#allocation8 + $0x220] sm:$0xff]   ;;  %v6143_v56 = vld [vmem:[#allocation8 + $0x1a8] sm:$0xff]  }
 0x41b   : > { %v2385_v48 = vmax.f32 %v2326_v13, %v2357_v9  ;;  %v6141_v49 = vld [vmem:[#allocation8 + $0x160] sm:$0xff]   ;;  %v6147_v9 = vld [vmem:[#allocation8 + $0x1b0] sm:$0xff]  }
 0x41c   : > { %v2307_v4 = vadd.f32 %v7146_v11, %v2226_v18  ;;  %v2229_v31 = vadd.f32 %v5484_v61, %v2148_v1  ;;  %v2359_v53 = vsel %vm1308_vm0, %v2356_v41, %v2358_v2  ;;  %v2156_v11 = vadd.f32 %v7142_v55, %v7150_v7  ;;  %v6146_v41 = vld [vmem:[#allocation8 + $0x1d8] sm:$0xff]   ;;  %v6150_v1 = vld [vmem:[#allocation8 + $0x1e0] sm:$0xff]   ;;  %v6145_v18 = vld [vmem:[#allocation8 + $0x168] sm:$0xff]  }
 0x41d   : > { %v2394_v38 = vpack.c.bf16 %v2385_v48, %v2384_v32  ;;  %v2386_v26 = vmax.f32 %v2327_v6, %v2359_v53  ;;  %v6124_v32 = vld [vmem:[#allocation13 + $0x18] sm:$0xff]   ;;  %v6125_v6 = vld [vmem:[#allocation13 + $0x20] sm:$0xff]  }
 0x41e   : > { %v2329_v45 = vmax.f32 %v2307_v4, 0.0  ;;  %v2310_v35 = vadd.f32 %v7152_v46, %v2229_v31  ;;  %v5485_v44 = vpop.f32.mrb[44].mxu1  ;;  %v6154_v61 = vld [vmem:[#allocation8 + $0x1e8] sm:$0xff]   ;;  %v6155_v48 = vld [vmem:[#allocation8 + $0x230] sm:$0xff]   ;;  %v6151_v53 = vld [vmem:[#allocation8 + $0x1b8] sm:$0xff]  }
 0x41f   : > { %v5486_v24 = vpop.f32.mrb[45].mxu1  ;;  %5820 = vmatprep.subr.bf16.mxu1 %v2394_v38  ;;  %v6149_v4 = vld [vmem:[#allocation8 + $0x170] sm:$0xff]  }
 0x420   : > { %v2360_v47 = vrot.slane %v2329_v45, 1  ;;  %v2330_v51 = vmax.f32 %v2310_v35, 0.0  ;;  %v5487_v52 = vadd.f32 %v5486_v24, %v5485_v44  ;;  %v5488_v21 = vpop.f32.mrb[46].mxu1  ;;  %5821 = vmatpush3.bf16.msra.mxu1 %v2394_v38  ;;  %v6157_v31 = vld [vmem:[#allocation8 + $0x1f0] sm:$0xff]   ;;  %v6158_v38 = vld [vmem:[#allocation8 + $0x238] sm:$0xff]   ;;  %v6156_v35 = vld [vmem:[#allocation8 + $0x240] sm:$0xff]  }
 0x421   : > { %v5489_v8 = vpop.f32.mrb[47].mxu1 }
 0x422   : > { %v2362_v29 = vrot.slane %v2330_v51, 1  ;;  %v2234_v10 = vadd.f32 %v5487_v52, %v2153_v37  ;;  %v5490_v34 = vadd.f32 %v5489_v8, %v5488_v21  ;;  %v2361_v46 = vsel %vm1308_vm0, %v2358_v2, %v2360_v47  ;;  %v6152_v2 = vld [vmem:[#allocation8 + $0x228] sm:$0xff]  }
 0x423   : > { %v2387_v59 = vmax.f32 %v2328_v16, %v2361_v46  ;;  %v6139_v16 = vld [vmem:[#allocation8 + $0x1a0] sm:$0xff]  }
 0x424   : > { %v2315_v57 = vadd.f32 %v7144_v50, %v2234_v10  ;;  %v2237_v58 = vadd.f32 %v5490_v34, %v2156_v11  ;;  %v2363_v0 = vsel %vm1308_vm0, %v2360_v47, %v2362_v29  ;;  %5525 = vmatprep.subr.bf16.mxu0 %v6139_v16  ;;  %v6172_v16 = vld [vmem:[#allocation8 + $0x2c0] sm:$0xff]  }
 0x425   : > { %v2395_v25 = vpack.c.bf16 %v2387_v59, %v2386_v26  ;;  %v2388_v19 = vmax.f32 %v2329_v45, %v2363_v0  ;;  %5526 = vmatpush3.bf16.msra.mxu0 %v6141_v49  ;;  %v6153_v26 = vld [vmem:[#allocation8 + $0x178] sm:$0xff]   ;;  %v6174_v49 = vld [vmem:[#allocation8 + $0x2c8] sm:$0xff]  }
 0x426   : > { %v2331_v27 = vmax.f32 %v2315_v57, 0.0  ;;  %v2318_v13 = vadd.f32 %v7148_v62, %v2237_v58  ;;  %v6122_v62 = vld [vmem:[#allocation13 + $0x8] sm:$0xff]   ;;  %5527 = vmatprep.subr.bf16.mxu0 %v6143_v56 }
 0x427   : > { %5822 = vmatprep.subr.bf16.mxu1 %v2395_v25  ;;  %v6160_v45 = vld [vmem:[#allocation8 + $0x1f8] sm:$0xff]  }
 0x428   : > { %v2364_v28 = vrot.slane %v2331_v27, 1  ;;  %v2332_v55 = vmax.f32 %v2318_v13, 0.0  ;;  %5823 = vmatpush3.bf16.msra.mxu1 %v2395_v25 }
 0x429   : > { %5528 = vmatpush3.bf16.msra.mxu0 %v6145_v18  ;;  %v5128_v18 = vld [vmem:[#allocation10 + $0x2] ss:$0 sm:$0xff] }
 0x42a   : > { %v2366_v7 = vrot.slane %v2332_v55, 1  ;;  %v2365_v30 = vsel %vm1308_vm0, %v2362_v29, %v2364_v28  ;;  %5529 = vmatprep.subr.bf16.mxu0 %v6147_v9 }
 0x42b   : > { %v2389_v63 = vmax.f32 %v2330_v51, %v2365_v30 }
 0x42c   : > { %v2391_v60 = vmax.f32 %v2332_v55, %v2366_v7  ;;  %v2367_v15 = vsel %vm1308_vm0, %v2364_v28, %v2366_v7  ;;  %v6159_v28 = vld [vmem:[#allocation8 + $0x248] sm:$0xff]  }
 0x42d   : > { %v2396_v50 = vpack.c.bf16 %v2389_v63, %v2388_v19  ;;  %v2390_v12 = vmax.f32 %v2331_v27, %v2367_v15  ;;  %5530 = vmatpush3.bf16.msra.mxu0 %v6149_v4 }
 0x42e   : > { %5531 = vmatprep.subr.bf16.mxu0 %v6151_v53 }
 0x42f   : > { %5824 = vmatprep.subr.bf16.mxu1 %v2396_v50  ;;  %v2397_v23 = vpack.c.bf16 %v2391_v60, %v2390_v12 }
 0x430   : > { %5825 = vmatpush3.bf16.msra.mxu1 %v2396_v50 }
 0x431   : > { %v2460_v36 = vand.u32 %v2397_v23, %v7060_v5  ;;  %5532 = vmatpush3.bf16.msra.mxu0 %v6153_v26  ;;  %v6161_v23 = vld [vmem:[#allocation8 + $0x250] sm:$0xff]  }
 0x432   : > { %5840 = vmatprep.subr.bf16.mxu0 %v6156_v35 }
 0x433   : > { %5826 = vmatprep.subr.bf16.mxu1 %v2460_v36 }
 0x434   : > { %5827 = vmatpush3.bf16.msra.mxu1 %v2460_v36 }
 0x435   : > { %5557 = vmatprep.subr.bf16.mxu1 %v6132_v17  ;;  %v6162_v17 = vld [vmem:[#allocation8 + $0x258] sm:$0xff]  }
 0x437   : > { %5829 = vmatmul.mubr.msk.bf16.vlgmr.msra.gmra.mrb[48].mxu1 %vm2440_vm6, %v6122_v62 }
 0x438   : > { %5832 = vmatprep.mubr.msk.bf16.mxu1 %vm2440_vm6, %v6123_v40  ;;  %5558 = vmatpush3.bf16.msra.mxu1 %v6134_v54  ;;  %v6163_v40 = vld [vmem:[#allocation8 + $0x260] sm:$0xff]  }
 0x439   : > { %5559 = vmatprep.subr.bf16.mxu1 %v6136_v42 }
 0x43c   : > { %5560 = vmatpush3.bf16.msra.mxu1 %v6138_v33 }
 0x43d   : > { %5561 = vmatprep.subr.bf16.mxu1 %v6140_v3 }
 0x43f   : > { %5833 = vmatmul.mubr.msk.bf16.gmra.mrb[52].mxu1 %vm2440_vm6, %v6124_v32 }
 0x440   : > { %5836 = vmatprep.mubr.msk.bf16.mxu1 %vm2440_vm6, %v6125_v6  ;;  %5562 = vmatpush3.bf16.msra.mxu1 %v6142_v20  ;;  %v6164_v6 = vld [vmem:[#allocation8 + $0x268] sm:$0xff]   ;;  %v6165_v20 = vld [vmem:[#allocation8 + $0x270] sm:$0xff]  }
 0x441   : > { %5563 = vmatprep.subr.bf16.mxu1 %v6144_v43  ;;  %v6166_v43 = vld [vmem:[#allocation8 + $0x278] sm:$0xff]  }
 0x444   : > { %5564 = vmatpush3.bf16.msra.mxu1 %v6146_v41  ;;  %v6493_v41 = vmov 0.0  }
 0x445   : > { %5565 = vmatprep.subr.bf16.mxu1 %v6148_v14  ;;  %v6173_v14 = vld [vmem:[#allocation8 + $0x280] sm:$0xff]  }
 0x447   : > { %5837 = vmatmul.mubr.msk.bf16.gmra.mrb[56].mxu1 %vm2440_vm6, %v6126_v22 }
 0x448   : > { %5566 = vmatpush3.bf16.msra.mxu1 %v6150_v1  ;;  %v6175_v1 = vld [vmem:[#allocation8 + $0x288] sm:$0xff]  }
 0x449   : > { %5567 = vmatprep.subr.bf16.mxu1 %v6152_v2 }
 0x44c   : > { %5568 = vmatpush3.bf16.msra.mxu1 %v6154_v61 }
 0x44d   : > { %5569 = vmatprep.subr.bf16.mxu1 %v6155_v48 }
 0x450   : > { %5570 = vmatpush3.bf16.msra.mxu1 %v6157_v31 }
 0x451   : > { %5571 = vmatprep.subr.bf16.mxu1 %v6158_v38 }
 0x454   : > { %5572 = vmatpush3.bf16.msra.mxu1 %v6160_v45 }
 0x455   : > { %5618 = vmatprep.subr.bf16.mxu1 %v6172_v16 }
 0x50a   : > { %v5830_v44 = vpop.f32.mrb[48].mxu1 }
 0x50b   : > { %v2496_v24 = vpop.f32.mrb[49].mxu1 }
 0x50c   : > { %v5831_v37 = vpop.f32.mrb[50].mxu1 }
 0x50d   : > { %v2544_v47 = vpack.c.bf16 %v5831_v37, %v5830_v44  ;;  %v2499_v51 = vpop.f32.mrb[51].mxu1 }
 0x50e   : > { %v2543_v52 = vpack.c.bf16 %v2499_v51, %v2496_v24 }
 0x50f   : > { %2550 = vst [vmem:[#allocation3 + $0x8] sm:$0xff] %v2544_v47  ;;  %v2574_v25 = vrot.slane %v2544_v47, 4 }
 0x510   : > { %2549 = vst [vmem:[#allocation3] sm:$0xff] %v2543_v52 }
 0x512   : > { %v5834_v21 = vpop.f32.mrb[52].mxu1 }
 0x513   : > { %v2512_v11 = vpop.f32.mrb[53].mxu1 }
 0x514   : > { %v5835_v8 = vpop.f32.mrb[54].mxu1 }
 0x515   : > { %v7202_v29 = vpack.c.bf16 %v5835_v8, %v5834_v21  ;;  %v2515_v10 = vpop.f32.mrb[55].mxu1 }
 0x516   : > { %v7204_v34 = vpack.c.bf16 %v2515_v10, %v2512_v11  ;;  %v2562_v46 = vld [vmem:[#allocation3 + $0x8] sm:$0xf0] }
 0x517   : > { %v2559_v59 = vld [vmem:[#allocation3] sm:$0xf0]  ;;  %v2591_v57 = vrot.slane %v2562_v46, 4  ;;  %v2578_v58 = vrot.slane %v7202_v29, 4 }
 0x518   : > { %v2573_v0 = vrot.slane %v2559_v59, 4  ;;  %v2576_v19 = vrot.slane %v7204_v34, 4 }
 0x51a   : > { %v5838_v27 = vpop.f32.mrb[56].mxu1  ;;  %v2575_v13 = vsel %vm1703_vm4, %v2573_v0, %v2574_v25  ;;  %v2577_v55 = vsel %vm1703_vm4, %v2574_v25, %v2576_v19  ;;  %v2593_v7 = vsel %vm1703_vm4, %v2591_v57, %v2576_v19  ;;  %v2579_v30 = vsel %vm1703_vm4, %v2576_v19, %v2578_v58 }
 0x51b   : > { %v2528_v63 = vpop.f32.mrb[57].mxu1  ;;  %2965 = vmatprep.mubr.bf16.mxu0 %v2575_v13  ;;  %3030 = vmatprep.mubr.bf16.mxu1 %v2593_v7 }
 0x51c   : > { %v5839_v60 = vpop.f32.mrb[58].mxu1  ;;  %2966 = vmatmul.mubr.bf16.vlgmr.msra.gmra.mrb[48].mxu0 %v2543_v52  ;;  %3031 = vmatmul.mubr.bf16.vlgmr.msra.gmra.mrb[60].mxu1 %v2544_v47 }
 0x51d   : > { %v2548_v15 = vpack.c.bf16 %v5839_v60, %v5838_v27  ;;  %v2531_v50 = vpop.f32.mrb[59].mxu1  ;;  %5841 = vmatpush3.bf16.msra.mxu0 %v6156_v35  ;;  %2973 = vmatprep.mubr.bf16.mxu0 %v2577_v55 }
 0x51e   : > { %v2547_v12 = vpack.c.bf16 %v2531_v50, %v2528_v63  ;;  %5842 = vmatprep.subr.bf16.mxu0 %v6159_v28  ;;  %3038 = vmatprep.mubr.bf16.mxu1 %v2579_v30 }
 0x51f   : > { %2554 = vst [vmem:[#allocation3 + $0x28] sm:$0xff] %v2548_v15  ;;  %5619 = vmatpush3.bf16.msra.mxu1 %v6173_v14 }
 0x520   : > { %2553 = vst [vmem:[#allocation3 + $0x20] sm:$0xff] %v2547_v12  ;;  %v2596_v36 = vrot.slane %v2547_v12, 4  ;;  %5620 = vmatprep.subr.bf16.mxu1 %v6174_v49 }
 0x521   : > { %5843 = vmatpush3.bf16.msra.mxu0 %v6159_v28 }
 0x522   : > { %5844 = vmatprep.subr.bf16.mxu0 %v6161_v23  ;;  %v2597_v62 = vsel %vm1703_vm4, %v2578_v58, %v2596_v36 }
 0x523   : > { %5621 = vmatpush3.bf16.msra.mxu1 %v6175_v1 }
 0x524   : > { %2974 = vmatmul.mubr.bf16.gmra.mrb[52].mxu0 %v2544_v47  ;;  %3039 = vmatmul.mubr.bf16.gmra.mrb[64].mxu1 %v7204_v34 }
 0x525   : > { %2981 = vmatprep.mubr.bf16.mxu0 %v2579_v30  ;;  %5845 = vmatpush3.bf16.msra.mxu0 %v6161_v23 }
 0x526   : > { %5846 = vmatprep.subr.bf16.mxu0 %v6162_v17  ;;  %3046 = vmatprep.mubr.bf16.mxu1 %v2597_v62  ;;  %v2566_v54 = vld [vmem:[#allocation3 + $0x28] sm:$0xf] }
 0x527   : > { %v2560_v42 = vld [vmem:[#allocation3 + $0x20] sm:$0xf]  ;;  %v2598_v32 = vrot.slane %v2566_v54, 4 }
 0x528   : > { %v2580_v33 = vrot.slane %v2560_v42, 4 }
 0x529   : > { %5847 = vmatpush3.bf16.msra.mxu0 %v6162_v17  ;;  %v2599_v3 = vsel %vm1703_vm4, %v2596_v36, %v2598_v32 }
 0x52a   : > { %5848 = vmatprep.subr.bf16.mxu0 %v6163_v40  ;;  %v2581_v22 = vsel %vm1703_vm4, %v2578_v58, %v2580_v33 }
 0x52c   : > { %2982 = vmatmul.mubr.bf16.gmra.mrb[56].mxu0 %v7204_v34  ;;  %3047 = vmatmul.mubr.bf16.gmra.mrb[68].mxu1 %v7202_v29 }
 0x52d   : > { %2989 = vmatprep.mubr.bf16.mxu0 %v2581_v22  ;;  %5849 = vmatpush3.bf16.msra.mxu0 %v6163_v40 }
 0x52e   : > { %5850 = vmatprep.subr.bf16.mxu0 %v6164_v6  ;;  %3054 = vmatprep.mubr.bf16.mxu1 %v2599_v3 }
 0x531   : > { %5851 = vmatpush3.bf16.msra.mxu0 %v6164_v6 }
 0x532   : > { %5852 = vmatprep.subr.bf16.mxu0 %v6165_v20 }
 0x534   : > { %2990 = vmatmul.mubr.bf16.gmra.mrb[60].mxu0 %v7202_v29  ;;  %3055 = vmatmul.mubr.bf16.gmra.mrb[72].mxu1 %v2547_v12 }
 0x535   : > { %5853 = vmatpush3.bf16.msra.mxu0 %v6165_v20  ;;  %5856 = vmatprep.mubr.bf16.mxu0 %v7204_v34 }
 0x536   : > { %5854 = vmatprep.subr.bf16.mxu0 %v6166_v43 }
 0x539   : > { %5855 = vmatpush3.bf16.msra.mxu0 %v6166_v43 }
 0x53a   : > { %5864 = vmatprep.subr.bf16.mxu0 %v6493_v41 }
 0x53c   : > { %5857 = vmatmul.mubr.bf16.vlgmr.msra.gmra.mrb[64].mxu0 %v7202_v29 }
 0x53d   : > { %5860 = vmatprep.mubr.bf16.mxu0 %v2547_v12 }
 0x544   : > { %5861 = vmatmul.mubr.bf16.gmra.mrb[68].mxu0 %v2548_v15 }
 0x545   : > { %5872 = vmatprep.mubr.msk.bf16.mxu0 %vm6494_vm7, %v6493_v41 }
 0x5ef   : > { %v5533_v56 = vpop.f32.mrb[48].mxu0  ;;  %v5573_v2 = vpop.f32.mrb[60].mxu1 }
 0x5f0   : > { %v5534_v61 = vpop.f32.mrb[49].mxu0  ;;  %v5574_v9 = vpop.f32.mrb[61].mxu1 }
 0x5f1   : > { %v5535_v48 = vadd.f32 %v5534_v61, %v5533_v56  ;;  %v5536_v4 = vpop.f32.mrb[50].mxu0  ;;  %v5575_v31 = vadd.f32 %v5574_v9, %v5573_v2  ;;  %v5576_v53 = vpop.f32.mrb[62].mxu1 }
 0x5f2   : > { %v5537_v38 = vpop.f32.mrb[51].mxu0  ;;  %v5577_v26 = vpop.f32.mrb[63].mxu1 }
 0x5f3   : > { %v2968_v45 = vadd.f32 %v5535_v48, %v5128_v18  ;;  %v5538_v35 = vadd.f32 %v5537_v38, %v5536_v4  ;;  %v5578_v44 = vadd.f32 %v5577_v26, %v5576_v53 }
 0x5f5   : > { %v2971_v24 = vadd.f32 %v5538_v35, %v5128_v18  ;;  %v3033_v37 = vadd.f32 %v5575_v31, %v2968_v45 }
 0x5f7   : > { %v5539_v47 = vpop.f32.mrb[52].mxu0  ;;  %v5579_v51 = vpop.f32.mrb[64].mxu1  ;;  %v3036_v52 = vadd.f32 %v5578_v44, %v2971_v24 }
 0x5f8   : > { %v5540_v21 = vpop.f32.mrb[53].mxu0  ;;  %v5580_v11 = vpop.f32.mrb[65].mxu1 }
 0x5f9   : > { %v5541_v8 = vadd.f32 %v5540_v21, %v5539_v47  ;;  %v5542_v29 = vpop.f32.mrb[54].mxu0  ;;  %v5581_v10 = vadd.f32 %v5580_v11, %v5579_v51  ;;  %v5582_v34 = vpop.f32.mrb[66].mxu1 }
 0x5fa   : > { %v5543_v46 = vpop.f32.mrb[55].mxu0  ;;  %v5583_v59 = vpop.f32.mrb[67].mxu1 }
 0x5fb   : > { %v2976_v57 = vadd.f32 %v5541_v8, %v5128_v18  ;;  %v5544_v58 = vadd.f32 %v5543_v46, %v5542_v29  ;;  %v5584_v0 = vadd.f32 %v5583_v59, %v5582_v34 }
 0x5fd   : > { %v2979_v25 = vadd.f32 %v5544_v58, %v5128_v18  ;;  %v3041_v19 = vadd.f32 %v5581_v10, %v2976_v57 }
 0x5ff   : > { %v5545_v27 = vpop.f32.mrb[56].mxu0  ;;  %v5585_v13 = vpop.f32.mrb[68].mxu1  ;;  %v3044_v28 = vadd.f32 %v5584_v0, %v2979_v25 }
 0x600   : > { %v5546_v55 = vpop.f32.mrb[57].mxu0  ;;  %v5586_v7 = vpop.f32.mrb[69].mxu1 }
 0x601   : > { %v5547_v30 = vadd.f32 %v5546_v55, %v5545_v27  ;;  %v5548_v63 = vpop.f32.mrb[58].mxu0  ;;  %v5587_v60 = vadd.f32 %v5586_v7, %v5585_v13  ;;  %v5588_v15 = vpop.f32.mrb[70].mxu1 }
 0x602   : > { %v5549_v50 = vpop.f32.mrb[59].mxu0  ;;  %v5589_v12 = vpop.f32.mrb[71].mxu1 }
 0x603   : > { %v2984_v23 = vadd.f32 %v5547_v30, %v5128_v18  ;;  %v5550_v36 = vadd.f32 %v5549_v50, %v5548_v63  ;;  %v5590_v17 = vadd.f32 %v5589_v12, %v5588_v15 }
 0x605   : > { %v2987_v62 = vadd.f32 %v5550_v36, %v5128_v18  ;;  %v3049_v40 = vadd.f32 %v5587_v60, %v2984_v23 }
 0x607   : > { %v5551_v54 = vpop.f32.mrb[60].mxu0  ;;  %v5591_v42 = vpop.f32.mrb[72].mxu1  ;;  %v3052_v33 = vadd.f32 %v5590_v17, %v2987_v62 }
 0x608   : > { %v5552_v32 = vpop.f32.mrb[61].mxu0  ;;  %v5592_v6 = vpop.f32.mrb[73].mxu1 }
 0x609   : > { %v5553_v22 = vadd.f32 %v5552_v32, %v5551_v54  ;;  %v5554_v3 = vpop.f32.mrb[62].mxu0  ;;  %v5593_v20 = vadd.f32 %v5592_v6, %v5591_v42  ;;  %v5594_v43 = vpop.f32.mrb[74].mxu1 }
 0x60a   : > { %v5555_v16 = vpop.f32.mrb[63].mxu0  ;;  %v5595_v14 = vpop.f32.mrb[75].mxu1 }
 0x60b   : > { %v2992_v49 = vadd.f32 %v5553_v22, %v5128_v18  ;;  %v5556_v1 = vadd.f32 %v5555_v16, %v5554_v3  ;;  %v5596_v56 = vadd.f32 %v5595_v14, %v5594_v43  ;;  %v6167_v43 = vld [vmem:[%s7388_s6] sm:$0xff]   ;;  %v6168_v16 = vld [vmem:[%s7388_s6 + $0x8] sm:$0xff]   ;;  %v6169_v14 = vld [vmem:[%s7388_s6 + $0x10] sm:$0xff]  }
 0x60d   : > { %v2995_v2 = vadd.f32 %v5556_v1, %v5128_v18  ;;  %v3057_v61 = vadd.f32 %v5593_v20, %v2992_v49  ;;  %v6170_v49 = vld [vmem:[%s7388_s6 + $0x18] sm:$0xff]   ;;  %v6171_v1 = vld [vmem:[%s7388_s6 + $0x20] ss:$0 sps:$4 sm:$0xff]  }
 0x60f   : > { %v5858_v9 = vpop.f32.mrb[64].mxu0  ;;  %v3060_v48 = vadd.f32 %v5596_v56, %v2995_v2  ;;  %v6176_v56 = vld [vmem:[#allocation8 + $0x380] sm:$0xff]   ;;  %v6177_v2 = vld [vmem:[#allocation8 + $0x2d0] sm:$0xff]  }
 0x610   : > { %v3106_v4 = vadd.f32 %v5858_v9, %v3041_v19  ;;  %v3097_v31 = vpop.f32.mrb[65].mxu0  ;;  %5622 = vmatprep.subr.bf16.mxu1 %v6177_v2  ;;  %v6179_v9 = vld [vmem:[#allocation8 + $0x388] sm:$0xff]  }
 0x611   : > { %v3098_v53 = vadd.f32 %v3097_v31, %v3033_v37  ;;  %v5859_v38 = vpop.f32.mrb[66].mxu0  ;;  %v6182_v31 = vld [vmem:[#allocation8 + $0x390] sm:$0xff]  }
 0x612   : > { %v3130_v26 = vmax.f32 %v3106_v4, 0.0  ;;  %v3109_v45 = vadd.f32 %v5859_v38, %v3044_v28  ;;  %v3100_v35 = vpop.f32.mrb[67].mxu0  ;;  %v6181_v4 = vld [vmem:[#allocation8 + $0x298] sm:$0xff]   ;;  %v6184_v38 = vld [vmem:[#allocation8 + $0x2a0] sm:$0xff]  }
 0x613   : > { %v3128_v44 = vmax.f32 %v3098_v53, 0.0  ;;  %v3101_v24 = vadd.f32 %v3100_v35, %v3036_v52  ;;  %v6183_v53 = vld [vmem:[#allocation8 + $0x2e0] sm:$0xff]   ;;  %v6187_v35 = vld [vmem:[#allocation8 + $0x2a8] sm:$0xff]  }
 0x614   : > { %v3131_v47 = vmax.f32 %v3109_v45, 0.0  ;;  %v3147_v21 = vrot.slane %v3130_v26, 1  ;;  %v6186_v45 = vld [vmem:[#allocation8 + $0x2e8] sm:$0xff]  }
 0x615   : > { %v3129_v51 = vmax.f32 %v3101_v24, 0.0  ;;  %v3144_v8 = vrot.slane %v3128_v44, 1  ;;  %v6189_v24 = vld [vmem:[#allocation8 + $0x2f0] sm:$0xff]  }
 0x616   : > { %v3149_v11 = vrot.slane %v3131_v47, 1 }
 0x617   : > { %v3145_v29 = vrot.slane %v3129_v51, 1  ;;  %v5862_v10 = vpop.f32.mrb[68].mxu0 }
 0x618   : > { %v3150_v18 = vsel %vm1308_vm0, %v3147_v21, %v3149_v11  ;;  %v3122_v34 = vadd.f32 %v5862_v10, %v3057_v61  ;;  %v3113_v46 = vpop.f32.mrb[69].mxu0  ;;  %v6178_v61 = vld [vmem:[#allocation8 + $0x290] sm:$0xff]   ;;  %v6201_v10 = vld [vmem:[#allocation8 + $0x3b8] sm:$0xff]  }
 0x619   : > { %v3169_v59 = vmax.f32 %v3130_v26, %v3150_v18  ;;  %v3146_v37 = vsel %vm1308_vm0, %v3144_v8, %v3145_v29  ;;  %v3148_v57 = vsel %vm1308_vm0, %v3145_v29, %v3147_v21  ;;  %v3114_v58 = vadd.f32 %v3113_v46, %v3049_v40  ;;  %v5863_v0 = vpop.f32.mrb[70].mxu0  ;;  %5623 = vmatpush3.bf16.msra.mxu1 %v6178_v61  ;;  %v6185_v26 = vld [vmem:[#allocation8 + $0x398] sm:$0xff]   ;;  %v6194_v8 = vld [vmem:[#allocation8 + $0x3b0] sm:$0xff]   ;;  %v6199_v29 = vld [vmem:[#allocation8 + $0x340] sm:$0xff]  }
 0x61a   : > { %v3167_v25 = vmax.f32 %v3128_v44, %v3146_v37  ;;  %v3168_v52 = vmax.f32 %v3129_v51, %v3148_v57  ;;  %v3134_v19 = vmax.f32 %v3122_v34, 0.0  ;;  %v3125_v27 = vadd.f32 %v5863_v0, %v3060_v48  ;;  %v3116_v13 = vpop.f32.mrb[71].mxu0  ;;  %v6180_v48 = vld [vmem:[#allocation8 + $0x2d8] sm:$0xff]   ;;  %v6188_v44 = vld [vmem:[#allocation8 + $0x3a0] sm:$0xff]   ;;  %v6191_v51 = vld [vmem:[#allocation8 + $0x3a8] sm:$0xff]  }
 0x61b   : > { %v3132_v28 = vmax.f32 %v3114_v58, 0.0  ;;  %v3117_v55 = vadd.f32 %v3116_v13, %v3052_v33  ;;  %5624 = vmatprep.subr.bf16.mxu1 %v6180_v48  ;;  %v6192_v21 = vld [vmem:[#allocation8 + $0x2f8] sm:$0xff]  }
 0x61c   : > { %v3175_v7 = vpack.c.bf16 %v3168_v52, %v3167_v25  ;;  %v3135_v30 = vmax.f32 %v3125_v27, 0.0  ;;  %v3155_v15 = vrot.slane %v3134_v19, 1 }
 0x61d   : > { %v3151_v63 = vrot.slane %v3132_v28, 1  ;;  %v3133_v60 = vmax.f32 %v3117_v55, 0.0  ;;  %5625 = vmatpush3.bf16.msra.mxu1 %v6181_v4 }
 0x61e   : > { %v3157_v50 = vrot.slane %v3135_v30, 1  ;;  %5865 = vmatpush3.bf16.msra.mxu0 %v3175_v7  ;;  %5626 = vmatprep.subr.bf16.mxu1 %v6183_v53  ;;  %v6209_v53 = vld [vmem:[#allocation8 + $0x358] sm:$0xff]  }
 0x61f   : > { %v3152_v12 = vsel %vm1308_vm0, %v3149_v11, %v3151_v63  ;;  %v3153_v23 = vrot.slane %v3133_v60, 1  ;;  %5866 = vmatprep.subr.bf16.mxu0 %v6493_v41  ;;  %v6193_v11 = vld [vmem:[#allocation8 + $0x2b8] sm:$0xff]  }
 0x620   : > { %v3170_v36 = vmax.f32 %v3131_v47, %v3152_v12  ;;  %v3158_v17 = vsel %vm1308_vm0, %v3155_v15, %v3157_v50  ;;  %v3174_v62 = vmax.f32 %v3135_v30, %v3157_v50  ;;  %v6190_v47 = vld [vmem:[#allocation8 + $0x2b0] sm:$0xff]  }
 0x621   : > { %v3173_v40 = vmax.f32 %v3134_v19, %v3158_v17  ;;  %v3154_v54 = vsel %vm1308_vm0, %v3151_v63, %v3153_v23  ;;  %v3156_v42 = vsel %vm1308_vm0, %v3153_v23, %v3155_v15  ;;  %5627 = vmatpush3.bf16.msra.mxu1 %v6184_v38 }
 0x622   : > { %v3171_v33 = vmax.f32 %v3132_v28, %v3154_v54  ;;  %v3172_v32 = vmax.f32 %v3133_v60, %v3156_v42  ;;  %v3176_v6 = vpack.c.bf16 %v3170_v36, %v3169_v59  ;;  %5628 = vmatprep.subr.bf16.mxu1 %v6186_v45 }
 0x623   : > { %v3178_v22 = vpack.c.bf16 %v3174_v62, %v3173_v40  ;;  %v6200_v62 = vld [vmem:[#allocation8 + $0x300] sm:$0xff]  }
 0x624   : > { %v3177_v3 = vpack.c.bf16 %v3172_v32, %v3171_v33  ;;  %5867 = vmatpush3.bf16.msra.mxu0 %v3176_v6  ;;  %v6202_v33 = vld [vmem:[#allocation8 + $0x348] sm:$0xff]  }
 0x625   : > { %5868 = vmatprep.subr.bf16.mxu0 %v6493_v41  ;;  %v3228_v20 = vand.u32 %v3178_v22, %v7060_v5  ;;  %5629 = vmatpush3.bf16.msra.mxu1 %v6187_v35 }
 0x626   : > { %5630 = vmatprep.subr.bf16.mxu1 %v6189_v24  ;;  %v6210_v24 = vld [vmem:[#allocation8 + $0x318] sm:$0xff]  }
 0x628   : > { %5869 = vmatpush3.bf16.msra.mxu0 %v3177_v3  ;;  %v6203_v3 = vld [vmem:[#allocation8 + $0x308] sm:$0xff]  }
 0x629   : > { %5870 = vmatprep.subr.bf16.mxu0 %v6493_v41  ;;  %5631 = vmatpush3.bf16.msra.mxu1 %v6190_v47 }
 0x62a   : > { %5632 = vmatprep.subr.bf16.mxu1 %v6192_v21 }
 0x62c   : > { %5871 = vmatpush3.bf16.msra.mxu0 %v3228_v20 }
 0x62d   : > { %5892 = vmatprep.subr.bf16.mxu0 %v6493_v41  ;;  %5633 = vmatpush3.bf16.msra.mxu1 %v6193_v11  ;;  %v6214_v11 = vld [vmem:[#allocation8 + $0x360] sm:$0xff]  }
 0x62e   : > { %5652 = vmatprep.subr.bf16.mxu1 %v6199_v29 }
 0x62f   : > { %5873 = vmatmul.mubr.msk.bf16.vlgmr.msra.gmra.mrb[72].mxu0 %vm3211_vm8, %v6167_v43 }
 0x630   : > { %5876 = vmatprep.mubr.msk.bf16.mxu0 %vm6494_vm7, %v6493_v41  ;;  %5893 = vmatpush3.bf16.msra.mxu0 %v6176_v56  ;;  %v6207_v56 = vld [vmem:[#allocation8 + $0x350] sm:$0xff]  }
 0x631   : > { %5894 = vmatprep.subr.bf16.mxu0 %v6493_v41 }
 0x634   : > { %5895 = vmatpush3.bf16.msra.mxu0 %v6179_v9  ;;  %v6208_v9 = vld [vmem:[#allocation8 + $0x310] sm:$0xff]  }
 0x635   : > { %5896 = vmatprep.subr.bf16.mxu0 %v6493_v41 }
 0x637   : > { %5877 = vmatmul.mubr.msk.bf16.gmra.mrb[76].mxu0 %vm3211_vm8, %v6168_v16 }
 0x638   : > { %5880 = vmatprep.mubr.msk.bf16.mxu0 %vm6494_vm7, %v6493_v41  ;;  %5897 = vmatpush3.bf16.msra.mxu0 %v6182_v31 }
 0x639   : > { %5898 = vmatprep.subr.bf16.mxu0 %v6493_v41 }
 0x63c   : > { %5899 = vmatpush3.bf16.msra.mxu0 %v6185_v26 }
 0x63d   : > { %5900 = vmatprep.subr.bf16.mxu0 %v6493_v41 }
 0x63f   : > { %5881 = vmatmul.mubr.msk.bf16.gmra.mrb[80].mxu0 %vm3211_vm8, %v6169_v14 }
 0x640   : > { %5884 = vmatprep.mubr.msk.bf16.mxu0 %vm6494_vm7, %v6493_v41  ;;  %5901 = vmatpush3.bf16.msra.mxu0 %v6188_v44 }
 0x641   : > { %5902 = vmatprep.subr.bf16.mxu0 %v6493_v41 }
 0x644   : > { %5903 = vmatpush3.bf16.msra.mxu0 %v6191_v51 }
 0x645   : > { %5904 = vmatprep.subr.bf16.mxu0 %v6493_v41 }
 0x647   : > { %5885 = vmatmul.mubr.msk.bf16.gmra.mrb[84].mxu0 %vm3211_vm8, %v6170_v49 }
 0x648   : > { %5888 = vmatprep.mubr.msk.bf16.mxu0 %vm6494_vm7, %v6493_v41  ;;  %5905 = vmatpush3.bf16.msra.mxu0 %v6194_v8 }
 0x649   : > { %5906 = vmatprep.subr.bf16.mxu0 %v6493_v41 }
 0x64c   : > { %5907 = vmatpush3.bf16.msra.mxu0 %v6201_v10 }
 0x64f   : > { %5889 = vmatmul.mubr.msk.bf16.gmra.mrb[88].mxu0 %vm3211_vm8, %v6171_v1 }
 0x650   : > { %5908 = vmatprep.mubr.msk.bf16.mxu0 %vm6494_vm7, %v6493_v41 }
 0x702   : > { %v3264_v18 = vpop.f32.mrb[72].mxu0 }
 0x703   : > { %v5874_v34 = vpop.f32.mrb[73].mxu0 }
 0x704   : > { %v3267_v46 = vpop.f32.mrb[74].mxu0 }
 0x705   : > { %v5350_v59 = vpack.c.bf16 %v3267_v46, %v3264_v18  ;;  %v5875_v37 = vpop.f32.mrb[75].mxu0  ;;  %v6215_v18 = vld [vmem:[#allocation8 + $0x320] sm:$0xff]  }
 0x707   : > { %5351 = vst [vmem:[#allocation4] sm:$0xff] %v5350_v59   ;;  %v6217_v59 = vld [vmem:[#allocation8 + $0x368] sm:$0xff]  }
 0x70a   : > { %v3272_v57 = vpop.f32.mrb[76].mxu0 }
 0x70b   : > { %v5878_v58 = vpop.f32.mrb[77].mxu0 }
 0x70c   : > { %v3275_v0 = vpop.f32.mrb[78].mxu0  ;;  %v6218_v58 = vld [vmem:[#allocation8 + $0x328] sm:$0xff]  }
 0x70d   : > { %v5355_v25 = vpack.c.bf16 %v3275_v0, %v3272_v57  ;;  %v5879_v52 = vpop.f32.mrb[79].mxu0 }
 0x70e   : > { %v3349_v27 = vld [vmem:[#allocation4 + $0x4] sm:$0xf]  ;;  %v3354_v13 = vld [vmem:[#allocation4] sm:$0x8]  ;;  %v6221_v52 = vld [vmem:[#allocation8 + $0x370] sm:$0xff]  }
 0x70f   : > { %5382 = vst [vmem:[#allocation4 + $0x8] sm:$0xff] %v5355_v25   ;;  %v5191_v63 = vcombine.low %v3354_v13, %v3349_v27  ;;  %v3348_v12 = vld [vmem:[#allocation4] sm:$0xf] }
 0x710   : > { %v5188_v54 = vcombine.low %v3348_v12, %v3349_v27  ;;  %v6223_v27 = vld [vmem:[#allocation8 + $0x378] sm:$0xff]  }
 0x711   : > { %v3392_v23 = vrot.slane %v5191_v63, 3 }
 0x712   : > { %v3280_v19 = vpop.f32.mrb[80].mxu0 }
 0x713   : > { %v5882_v28 = vpop.f32.mrb[81].mxu0 }
 0x714   : > { %v3283_v55 = vpop.f32.mrb[82].mxu0  ;;  %v3356_v28 = vld [vmem:[#allocation4 + $0x4] sm:$0xc] }
 0x715   : > { %v5360_v7 = vpack.c.bf16 %v3283_v55, %v3280_v19  ;;  %v5883_v30 = vpop.f32.mrb[83].mxu0  ;;  %v6222_v19 = vld [vmem:[#allocation8 + $0x330] sm:$0xff]  }
 0x716   : > { %v7268_v60 = vld [vmem:[#allocation4 + $0x8] sm:$0xf]  ;;  %v7270_v15 = vld [vmem:[#allocation4 + $0xc] sm:$0xf] }
 0x717   : > { %5383 = vst [vmem:[#allocation4 + $0x10] sm:$0xff] %v5360_v7   ;;  %v5189_v50 = vcombine.low %v7268_v60, %v7270_v15  ;;  %v3360_v20 = vld [vmem:[#allocation4 + $0xc] sm:$0xf]  ;;  %v3359_v26 = vld [vmem:[#allocation4 + $0x8] sm:$0xe]  ;;  %v5193_v7 = vcombine.low %v3356_v28, %v7268_v60 }
 0x718   : > { %v5197_v8 = vcombine.low %v3359_v26, %v3360_v20  ;;  %v6224_v30 = vld [vmem:[#allocation8 + $0x338] sm:$0xff]  }
 0x719   : > { %v3393_v36 = vrot.slane %v5189_v50, 3 }
 0x71a   : > { %v3288_v17 = vpop.f32.mrb[84].mxu0  ;;  %v3441_v46 = vrot.slane %v5197_v8, 1 }
 0x71b   : > { %v5886_v40 = vpop.f32.mrb[85].mxu0  ;;  %v3394_v42 = vsel %vm3391_vm9, %v3392_v23, %v3393_v36  ;;  %v3412_v23 = vrot.slane %v5193_v7, 2 }
 0x71c   : > { %v3291_v32 = vpop.f32.mrb[86].mxu0  ;;  %3820 = vmatprep.mubr.bf16.mxu1 %v3394_v42 }
 0x71d   : > { %v5365_v6 = vpack.c.bf16 %v3291_v32, %v3288_v17  ;;  %3821 = vmatmul.mubr.bf16.vlgmr.msra.gmra.mrb[76].mxu1 %v5188_v54  ;;  %v5887_v22 = vpop.f32.mrb[87].mxu0 }
 0x71e   : > { %5653 = vmatpush3.bf16.msra.mxu1 %v6200_v62  ;;  %v3361_v43 = vld [vmem:[#allocation4 + $0x10] sm:$0xf]  ;;  %v7277_v14 = vld [vmem:[#allocation4 + $0x14] sm:$0xf]  ;;  %v6228_v22 = vld [vmem:[%s7389_s7] sm:$0xff]  }
 0x71f   : > { %v7275_v16 = vld [vmem:[#allocation4 + $0x10] sm:$0xf]  ;;  %5384 = vst [vmem:[#allocation4 + $0x18] sm:$0xff] %v5365_v6   ;;  %5654 = vmatprep.subr.bf16.mxu1 %v6202_v33  ;;  %v5201_v49 = vcombine.low %v3360_v20, %v3361_v43  ;;  %v3362_v48 = vld [vmem:[#allocation4 + $0x14] sm:$0xf] }
 0x720   : > { %v5190_v1 = vcombine.low %v7275_v16, %v7277_v14  ;;  %v5198_v35 = vcombine.low %v3361_v43, %v3362_v48  ;;  %v5194_v13 = vcombine.low %v7270_v15, %v7275_v16  ;;  %v6233_v20 = vld [vmem:[#allocation8 + $0x3c0] sm:$0xff]   ;;  %v6234_v43 = vld [vmem:[#allocation8 + $0x408] sm:$0xff]  }
 0x721   : > { %5909 = vmatmul.mubr.bf16.vlgmr.msra.gmra.mrb[92].mxu0 %v5201_v49  ;;  %v6235_v16 = vld [vmem:[#allocation8 + $0x3c8] sm:$0xff]  }
 0x722   : > { %v3395_v2 = vrot.slane %v5190_v1, 3  ;;  %5655 = vmatpush3.bf16.msra.mxu1 %v6203_v3  ;;  %v3296_v61 = vpop.f32.mrb[88].mxu0  ;;  %5912 = vmatprep.mubr.msk.bf16.mxu0 %vm6494_vm7, %v6493_v41  ;;  %v3442_v10 = vrot.slane %v5198_v35, 1  ;;  %v3413_v63 = vrot.slane %v5194_v13, 2  ;;  %v6232_v3 = vld [vmem:[#allocation8 + $0x400] sm:$0xff]  }
 0x723   : > { %v5334_v4 = vpack.c.bf16 %v3296_v61, %v3296_v61  ;;  %5656 = vmatprep.subr.bf16.mxu1 %v6207_v56  ;;  %v5890_v38 = vpop.f32.mrb[89].mxu0  ;;  %5704 = vmatprep.subr.bf16.mxu0 %v6232_v3 }
 0x724   : > { %v3396_v31 = vsel %vm3391_vm9, %v3393_v36, %v3395_v2  ;;  %v3299_v45 = vpop.f32.mrb[90].mxu0  ;;  %v3443_v57 = vsel %vm1308_vm0, %v3441_v46, %v3442_v10  ;;  %v3414_v36 = vsel %vm1730_vm5, %v3412_v23, %v3413_v63  ;;  %5705 = vmatpush3.bf16.msra.mxu0 %v6233_v20 }
 0x725   : > { %3828 = vmatprep.mubr.bf16.mxu1 %v3396_v31  ;;  %3347 = vst [vmem:[#allocation4 + $0x20] sm:$0xf] %v5334_v4  ;;  %v5891_v44 = vpop.f32.mrb[91].mxu0  ;;  %5706 = vmatprep.subr.bf16.mxu0 %v6234_v43 }
 0x726   : > { %3829 = vmatmul.mubr.bf16.gmra.mrb[80].mxu1 %v5189_v50  ;;  %v3363_v47 = vld [vmem:[#allocation4 + $0x18] sm:$0xf]  ;;  %v3364_v0 = vld [vmem:[#allocation4 + $0x1c] sm:$0xf] }
 0x727   : > { %5657 = vmatpush3.bf16.msra.mxu1 %v6208_v9  ;;  %v5202_v51 = vcombine.low %v3362_v48, %v3363_v47  ;;  %v6213_v21 = vld [vmem:[#allocation4 + $0x18] ss:$0 sps:$4 sm:$0x77]   ;;  %v5199_v55 = vcombine.low %v3363_v47, %v3364_v0  ;;  %v6227_v42 = vld [vmem:[#allocation4 + $0x1c] ss:$0 sps:$4 sm:$0x33]  }
 0x728   : > { %5658 = vmatprep.subr.bf16.mxu1 %v6209_v53  ;;  %v3397_v29 = vrot.slane %v6213_v21, 3  ;;  %v3357_v12 = vld [vmem:[#allocation4 + $0x18] sm:$0xf]  ;;  %v3417_v32 = vrot.slane %v6227_v42, 2  ;;  %5707 = vmatpush3.bf16.msra.mxu0 %v6235_v16 }
 0x729   : > { %5913 = vmatmul.mubr.bf16.gmra.mrb[96].mxu0 %v5202_v51  ;;  %v3444_v50 = vrot.slane %v5199_v55, 1  ;;  %v5195_v17 = vcombine.low %v7277_v14, %v3357_v12  ;;  %v6236_v14 = vld [vmem:[#allocation8 + $0x410] sm:$0xff]  }
 0x72a   : > { %5916 = vmatprep.mubr.msk.bf16.mxu0 %vm6494_vm7, %v6493_v41  ;;  %v3398_v34 = vsel %vm3391_vm9, %v3395_v2, %v3397_v29  ;;  %5708 = vmatprep.subr.bf16.mxu0 %v6236_v14 }
 0x72b   : > { %5659 = vmatpush3.bf16.msra.mxu1 %v6210_v24  ;;  %3836 = vmatprep.mubr.bf16.mxu1 %v3398_v34  ;;  %v3445_v62 = vsel %vm1308_vm0, %v3442_v10, %v3444_v50  ;;  %v3415_v40 = vrot.slane %v5195_v17, 2 }
 0x72c   : > { %5660 = vmatprep.subr.bf16.mxu1 %v6214_v11  ;;  %v3366_v37 = vld [vmem:[#allocation4 + $0x20] sm:$0xf] }
 0x72d   : > { %v5203_v25 = vcombine.low %v3364_v0, %v3366_v37  ;;  %v6226_v15 = vld [vmem:[#allocation4 + $0x20] ss:$0 sps:$4 sm:$0x11]   ;;  %v3416_v60 = vsel %vm1730_vm5, %v3413_v63, %v3415_v40  ;;  %v3418_v6 = vsel %vm1730_vm5, %v3415_v40, %v3417_v32  ;;  %v5204_v0 = vld [vmem:[#allocation10 + $0x3] ss:$0 sm:$0xff] }
 0x72e   : > { %3837 = vmatmul.mubr.bf16.gmra.mrb[84].mxu1 %v5190_v1  ;;  %v3446_v54 = vrot.slane %v6226_v15, 1 }
 0x72f   : > { %5661 = vmatpush3.bf16.msra.mxu1 %v6215_v18  ;;  %3877 = vmatprep.mubr.bf16.mxu1 %v3443_v57 }
 0x730   : > { %5662 = vmatprep.subr.bf16.mxu1 %v6217_v59  ;;  %v3447_v33 = vsel %vm1308_vm0, %v3444_v50, %v3446_v54 }
 0x731   : > { %5917 = vmatmul.mubr.bf16.gmra.mrb[100].mxu0 %v5203_v25 }
 0x733   : > { %5663 = vmatpush3.bf16.msra.mxu1 %v6218_v58 }
 0x734   : > { %5664 = vmatprep.subr.bf16.mxu1 %v6221_v52 }
 0x737   : > { %5665 = vmatpush3.bf16.msra.mxu1 %v6222_v19 }
 0x738   : > { %5666 = vmatprep.subr.bf16.mxu1 %v6223_v27 }
 0x73b   : > { %5667 = vmatpush3.bf16.msra.mxu1 %v6224_v30 }
 0x73e   : > { %3878 = vmatmul.mubr.bf16.vlgmr.msra.gmra.mrb[88].mxu1 %v3414_v36 }
 0x73f   : > { %3885 = vmatprep.mubr.bf16.mxu1 %v3445_v62 }
 0x746   : > { %3886 = vmatmul.mubr.bf16.gmra.mrb[92].mxu1 %v3416_v60 }
 0x747   : > { %3893 = vmatprep.mubr.bf16.mxu1 %v3447_v33 }
 0x74e   : > { %3894 = vmatmul.mubr.bf16.gmra.mrb[96].mxu1 %v3418_v6 }
 0x74f   : > { %5926 = vmatprep.mubr.msk.bf16.mxu1 %vm4025_vm10, %v6228_v22 }
 0x7f0   : > { %v5634_v49 = vpop.f32.mrb[76].mxu1 }
 0x7f1   : > { %v5635_v1 = vpop.f32.mrb[77].mxu1 }
 0x7f2   : > { %v5636_v56 = vadd.f32 %v5635_v1, %v5634_v49  ;;  %v5637_v2 = vpop.f32.mrb[78].mxu1 }
 0x7f3   : > { %v5638_v61 = vpop.f32.mrb[79].mxu1 }
 0x7f4   : > { %v5639_v9 = vadd.f32 %v5638_v61, %v5637_v2  ;;  %v3936_v48 = vpop.f32.mrb[92].mxu0  ;;  %v3823_v19 = vadd.f32 %v5636_v56, %v5204_v0 }
 0x7f5   : > { %v5910_v4 = vpop.f32.mrb[93].mxu0 }
 0x7f6   : > { %v3939_v31 = vpop.f32.mrb[94].mxu0  ;;  %v3826_v55 = vadd.f32 %v5639_v9, %v5204_v0 }
 0x7f7   : > { %v5911_v53 = vpop.f32.mrb[95].mxu0 }
 0x7f9   : > { %v5640_v38 = vpop.f32.mrb[80].mxu1 }
 0x7fa   : > { %v5641_v26 = vpop.f32.mrb[81].mxu1 }
 0x7fb   : > { %v5642_v45 = vadd.f32 %v5641_v26, %v5640_v38  ;;  %v5643_v35 = vpop.f32.mrb[82].mxu1 }
 0x7fc   : > { %v5644_v44 = vpop.f32.mrb[83].mxu1  ;;  %v3944_v47 = vpop.f32.mrb[96].mxu0 }
 0x7fd   : > { %v5645_v24 = vadd.f32 %v5644_v44, %v5643_v35  ;;  %v5914_v51 = vpop.f32.mrb[97].mxu0  ;;  %v3831_v62 = vadd.f32 %v5642_v45, %v5204_v0 }
 0x7fe   : > { %v3947_v21 = vpop.f32.mrb[98].mxu0 }
 0x7ff   : > { %v5915_v11 = vpop.f32.mrb[99].mxu0  ;;  %v3834_v60 = vadd.f32 %v5645_v24, %v5204_v0 }
 0x801   : > { %v5646_v8 = vpop.f32.mrb[84].mxu1 }
 0x802   : > { %v5647_v29 = vpop.f32.mrb[85].mxu1 }
 0x803   : > { %v5648_v10 = vadd.f32 %v5647_v29, %v5646_v8  ;;  %v5649_v18 = vpop.f32.mrb[86].mxu1 }
 0x804   : > { %v5650_v34 = vpop.f32.mrb[87].mxu1  ;;  %v3952_v59 = vpop.f32.mrb[100].mxu0 }
 0x805   : > { %v5651_v46 = vadd.f32 %v5650_v34, %v5649_v18  ;;  %v5918_v37 = vpop.f32.mrb[101].mxu0  ;;  %v3839_v2 = vadd.f32 %v5648_v10, %v5204_v0 }
 0x806   : > { %v3955_v57 = vpop.f32.mrb[102].mxu0 }
 0x807   : > { %v5919_v58 = vpop.f32.mrb[103].mxu0 }
 0x811   : > { %v5668_v25 = vpop.f32.mrb[88].mxu1 }
 0x812   : > { %v5669_v52 = vpop.f32.mrb[89].mxu1 }
 0x813   : > { %v5670_v27 = vadd.f32 %v5669_v52, %v5668_v25  ;;  %v5671_v13 = vpop.f32.mrb[90].mxu1 }
 0x814   : > { %v5672_v28 = vpop.f32.mrb[91].mxu1 }
 0x815   : > { %v3880_v7 = vadd.f32 %v5670_v27, %v3823_v19  ;;  %v5673_v30 = vadd.f32 %v5672_v28, %v5671_v13  ;;  %v6230_v27 = vld [vmem:[%s7389_s7 + $0x10] sm:$0xff]   ;;  %v6231_v13 = vld [vmem:[%s7389_s7 + $0x18] sm:$0x3f]   ;;  %v6238_v28 = vld [vmem:[#allocation8 + $0x480] sm:$0xff]  }
 0x817   : > { %v3937_v63 = vadd.f32 %v3936_v48, %v3880_v7  ;;  %v3883_v50 = vadd.f32 %v5673_v30, %v3826_v55  ;;  %v6239_v55 = vld [vmem:[#allocation8 + $0x440] sm:$0xff]   ;;  %v6240_v7 = vld [vmem:[#allocation8 + $0x418] sm:$0xff]  }
 0x818   : > { %v6241_v30 = vld [vmem:[#allocation8 + $0x3d8] sm:$0xff]  }
 0x819   : > { %v3959_v12 = vmax.f32 %v3937_v63, 0.0  ;;  %v3940_v23 = vadd.f32 %v3939_v31, %v3883_v50  ;;  %v5674_v36 = vpop.f32.mrb[92].mxu1  ;;  %v3842_v31 = vadd.f32 %v5651_v46, %v5204_v0  ;;  %v6242_v63 = vld [vmem:[#allocation8 + $0x488] sm:$0xff]  }
 0x81a   : > { %v5675_v17 = vpop.f32.mrb[93].mxu1  ;;  %v6243_v50 = vld [vmem:[#allocation8 + $0x448] sm:$0xff]  }
 0x81b   : > { %v3960_v15 = vmax.f32 %v3940_v23, 0.0  ;;  %v5676_v40 = vadd.f32 %v5675_v17, %v5674_v36  ;;  %v5677_v54 = vpop.f32.mrb[94].mxu1  ;;  %v3971_v33 = vrot.slane %v3959_v12, 1  ;;  %v6245_v23 = vld [vmem:[#allocation8 + $0x3e0] sm:$0xff]   ;;  %v6246_v36 = vld [vmem:[#allocation8 + $0x490] sm:$0xff]  }
 0x81c   : > { %v5678_v42 = vpop.f32.mrb[95].mxu1  ;;  %v6247_v17 = vld [vmem:[#allocation8 + $0x450] sm:$0xff]  }
 0x81d   : > { %v3972_v32 = vrot.slane %v3960_v15, 1  ;;  %v3888_v6 = vadd.f32 %v5676_v40, %v3831_v62  ;;  %v5679_v22 = vadd.f32 %v5678_v42, %v5677_v54  ;;  %v6248_v62 = vld [vmem:[#allocation8 + $0x428] sm:$0xff]   ;;  %v6250_v40 = vld [vmem:[#allocation8 + $0x498] sm:$0xff]   ;;  %v6253_v42 = vld [vmem:[#allocation8 + $0x3f0] sm:$0xff]  }
 0x81e   : > { %v6251_v54 = vld [vmem:[#allocation8 + $0x458] sm:$0xff]  }
 0x81f   : > { %v3945_v3 = vadd.f32 %v3944_v47, %v3888_v6  ;;  %v3891_v20 = vadd.f32 %v5679_v22, %v3834_v60  ;;  %v3973_v43 = vsel %vm1308_vm0, %v3971_v33, %v3972_v32  ;;  %v6252_v60 = vld [vmem:[#allocation8 + $0x430] sm:$0xff]   ;;  %v6254_v33 = vld [vmem:[#allocation8 + $0x4a0] sm:$0xff]   ;;  %v6256_v6 = vld [vmem:[#allocation8 + $0x438] sm:$0xff]  }
 0x820   : > { %v3988_v16 = vmax.f32 %v3959_v12, %v3973_v43  ;;  %v6244_v12 = vld [vmem:[#allocation8 + $0x420] sm:$0xff]   ;;  %v6258_v22 = vld [vmem:[#allocation8 + $0x4a8] sm:$0xff]   ;;  %v6263_v43 = vld [vmem:[#allocation8 + $0x4b0] sm:$0xff]  }
 0x821   : > { %v3961_v14 = vmax.f32 %v3945_v3, 0.0  ;;  %v3948_v49 = vadd.f32 %v3947_v21, %v3891_v20  ;;  %v5680_v1 = vpop.f32.mrb[96].mxu1  ;;  %v6257_v3 = vld [vmem:[#allocation8 + $0x3f8] sm:$0xff]   ;;  %v6259_v20 = vld [vmem:[#allocation8 + $0x468] sm:$0xff]  }
 0x822   : > { %v5681_v56 = vpop.f32.mrb[97].mxu1 }
 0x823   : > { %v3974_v61 = vrot.slane %v3961_v14, 1  ;;  %v3962_v9 = vmax.f32 %v3948_v49, 0.0  ;;  %v5682_v48 = vadd.f32 %v5681_v56, %v5680_v1  ;;  %v5683_v4 = vpop.f32.mrb[98].mxu1  ;;  %v6268_v49 = vld [vmem:[#allocation8 + $0x478] sm:$0xff]  }
 0x824   : > { %v5684_v53 = vpop.f32.mrb[99].mxu1 }
 0x825   : > { %v3976_v38 = vrot.slane %v3962_v9, 1  ;;  %v3896_v26 = vadd.f32 %v5682_v48, %v3839_v2  ;;  %v5685_v45 = vadd.f32 %v5684_v53, %v5683_v4  ;;  %v3975_v35 = vsel %vm1308_vm0, %v3972_v32, %v3974_v61  ;;  %v6255_v32 = vld [vmem:[#allocation8 + $0x460] sm:$0xff]  }
 0x826   : > { %v3989_v44 = vmax.f32 %v3960_v15, %v3975_v35  ;;  %v6249_v15 = vld [vmem:[#allocation8 + $0x3e8] sm:$0xff]  }
 0x827   : > { %v3953_v24 = vadd.f32 %v3952_v59, %v3896_v26  ;;  %v3899_v47 = vadd.f32 %v5685_v45, %v3842_v31  ;;  %v3977_v51 = vsel %vm1308_vm0, %v3974_v61, %v3976_v38 }
 0x828   : > { %v3994_v21 = vpack.c.bf16 %v3989_v44, %v3988_v16  ;;  %v3990_v11 = vmax.f32 %v3961_v14, %v3977_v51  ;;  %v6265_v16 = vld [vmem:[#allocation8 + $0x470] sm:$0xff]   ;;  %v6266_v14 = vld [vmem:[#allocation8 + $0x4b8] sm:$0xff]  }
 0x829   : > { %v3963_v8 = vmax.f32 %v3953_v24, 0.0  ;;  %v3956_v29 = vadd.f32 %v3955_v57, %v3899_v47  ;;  %v6229_v57 = vld [vmem:[%s7389_s7 + $0x8] sm:$0xff]  }
 0x82a   : > { %5920 = vmatprep.subr.bf16.mxu1 %v3994_v21 }
 0x82b   : > { %v3978_v10 = vrot.slane %v3963_v8, 1  ;;  %v3964_v18 = vmax.f32 %v3956_v29, 0.0  ;;  %5921 = vmatpush3.bf16.msra.mxu1 %v3994_v21 }
 0x82d   : > { %v3980_v34 = vrot.slane %v3964_v18, 1  ;;  %v3979_v46 = vsel %vm1308_vm0, %v3976_v38, %v3978_v10 }
 0x82e   : > { %v3991_v37 = vmax.f32 %v3962_v9, %v3979_v46 }
 0x82f   : > { %v3993_v58 = vmax.f32 %v3964_v18, %v3980_v34  ;;  %v3981_v0 = vsel %vm1308_vm0, %v3978_v10, %v3980_v34 }
 0x830   : > { %v3995_v25 = vpack.c.bf16 %v3991_v37, %v3990_v11  ;;  %v3992_v59 = vmax.f32 %v3963_v8, %v3981_v0 }
 0x832   : > { %5922 = vmatprep.subr.bf16.mxu1 %v3995_v25  ;;  %v3996_v52 = vpack.c.bf16 %v3993_v58, %v3992_v59 }
 0x833   : > { %5923 = vmatpush3.bf16.msra.mxu1 %v3995_v25 }
 0x834   : > { %v4039_v19 = vand.u32 %v3996_v52, %v7060_v5  ;;  %v6237_v5 = vld [vmem:[#allocation8 + $0x3d0] sm:$0xff]  }
 0x835   : > { %5709 = vmatpush3.bf16.msra.mxu0 %v6237_v5  ;;  %v6264_v5 = vld [vmem:[#allocation8 + $0x4c0] sm:$0xff]  }
 0x836   : > { %5924 = vmatprep.subr.bf16.mxu1 %v4039_v19  ;;  %5710 = vmatprep.subr.bf16.mxu0 %v6240_v7 }
 0x837   : > { %5925 = vmatpush3.bf16.msra.mxu1 %v4039_v19 }
 0x838   : > { %5738 = vmatprep.subr.bf16.mxu1 %v6238_v28 }
 0x839   : > { %5711 = vmatpush3.bf16.msra.mxu0 %v6241_v30 }
 0x83a   : > { %5927 = vmatmul.mubr.msk.bf16.vlgmr.msra.gmra.mrb[100].mxu1 %vm4025_vm10, %v6229_v57  ;;  %5712 = vmatprep.subr.bf16.mxu0 %v6244_v12 }
 0x83b   : > { %5930 = vmatprep.mubr.msk.bf16.mxu1 %vm4025_vm10, %v6230_v27  ;;  %5739 = vmatpush3.bf16.msra.mxu1 %v6239_v55 }
 0x83c   : > { %5740 = vmatprep.subr.bf16.mxu1 %v6242_v63 }
 0x83d   : > { %5713 = vmatpush3.bf16.msra.mxu0 %v6245_v23 }
 0x83e   : > { %5714 = vmatprep.subr.bf16.mxu0 %v6248_v62 }
 0x83f   : > { %5741 = vmatpush3.bf16.msra.mxu1 %v6243_v50 }
 0x840   : > { %5742 = vmatprep.subr.bf16.mxu1 %v6246_v36 }
 0x841   : > { %5715 = vmatpush3.bf16.msra.mxu0 %v6249_v15 }
 0x842   : > { %5931 = vmatmul.mubr.msk.bf16.gmra.mrb[104].mxu1 %vm4025_vm10, %v6231_v13  ;;  %5716 = vmatprep.subr.bf16.mxu0 %v6252_v60 }
 0x843   : > { %5743 = vmatpush3.bf16.msra.mxu1 %v6247_v17 }
 0x844   : > { %5744 = vmatprep.subr.bf16.mxu1 %v6250_v40 }
 0x845   : > { %5717 = vmatpush3.bf16.msra.mxu0 %v6253_v42  ;;  %v6267_v42 = vld [vmem:[#allocation8 + $0x4c8] sm:$0xff]  }
 0x846   : > { %5718 = vmatprep.subr.bf16.mxu0 %v6256_v6 }
 0x847   : > { %5745 = vmatpush3.bf16.msra.mxu1 %v6251_v54 }
 0x848   : > { %5746 = vmatprep.subr.bf16.mxu1 %v6254_v33 }
 0x849   : > { %5719 = vmatpush3.bf16.msra.mxu0 %v6257_v3 }
 0x84a   : > { %5934 = vmatprep.subr.bf16.mxu0 %v6493_v41 }
 0x84b   : > { %5747 = vmatpush3.bf16.msra.mxu1 %v6255_v32 }
 0x84c   : > { %5748 = vmatprep.subr.bf16.mxu1 %v6258_v22 }
 0x84f   : > { %5749 = vmatpush3.bf16.msra.mxu1 %v6259_v20 }
 0x850   : > { %5750 = vmatprep.subr.bf16.mxu1 %v6263_v43 }
 0x853   : > { %5751 = vmatpush3.bf16.msra.mxu1 %v6265_v16 }
 0x854   : > { %5752 = vmatprep.subr.bf16.mxu1 %v6266_v14 }
 0x857   : > { %5753 = vmatpush3.bf16.msra.mxu1 %v6268_v49 }
 0x90d   : > { %v5928_v1 = vpop.f32.mrb[100].mxu1 }
 0x90e   : > { %v4075_v56 = vpop.f32.mrb[101].mxu1 }
 0x90f   : > { %v5929_v2 = vpop.f32.mrb[102].mxu1 }
 0x910   : > { %v5375_v61 = vpack.c.bf16 %v5929_v2, %v5928_v1  ;;  %v4078_v9 = vpop.f32.mrb[103].mxu1 }
 0x911   : > { %v5370_v48 = vpack.c.bf16 %v4078_v9, %v4075_v56 }
 0x912   : > { %5385 = vst [vmem:[#allocation5 + $0x8] sm:$0xff] %v5375_v61  }
 0x913   : > { %5371 = vst [vmem:[#allocation5] sm:$0xff] %v5370_v48   ;;  %v6273_v48 = vld [vmem:[#allocation8 + $0x4d0] sm:$0xff]  }
 0x915   : > { %v5932_v4 = vpop.f32.mrb[104].mxu1 }
 0x916   : > { %v5341_v31 = vpack.c.bf16 %v5932_v4, %v5932_v4  ;;  %v4091_v53 = vpop.f32.mrb[105].mxu1 }
 0x917   : > { %v5933_v38 = vpop.f32.mrb[106].mxu1 }
 0x918   : > { %4144 = vst [vmem:[#allocation5 + $0x18] sm:$0xf] %v5341_v31  ;;  %v5342_v26 = vpack.c.bf16 %v5933_v38, %v5933_v38  ;;  %v4094_v45 = vpop.f32.mrb[107].mxu1 }
 0x919   : > { %v5380_v35 = vpack.c.bf16 %v4094_v45, %v4091_v53  ;;  %v4148_v44 = vld [vmem:[#allocation5 + $0x8] sm:$0xf]  ;;  %v7320_v24 = vld [vmem:[#allocation5 + $0xc] sm:$0xf] }
 0x91a   : > { %4145 = vst [vmem:[#allocation5 + $0x1c] sm:$0x3] %v5342_v26  ;;  %v4147_v47 = vld [vmem:[#allocation5 + $0x4] sm:$0xf]  ;;  %v4151_v51 = vld [vmem:[#allocation5] sm:$0xc]  ;;  %v7323_v21 = vcombine.low %v4148_v44, %v7320_v24 }
 0x91b   : > { %5386 = vst [vmem:[#allocation5 + $0x10] sm:$0xff] %v5380_v35   ;;  %v5264_v11 = vcombine.low %v4151_v51, %v4147_v47  ;;  %v4156_v8 = vld [vmem:[#allocation5 + $0x4] sm:$0x8]  ;;  %v4146_v59 = vld [vmem:[#allocation5] sm:$0xf] }
 0x91c   : > { %v4192_v29 = vshrl.u32 %v7323_v21, 16  ;;  %v4195_v10 = vshll.u32 %v7323_v21, 16  ;;  %v5269_v18 = vcombine.low %v4156_v8, %v4148_v44  ;;  %v5261_v28 = vcombine.low %v4146_v59, %v4147_v47  ;;  %v4153_v23 = vld [vmem:[#allocation5 + $0x4] sm:$0xe]  ;;  %v6280_v8 = vld [vmem:[#allocation8 + $0x4f0] sm:$0xff]  }
 0x91d   : > { %v4184_v34 = vshrl.u32 %v5264_v11, 16  ;;  %v4187_v46 = vshll.u32 %v5264_v11, 16  ;;  %v5266_v33 = vcombine.low %v4153_v23, %v4148_v44  ;;  %v6275_v35 = vld [vmem:[#allocation8 + $0x4d8] sm:$0xff]   ;;  %v6278_v47 = vld [vmem:[#allocation8 + $0x4e0] sm:$0xff]  }
 0x91e   : > { %v4194_v37 = vrot.slane %v4192_v29, 2  ;;  %v4197_v58 = vrot.slane %v4195_v10, 3  ;;  %v4237_v19 = vshrl.u32 %v5269_v18, 16  ;;  %v4240_v57 = vshll.u32 %v5269_v18, 16  ;;  %v4158_v29 = vld [vmem:[#allocation5 + $0x8] sm:$0xc] }
 0x91f   : > { %v4186_v0 = vrot.slane %v4184_v34, 2  ;;  %v4189_v25 = vrot.slane %v4187_v46, 3  ;;  %v7327_v27 = vld [vmem:[#allocation5 + $0x18] sm:$0xf]  ;;  %v4221_v9 = vrot.slane %v5266_v33, 1  ;;  %v6281_v18 = vld [vmem:[#allocation8 + $0x4f8] sm:$0xff]   ;;  %v5271_v34 = vcombine.low %v4158_v29, %v7320_v24 }
 0x920   : > { %v4198_v52 = vor.u32 %v4197_v58, %v4194_v37  ;;  %v4239_v17 = vrot.slane %v4237_v19, 3  ;;  %v4242_v62 = vrot.slane %v4240_v57, 4  ;;  %v4155_v61 = vld [vmem:[#allocation5 + $0x18] sm:$0x1] }
 0x921   : > { %v4190_v13 = vor.u32 %v4189_v25, %v4186_v0  ;;  %v4159_v37 = vld [vmem:[#allocation5 + $0x1c] sm:$0x3]  ;;  %v4272_v58 = vrot.slane %v5271_v34, 2 }
 0x922   : > { %v7329_v55 = vld [vmem:[#allocation5 + $0x10] sm:$0xf]  ;;  %v4152_v7 = vld [vmem:[#allocation5 + $0x14] sm:$0x7]  ;;  %v4243_v56 = vor.u32 %v4242_v62, %v4239_v17  ;;  %v5273_v25 = vcombine.low %v7327_v27, %v4159_v37 }
 0x923   : > { %v7331_v30 = vld [vmem:[#allocation5 + $0x14] sm:$0xf]  ;;  %v4199_v63 = vsel %vm4182_vm11, %v4190_v13, %v4198_v52  ;;  %v5265_v50 = vcombine.low %v7329_v55, %v4152_v7  ;;  %v5267_v12 = vcombine.low %v7320_v24, %v7329_v55  ;;  %v5263_v51 = vcombine.low %v7329_v55, %v7329_v55  ;;  %v6285_v24 = vld [vmem:[#allocation14] sm:$0xff]  }
 0x924   : > { %v5270_v36 = vcombine.low %v7331_v30, %v7327_v27  ;;  %4641 = vmatprep.mubr.bf16.mxu0 %v4199_v63  ;;  %v5268_v26 = vcombine.low %v7331_v30, %v4155_v61  ;;  %v5272_v10 = vcombine.low %v7329_v55, %v7331_v30  ;;  %v4275_v59 = vrot.slane %v5273_v25, 2  ;;  %v5274_v55 = vld [vmem:[#allocation10 + $0x4] ss:$0 sm:$0xff] }
 0x925   : > { %4642 = vmatmul.mubr.bf16.vlgmr.msra.gmra.mrb[104].mxu0 %v5261_v28  ;;  %v4201_v15 = vshrl.u32 %v5265_v50, 16  ;;  %v4204_v40 = vshll.u32 %v5265_v50, 16  ;;  %v4245_v54 = vshrl.u32 %v5267_v12, 16  ;;  %v4248_v60 = vshll.u32 %v5267_v12, 16 }
 0x926   : > { %5935 = vmatpush3.bf16.msra.mxu0 %v6264_v5  ;;  %v4254_v32 = vshrl.u32 %v5270_v36, 16  ;;  %v4257_v6 = vshll.u32 %v5270_v36, 16  ;;  %v4222_v16 = vrot.slane %v5267_v12, 1  ;;  %v4224_v44 = vrot.slane %v5268_v26, 1 }
 0x927   : > { %5936 = vmatprep.subr.bf16.mxu0 %v6493_v41  ;;  %v4203_v22 = vrot.slane %v4201_v15, 2  ;;  %v4206_v3 = vrot.slane %v4204_v40, 3  ;;  %v4247_v20 = vrot.slane %v4245_v54, 3  ;;  %v4250_v43 = vrot.slane %v4248_v60, 4 }
 0x928   : > { %v4256_v14 = vrot.slane %v4254_v32, 3  ;;  %v4259_v49 = vrot.slane %v4257_v6, 4  ;;  %v4223_v38 = vsel %vm1308_vm0, %v4221_v9, %v4222_v16  ;;  %v4225_v11 = vsel %vm1308_vm0, %v4222_v16, %v4224_v44 }
 0x929   : > { %v4207_v1 = vor.u32 %v4206_v3, %v4203_v22  ;;  %v4251_v2 = vor.u32 %v4250_v43, %v4247_v20  ;;  %v4273_v46 = vrot.slane %v5272_v10, 2 }
 0x92a   : > { %5937 = vmatpush3.bf16.msra.mxu0 %v6267_v42  ;;  %v4260_v4 = vor.u32 %v4259_v49, %v4256_v14 }
 0x92b   : > { %v4208_v31 = vsel %vm4182_vm11, %v4198_v52, %v4207_v1  ;;  %v4252_v53 = vsel %vm4235_vm12, %v4243_v56, %v4251_v2  ;;  %5938 = vmatprep.subr.bf16.mxu0 %v6493_v41  ;;  %v4274_v0 = vsel %vm1730_vm5, %v4272_v58, %v4273_v46  ;;  %v4276_v52 = vsel %vm1730_vm5, %v4273_v46, %v4275_v59 }
 0x92c   : > { %4649 = vmatprep.mubr.bf16.mxu0 %v4208_v31  ;;  %4697 = vmatprep.mubr.bf16.mxu1 %v4252_v53  ;;  %v4261_v45 = vsel %vm4235_vm12, %v4251_v2, %v4260_v4 }
 0x92d   : > { %4650 = vmatmul.mubr.bf16.gmra.mrb[108].mxu0 %v7323_v21  ;;  %4698 = vmatmul.mubr.bf16.vlgmr.msra.gmra.mrb[108].mxu1 %v4223_v38  ;;  %v6279_v21 = vld [vmem:[#allocation8 + $0x4e8] sm:$0xff]  }
 0x92e   : > { %5939 = vmatpush3.bf16.msra.mxu0 %v6273_v48  ;;  %4705 = vmatprep.mubr.bf16.mxu1 %v4261_v45 }
 0x92f   : > { %4657 = vmatprep.mubr.bf16.mxu0 %v4207_v1  ;;  %5940 = vmatprep.subr.bf16.mxu0 %v6493_v41 }
 0x932   : > { %5941 = vmatpush3.bf16.msra.mxu0 %v6275_v35 }
 0x933   : > { %5942 = vmatprep.subr.bf16.mxu0 %v6493_v41 }
 0x935   : > { %4658 = vmatmul.mubr.bf16.gmra.mrb[112].mxu0 %v5263_v51  ;;  %4706 = vmatmul.mubr.bf16.gmra.mrb[112].mxu1 %v4225_v11 }
 0x936   : > { %5943 = vmatpush3.bf16.msra.mxu0 %v6278_v47  ;;  %4713 = vmatprep.mubr.bf16.mxu1 %v4260_v4 }
 0x937   : > { %5944 = vmatprep.subr.bf16.mxu0 %v6493_v41  ;;  %5950 = vmatprep.mubr.msk.bf16.mxu0 %vm6494_vm7, %v6493_v41 }
 0x93a   : > { %5945 = vmatpush3.bf16.msra.mxu0 %v6279_v21 }
 0x93b   : > { %5946 = vmatprep.subr.bf16.mxu0 %v6493_v41 }
 0x93d   : > { %4714 = vmatmul.mubr.bf16.gmra.mrb[116].mxu1 %v4224_v44 }
 0x93e   : > { %5947 = vmatpush3.bf16.msra.mxu0 %v6280_v8  ;;  %5968 = vmatprep.mubr.msk.bf16.mxu1 %vm4823_vm13, %v6285_v24 }
 0x93f   : > { %5948 = vmatprep.subr.bf16.mxu0 %v6493_v41 }
 0x942   : > { %5949 = vmatpush3.bf16.msra.mxu0 %v6281_v18 }
 0x945   : > { %5951 = vmatmul.mubr.bf16.vlgmr.msra.gmra.mrb[116].mxu0 %v4274_v0 }
 0x946   : > { %5954 = vmatprep.mubr.msk.bf16.mxu0 %vm6494_vm7, %v6493_v41 }
 0x94d   : > { %5955 = vmatmul.mubr.bf16.gmra.mrb[120].mxu0 %v4276_v52 }
 0x94e   : > { %5958 = vmatprep.mubr.msk.bf16.mxu0 %vm6494_vm7, %v6493_v41 }
 0x955   : > { %5959 = vmatmul.mubr.bf16.gmra.mrb[124].mxu0 %v4275_v59 }
 0x9f8   : > { %v5720_v19 = vpop.f32.mrb[104].mxu0 }
 0x9f9   : > { %v5721_v57 = vpop.f32.mrb[105].mxu0 }
 0x9fa   : > { %v5722_v13 = vadd.f32 %v5721_v57, %v5720_v19  ;;  %v5723_v27 = vpop.f32.mrb[106].mxu0 }
 0x9fb   : > { %v5724_v5 = vpop.f32.mrb[107].mxu0 }
 0x9fc   : > { %v5725_v28 = vadd.f32 %v5724_v5, %v5723_v27  ;;  %v4644_v12 = vadd.f32 %v5722_v13, %v5274_v55 }
 0x9fe   : > { %v4647_v40 = vadd.f32 %v5725_v28, %v5274_v55 }
 0xa00   : > { %v5726_v7 = vpop.f32.mrb[108].mxu0  ;;  %v5754_v30 = vpop.f32.mrb[108].mxu1 }
 0xa01   : > { %v5727_v63 = vpop.f32.mrb[109].mxu0  ;;  %v5755_v50 = vpop.f32.mrb[109].mxu1 }
 0xa02   : > { %v5728_v23 = vadd.f32 %v5727_v63, %v5726_v7  ;;  %v5756_v36 = vadd.f32 %v5755_v50, %v5754_v30  ;;  %v5729_v41 = vpop.f32.mrb[110].mxu0  ;;  %v5757_v17 = vpop.f32.mrb[110].mxu1 }
 0xa03   : > { %v5730_v62 = vpop.f32.mrb[111].mxu0  ;;  %v5758_v15 = vpop.f32.mrb[111].mxu1 }
 0xa04   : > { %v5731_v54 = vadd.f32 %v5730_v62, %v5729_v41  ;;  %v5759_v60 = vadd.f32 %v5758_v15, %v5757_v17  ;;  %v4700_v42 = vadd.f32 %v5756_v36, %v4644_v12  ;;  %v4652_v20 = vadd.f32 %v5728_v23, %v5274_v55 }
 0xa05   : > { %v4832_v62 = vsel %vm4830_vm14, 4294967295, %v6492_v39 }
 0xa06   : > { %v4703_v33 = vadd.f32 %v5759_v60, %v4647_v40  ;;  %v4655_v2 = vadd.f32 %v5731_v54, %v5274_v55  ;;  %v4833_v60 = vsel %vm1703_vm4, %v4832_v62, 0 }
 0xa08   : > { %v5732_v32 = vpop.f32.mrb[112].mxu0  ;;  %v5760_v6 = vpop.f32.mrb[112].mxu1 }
 0xa09   : > { %v5733_v22 = vpop.f32.mrb[113].mxu0  ;;  %v5761_v3 = vpop.f32.mrb[113].mxu1 }
 0xa0a   : > { %v5734_v43 = vadd.f32 %v5733_v22, %v5732_v32  ;;  %v5762_v16 = vadd.f32 %v5761_v3, %v5760_v6  ;;  %v5735_v14 = vpop.f32.mrb[114].mxu0  ;;  %v5763_v49 = vpop.f32.mrb[114].mxu1  ;;  %v6286_v6 = vld [vmem:[#allocation14 + $0x8] sm:$0xff]  }
 0xa0b   : > { %v5736_v1 = vpop.f32.mrb[115].mxu0  ;;  %v5764_v56 = vpop.f32.mrb[115].mxu1 }
 0xa0c   : > { %v5765_v61 = vadd.f32 %v5764_v56, %v5763_v49  ;;  %v4708_v9 = vadd.f32 %v5762_v16, %v4652_v20  ;;  %v4660_v53 = vadd.f32 %v5734_v43, %v5274_v55 }
 0xa0e   : > { %v4711_v48 = vadd.f32 %v5765_v61, %v4655_v2 }
 0xa10   : > { %v5766_v4 = vpop.f32.mrb[116].mxu1 }
 0xa11   : > { %v5767_v31 = vpop.f32.mrb[117].mxu1 }
 0xa12   : > { %v5768_v38 = vadd.f32 %v5767_v31, %v5766_v4  ;;  %v5769_v26 = vpop.f32.mrb[118].mxu1 }
 0xa13   : > { %v5770_v45 = vpop.f32.mrb[119].mxu1 }
 0xa14   : > { %v4716_v35 = vadd.f32 %v5768_v38, %v4660_v53 }
 0xa18   : > { %v4755_v44 = vpop.f32.mrb[116].mxu0 }
 0xa19   : > { %v4756_v47 = vadd.f32 %v4755_v44, %v4700_v42  ;;  %v5952_v51 = vpop.f32.mrb[117].mxu0 }
 0xa1a   : > { %v4758_v11 = vpop.f32.mrb[118].mxu0 }
 0xa1b   : > { %v4777_v21 = vmax.f32 %v4756_v47, 0.0  ;;  %v4759_v8 = vadd.f32 %v4758_v11, %v4703_v33  ;;  %v5953_v29 = vpop.f32.mrb[119].mxu0 }
 0xa1d   : > { %v4778_v10 = vmax.f32 %v4759_v8, 0.0  ;;  %v4787_v18 = vrot.slane %v4777_v21, 1 }
 0xa1f   : > { %v4788_v34 = vrot.slane %v4778_v10, 1 }
 0xa20   : > { %v4763_v46 = vpop.f32.mrb[120].mxu0 }
 0xa21   : > { %v4764_v37 = vadd.f32 %v4763_v46, %v4708_v9  ;;  %v5956_v58 = vpop.f32.mrb[121].mxu0  ;;  %v4789_v0 = vsel %vm1308_vm0, %v4787_v18, %v4788_v34 }
 0xa22   : > { %v4766_v25 = vpop.f32.mrb[122].mxu0  ;;  %v4801_v59 = vmax.f32 %v4777_v21, %v4789_v0 }
 0xa23   : > { %v4779_v52 = vmax.f32 %v4764_v37, 0.0  ;;  %v4767_v24 = vadd.f32 %v4766_v25, %v4711_v48  ;;  %v5957_v19 = vpop.f32.mrb[123].mxu0 }
 0xa25   : > { %v4790_v57 = vrot.slane %v4779_v52, 1  ;;  %v4780_v13 = vmax.f32 %v4767_v24, 0.0 }
 0xa27   : > { %v4792_v27 = vrot.slane %v4780_v13, 1  ;;  %v4791_v5 = vsel %vm1308_vm0, %v4788_v34, %v4790_v57 }
 0xa28   : > { %v4771_v28 = vpop.f32.mrb[124].mxu0  ;;  %v4802_v55 = vmax.f32 %v4778_v10, %v4791_v5 }
 0xa29   : > { %v4772_v7 = vadd.f32 %v4771_v28, %v4716_v35  ;;  %v5960_v30 = vpop.f32.mrb[125].mxu0  ;;  %v4793_v63 = vsel %vm1308_vm0, %v4790_v57, %v4792_v27 }
 0xa2a   : > { %v4774_v50 = vpop.f32.mrb[126].mxu0  ;;  %v4806_v12 = vpack.c.bf16 %v4802_v55, %v4801_v59  ;;  %v4803_v23 = vmax.f32 %v4779_v52, %v4793_v63 }
 0xa2b   : > { %v4781_v36 = vmax.f32 %v4772_v7, 0.0  ;;  %v5961_v41 = vpop.f32.mrb[127].mxu0 }
 0xa2c   : > { %5962 = vmatprep.subr.bf16.mxu1 %v4806_v12 }
 0xa2d   : > { %v4794_v17 = vrot.slane %v4781_v36, 1  ;;  %5963 = vmatpush3.bf16.msra.mxu1 %v4806_v12 }
 0xa2f   : > { %v4805_v15 = vmax.f32 %v4781_v36, %v4794_v17  ;;  %v4795_v40 = vsel %vm1308_vm0, %v4792_v27, %v4794_v17 }
 0xa30   : > { %v4804_v54 = vmax.f32 %v4780_v13, %v4795_v40 }
 0xa31   : > { %v4808_v42 = vpack.c.bf16 %v4805_v15, %v4805_v15 }
 0xa32   : > { %v4807_v33 = vpack.c.bf16 %v4804_v54, %v4803_v23 }
 0xa33   : > { %v4835_v32 = vand.u32 %v4833_v60, %v4808_v42 }
 0xa34   : > { %5964 = vmatprep.subr.bf16.mxu1 %v4807_v33 }
 0xa35   : > { %5965 = vmatpush3.bf16.msra.mxu1 %v4807_v33 }
 0xa36   : > { %5966 = vmatprep.subr.bf16.mxu1 %v4835_v32 }
 0xa39   : > { %5967 = vmatpush3.bf16.msra.mxu1 %v4835_v32 }
 0xa3c   : > { %5969 = vmatmul.mubr.msk.bf16.vlgmr.msra.gmra.mrb[120].mxu1 %vm4823_vm13, %v6286_v6 }
 0xb0f   : > { %v5970_v39 = vpop.f32.mrb[120].mxu1 }
 0xb10   : > { %v5345_v22 = vpack.c.bf16 %v5970_v39, %v5970_v39  ;;  %v4871_v3 = vpop.f32.mrb[121].mxu1 }
 0xb11   : > { %v5343_v20 = vpack.c.bf16 %v4871_v3, %v4871_v3  ;;  %v5971_v43 = vpop.f32.mrb[122].mxu1 }
 0xb12   : > { %4905 = vst.msk [vmem:[%s420_s19 + $0x8] sm:$0xf] %vm4902_vm15, %v5345_v22  ;;  %v5346_v16 = vpack.c.bf16 %v5971_v43, %v5971_v43  ;;  %v4874_v14 = vpop.f32.mrb[123].mxu1 }
 0xb13   : > { %4903 = vst.msk [vmem:[%s420_s19] sm:$0xf] %vm4902_vm15, %v5343_v20  ;;  %v5344_v49 = vpack.c.bf16 %v4874_v14, %v4874_v14 }
 0xb14   : > { %4906 = vst.msk [vmem:[%s420_s19 + $0xc] sm:$0xf] %vm4902_vm15, %v5346_v16 }
 0xb15   : > { %4904 = vst.msk [vmem:[%s420_s19 + $0x4] sm:$0xf] %vm4902_vm15, %v5344_v49 }
 0xb16 PF: > { %s23_s30 = sadd.s32 1, %s6477_s30  }
 0xb17   : > { %p20_p6 = scmp.ge.s32.totalorder %s23_s30, 4  }
 0xb19   :  { %22 = sbr.rel (!%p20_p6) target bundleno = 4 (0x4), region = 122 }
 0xb20   :  { %4928 = vsyncpa [#allocation7], 1 }
 0xb21   :  { %4930 = vsyncpa [#allocation7 + $0x1], 1 }
 0xb22   :  { %4931 = vsyncpa [#allocation9], 1 }
 0xb23   :  { %4932 = vsyncpa [#allocation12], 1 }
 0xb24   :  { %4933 = vsyncpa [#allocation15], 1 }

</bundles_post_ra>
